<compile_context>
chip_gen: v5e
topology: v5e:2x2
jax: 0.10.0
libtpu: 0.0.40
codegen_flags: <defaults>
</compile_context>

<pallas_src>
import jax
import jax.numpy as jnp
from jax.experimental import pallas as pl
from jax.experimental.pallas import tpu as pltpu


def _leaky_relu(h, slope=0.2):
    return jnp.where(h > 0, h, slope * h)


def _round_up(n, m):
    return ((n + m - 1) // m) * m


def discriminator_kernel(x_ref,
                         w1_ref, b1_ref,
                         w2_ref, b2_ref,
                         w3_ref, b3_ref,
                         w4_ref, b4_ref,
                         o_ref):
    # fc1 -> leaky_relu(0.2): bf16 MXU inputs, f32 accumulate, f32 epilogue,
    # single cast back to bf16 for the next layer.
    h = jnp.dot(x_ref[...].astype(jnp.bfloat16), w1_ref[...],
                preferred_element_type=jnp.float32)
    h = _leaky_relu(h + b1_ref[...]).astype(jnp.bfloat16)
    # dropout1 (eval mode -> identity)

    # fc2 -> leaky_relu(0.2)
    h = jnp.dot(h, w2_ref[...], preferred_element_type=jnp.float32)
    h = _leaky_relu(h + b2_ref[...]).astype(jnp.bfloat16)
    # dropout2 (identity)

    # fc3 -> leaky_relu(0.2)
    h = jnp.dot(h, w3_ref[...], preferred_element_type=jnp.float32)
    h = _leaky_relu(h + b3_ref[...]).astype(jnp.bfloat16)
    # dropout3 (identity)

    # fc4 (zero-padded to 128 out lanes) -> sigmoid; lane-dense bf16 store.
    h = jnp.dot(h, w4_ref[...], preferred_element_type=jnp.float32) + b4_ref[...]
    o_ref[...] = jax.nn.sigmoid(h).astype(o_ref.dtype)


def discriminator_forward(x, params, *, tm=512):
    """x: (B, d_input_dim) float32.  params: dict from init_params()."""
    B, D = x.shape
    assert D == params["w1"].shape[0], "input feature dim mismatch"
    n_pad = params["w4"].shape[1]              # fc4 out-dim padded to 128 lanes

    # Adaptive batch tile: don't pad tiny batches up to a full 512-row tile.
    tm_eff = min(tm, _round_up(B, 16))
    b_pad = pl.cdiv(B, tm_eff) * tm_eff
    if b_pad != B:
        x = jnp.pad(x, ((0, b_pad - B), (0, 0)))

    weight_names = ("w1", "b1", "w2", "b2", "w3", "b3", "w4", "b4")
    weight_specs = [
        # Full-extent block, constant index -> DMA'd once, VMEM-resident.
        pl.BlockSpec(params[name].shape, lambda i: (0, 0))
        for name in weight_names
    ]
    weight_bytes = sum(params[n].size * params[n].dtype.itemsize
                       for n in weight_names)

    cost = pl.CostEstimate(
        flops=2 * b_pad * (D * 1024 + 1024 * 512 + 512 * 256 + 256 * n_pad),
        transcendentals=b_pad * n_pad,
        bytes_accessed=x.size * x.dtype.itemsize + b_pad * n_pad * 2 + weight_bytes,
    )

    out = pl.pallas_call(
        discriminator_kernel,
        out_shape=jax.ShapeDtypeStruct((b_pad, n_pad), jnp.bfloat16),
        grid=(b_pad // tm_eff,),
        in_specs=[pl.BlockSpec((tm_eff, D), lambda i: (i, 0))] + weight_specs,
        out_specs=pl.BlockSpec((tm_eff, n_pad), lambda i: (i, 0)),
        compiler_params=pltpu.CompilerParams(
            dimension_semantics=("parallel",),
            vmem_limit_bytes=48 * 1024 * 1024),
        cost_estimate=cost,
    )(x,
      params["w1"], params["b1"],
      params["w2"], params["b2"],
      params["w3"], params["b3"],
      params["w4"], params["b4"])

    return out[:B, :1].astype(jnp.float32)


def init_params(key, d_input_dim, *, out_pad=128):
    """PyTorch-style Linear init U(-1/sqrt(fan_in), 1/sqrt(fan_in)).
    Weights stored transposed (in, out) in bfloat16; biases (1, out) in f32.
    fc1 weight is stored unpadded; fc4 out-dim is zero-padded to 128 lanes."""
    dims = [(d_input_dim, 1024), (1024, 512), (512, 256), (256, 1)]
    params = {}
    for idx, (fan_in, fan_out) in enumerate(dims, start=1):
        key, kw, kb = jax.random.split(key, 3)
        bound = 1.0 / (fan_in ** 0.5)
        w = jax.random.uniform(kw, (fan_in, fan_out), jnp.float32,
                               minval=-bound, maxval=bound)
        b = jax.random.uniform(kb, (1, fan_out), jnp.float32,
                               minval=-bound, maxval=bound)
        if idx == 4 and fan_out < out_pad:
            w = jnp.pad(w, ((0, 0), (0, out_pad - fan_out)))
            b = jnp.pad(b, ((0, 0), (0, out_pad - fan_out)))
        params[f"w{idx}"] = w.astype(jnp.bfloat16)
        params[f"b{idx}"] = b
    return params


def reference_forward(x, params):
    """Plain-JAX reference using the same bf16 weights / bf16 activations."""
    h = x
    for i in (1, 2, 3):
        z = jnp.dot(h.astype(jnp.bfloat16), params[f"w{i}"],
                    preferred_element_type=jnp.float32) + params[f"b{i}"]
        h = jnp.where(z > 0, z, 0.2 * z).astype(jnp.bfloat16)
    z = jnp.dot(h, params["w4"],
                preferred_element_type=jnp.float32) + params["b4"]
    return jax.nn.sigmoid(z)[:, :1]


if __name__ == "__main__":
    key = jax.random.PRNGKey(0)
    d_input_dim = 64
    batch = 8

    key, kx = jax.random.split(key)
    x = jax.random.normal(kx, (batch, d_input_dim), jnp.float32)
    params = init_params(key, d_input_dim)

    out = discriminator_forward(x, params)
    out = jax.block_until_ready(out)

    # sanity checks: shape and sigmoid range
    assert out.shape == (batch, 1), out.shape
    assert bool(jnp.all((out >= 0.0) & (out <= 1.0))), "sigmoid out of range"

    # reference check (same bf16 weights/activations; kernel output is bf16,
    # so allow ~1 bf16 ulp of a value in [0, 1]).
    ref = reference_forward(x, params)
    assert bool(jnp.allclose(out, ref, atol=5e-3, rtol=5e-3)), "mismatch vs reference"

    print("KERNEL_OK")
</pallas_src>

<mosaic_0001>
module attributes {stable_mosaic.version = 11 : i64} {
  func.func @discriminator_kernel(%arg0: i32, %arg1: memref<16x64xf32, #tpu.memory_space<vmem>>, %arg2: memref<64x1024xbf16, #tpu.memory_space<vmem>>, %arg3: memref<1x1024xf32, #tpu.memory_space<vmem>>, %arg4: memref<1024x512xbf16, #tpu.memory_space<vmem>>, %arg5: memref<1x512xf32, #tpu.memory_space<vmem>>, %arg6: memref<512x256xbf16, #tpu.memory_space<vmem>>, %arg7: memref<1x256xf32, #tpu.memory_space<vmem>>, %arg8: memref<256x128xbf16, #tpu.memory_space<vmem>>, %arg9: memref<1x128xf32, #tpu.memory_space<vmem>>, %arg10: memref<16x128xbf16, #tpu.memory_space<vmem>>) attributes {dimension_semantics = [#tpu.dimension_semantics<parallel>], iteration_bounds = array<i64: 1>, scalar_prefetch = 0 : i64, scratch_operands = 0 : i64, tpu.core_type = #tpu.core_type<tc>, window_params = [{transform_indices = @transform_0, window_bounds = array<i64: 16, 64>}, {pipeline_mode = #tpu.pipeline_mode<synchronous>, transform_indices = @transform_1, window_bounds = array<i64: 64, 1024>}, {pipeline_mode = #tpu.pipeline_mode<synchronous>, transform_indices = @transform_2, window_bounds = array<i64: 1, 1024>}, {pipeline_mode = #tpu.pipeline_mode<synchronous>, transform_indices = @transform_3, window_bounds = array<i64: 1024, 512>}, {pipeline_mode = #tpu.pipeline_mode<synchronous>, transform_indices = @transform_4, window_bounds = array<i64: 1, 512>}, {pipeline_mode = #tpu.pipeline_mode<synchronous>, transform_indices = @transform_5, window_bounds = array<i64: 512, 256>}, {pipeline_mode = #tpu.pipeline_mode<synchronous>, transform_indices = @transform_6, window_bounds = array<i64: 1, 256>}, {pipeline_mode = #tpu.pipeline_mode<synchronous>, transform_indices = @transform_7, window_bounds = array<i64: 256, 128>}, {pipeline_mode = #tpu.pipeline_mode<synchronous>, transform_indices = @transform_8, window_bounds = array<i64: 1, 128>}, {transform_indices = @transform_9, window_bounds = array<i64: 16, 128>}]} {
    %c0 = arith.constant 0 : index
    %c0_0 = arith.constant 0 : index
    %0 = vector.load %arg1[%c0, %c0_0] : memref<16x64xf32, #tpu.memory_space<vmem>>, vector<16x64xf32>
    %1 = arith.truncf %0 : vector<16x64xf32> to vector<16x64xbf16>
    %c0_1 = arith.constant 0 : index
    %c0_2 = arith.constant 0 : index
    %2 = vector.load %arg2[%c0_1, %c0_2] : memref<64x1024xbf16, #tpu.memory_space<vmem>>, vector<64x1024xbf16>
    %cst = arith.constant dense<0.000000e+00> : vector<16x1024xf32>
    %3 = tpu.matmul %1, %2, %cst {dimension_numbers = #tpu.dot_dimension_numbers<[1], [0], [0], [1], [0, 0, 1, 1], [], []>} : vector<16x64xbf16>, vector<64x1024xbf16>, vector<16x1024xf32> -> vector<16x1024xf32>
    %c0_3 = arith.constant 0 : index
    %c0_4 = arith.constant 0 : index
    %4 = vector.load %arg3[%c0_3, %c0_4] : memref<1x1024xf32, #tpu.memory_space<vmem>>, vector<1x1024xf32>
    %5 = vector.broadcast %4 : vector<1x1024xf32> to vector<16x1024xf32>
    %6 = arith.addf %3, %5 : vector<16x1024xf32>
    %cst_5 = arith.constant 0.000000e+00 : f32
    %7 = vector.broadcast %cst_5 : f32 to vector<16x1024xf32>
    %8 = arith.cmpf ogt, %6, %7 : vector<16x1024xf32>
    %cst_6 = arith.constant 2.000000e-01 : f32
    %9 = vector.broadcast %cst_6 : f32 to vector<16x1024xf32>
    %10 = arith.mulf %9, %6 : vector<16x1024xf32>
    %11 = arith.select %8, %6, %10 : vector<16x1024xi1>, vector<16x1024xf32>
    %12 = arith.truncf %11 : vector<16x1024xf32> to vector<16x1024xbf16>
    %c0_7 = arith.constant 0 : index
    %c0_8 = arith.constant 0 : index
    %13 = vector.load %arg4[%c0_7, %c0_8] : memref<1024x512xbf16, #tpu.memory_space<vmem>>, vector<1024x512xbf16>
    %cst_9 = arith.constant dense<0.000000e+00> : vector<16x512xf32>
    %14 = tpu.matmul %12, %13, %cst_9 {dimension_numbers = #tpu.dot_dimension_numbers<[1], [0], [0], [1], [0, 0, 1, 1], [], []>} : vector<16x1024xbf16>, vector<1024x512xbf16>, vector<16x512xf32> -> vector<16x512xf32>
    %c0_10 = arith.constant 0 : index
    %c0_11 = arith.constant 0 : index
    %15 = vector.load %arg5[%c0_10, %c0_11] : memref<1x512xf32, #tpu.memory_space<vmem>>, vector<1x512xf32>
    %16 = vector.broadcast %15 : vector<1x512xf32> to vector<16x512xf32>
    %17 = arith.addf %14, %16 : vector<16x512xf32>
    %cst_12 = arith.constant 0.000000e+00 : f32
    %18 = vector.broadcast %cst_12 : f32 to vector<16x512xf32>
    %19 = arith.cmpf ogt, %17, %18 : vector<16x512xf32>
    %cst_13 = arith.constant 2.000000e-01 : f32
    %20 = vector.broadcast %cst_13 : f32 to vector<16x512xf32>
    %21 = arith.mulf %20, %17 : vector<16x512xf32>
    %22 = arith.select %19, %17, %21 : vector<16x512xi1>, vector<16x512xf32>
    %23 = arith.truncf %22 : vector<16x512xf32> to vector<16x512xbf16>
    %c0_14 = arith.constant 0 : index
    %c0_15 = arith.constant 0 : index
    %24 = vector.load %arg6[%c0_14, %c0_15] : memref<512x256xbf16, #tpu.memory_space<vmem>>, vector<512x256xbf16>
    %cst_16 = arith.constant dense<0.000000e+00> : vector<16x256xf32>
    %25 = tpu.matmul %23, %24, %cst_16 {dimension_numbers = #tpu.dot_dimension_numbers<[1], [0], [0], [1], [0, 0, 1, 1], [], []>} : vector<16x512xbf16>, vector<512x256xbf16>, vector<16x256xf32> -> vector<16x256xf32>
    %c0_17 = arith.constant 0 : index
    %c0_18 = arith.constant 0 : index
    %26 = vector.load %arg7[%c0_17, %c0_18] : memref<1x256xf32, #tpu.memory_space<vmem>>, vector<1x256xf32>
    %27 = vector.broadcast %26 : vector<1x256xf32> to vector<16x256xf32>
    %28 = arith.addf %25, %27 : vector<16x256xf32>
    %cst_19 = arith.constant 0.000000e+00 : f32
    %29 = vector.broadcast %cst_19 : f32 to vector<16x256xf32>
    %30 = arith.cmpf ogt, %28, %29 : vector<16x256xf32>
    %cst_20 = arith.constant 2.000000e-01 : f32
    %31 = vector.broadcast %cst_20 : f32 to vector<16x256xf32>
    %32 = arith.mulf %31, %28 : vector<16x256xf32>
    %33 = arith.select %30, %28, %32 : vector<16x256xi1>, vector<16x256xf32>
    %34 = arith.truncf %33 : vector<16x256xf32> to vector<16x256xbf16>
    %c0_21 = arith.constant 0 : index
    %c0_22 = arith.constant 0 : index
    %35 = vector.load %arg8[%c0_21, %c0_22] : memref<256x128xbf16, #tpu.memory_space<vmem>>, vector<256x128xbf16>
    %cst_23 = arith.constant dense<0.000000e+00> : vector<16x128xf32>
    %36 = tpu.matmul %34, %35, %cst_23 {dimension_numbers = #tpu.dot_dimension_numbers<[1], [0], [0], [1], [0, 0, 1, 1], [], []>} : vector<16x256xbf16>, vector<256x128xbf16>, vector<16x128xf32> -> vector<16x128xf32>
    %c0_24 = arith.constant 0 : index
    %c0_25 = arith.constant 0 : index
    %37 = vector.load %arg9[%c0_24, %c0_25] : memref<1x128xf32, #tpu.memory_space<vmem>>, vector<1x128xf32>
    %38 = vector.broadcast %37 : vector<1x128xf32> to vector<16x128xf32>
    %39 = arith.addf %36, %38 : vector<16x128xf32>
    %40 = arith.negf %39 : vector<16x128xf32>
    %41 = math.exp %40 : vector<16x128xf32>
    %cst_26 = arith.constant 1.000000e+00 : f32
    %42 = vector.broadcast %cst_26 : f32 to vector<16x128xf32>
    %43 = arith.addf %42, %41 : vector<16x128xf32>
    %44 = arith.divf %42, %43 : vector<16x128xf32>
    %45 = arith.truncf %44 : vector<16x128xf32> to vector<16x128xbf16>
    %c0_27 = arith.constant 0 : index
    %c0_28 = arith.constant 0 : index
    %46 = vector.load %arg10[%c0_27, %c0_28] : memref<16x128xbf16, #tpu.memory_space<vmem>>, vector<16x128xbf16>
    tpu.vector_store %arg10[%c0_27, %c0_28], %45 {strides = array<i32>} : memref<16x128xbf16, #tpu.memory_space<vmem>>, vector<16x128xbf16>,
    return
  }
  func.func @transform_0(%arg0: i32) -> (i32, i32) {
    %c0_i32 = arith.constant 0 : i32
    %c0_i32_0 = arith.constant 0 : i32
    return %arg0, %c0_i32 : i32, i32
  }
  func.func @transform_1(%arg0: i32) -> (i32, i32) {
    %c0_i32 = arith.constant 0 : i32
    %c0_i32_0 = arith.constant 0 : i32
    %c0_i32_1 = arith.constant 0 : i32
    return %c0_i32, %c0_i32_0 : i32, i32
  }
  func.func @transform_2(%arg0: i32) -> (i32, i32) {
    %c0_i32 = arith.constant 0 : i32
    %c0_i32_0 = arith.constant 0 : i32
    %c0_i32_1 = arith.constant 0 : i32
    return %c0_i32, %c0_i32_0 : i32, i32
  }
  func.func @transform_3(%arg0: i32) -> (i32, i32) {
    %c0_i32 = arith.constant 0 : i32
    %c0_i32_0 = arith.constant 0 : i32
    %c0_i32_1 = arith.constant 0 : i32
    return %c0_i32, %c0_i32_0 : i32, i32
  }
  func.func @transform_4(%arg0: i32) -> (i32, i32) {
    %c0_i32 = arith.constant 0 : i32
    %c0_i32_0 = arith.constant 0 : i32
    %c0_i32_1 = arith.constant 0 : i32
    return %c0_i32, %c0_i32_0 : i32, i32
  }
  func.func @transform_5(%arg0: i32) -> (i32, i32) {
    %c0_i32 = arith.constant 0 : i32
    %c0_i32_0 = arith.constant 0 : i32
    %c0_i32_1 = arith.constant 0 : i32
    return %c0_i32, %c0_i32_0 : i32, i32
  }
  func.func @transform_6(%arg0: i32) -> (i32, i32) {
    %c0_i32 = arith.constant 0 : i32
    %c0_i32_0 = arith.constant 0 : i32
    %c0_i32_1 = arith.constant 0 : i32
    return %c0_i32, %c0_i32_0 : i32, i32
  }
  func.func @transform_7(%arg0: i32) -> (i32, i32) {
    %c0_i32 = arith.constant 0 : i32
    %c0_i32_0 = arith.constant 0 : i32
    %c0_i32_1 = arith.constant 0 : i32
    return %c0_i32, %c0_i32_0 : i32, i32
  }
  func.func @transform_8(%arg0: i32) -> (i32, i32) {
    %c0_i32 = arith.constant 0 : i32
    %c0_i32_0 = arith.constant 0 : i32
    %c0_i32_1 = arith.constant 0 : i32
    return %c0_i32, %c0_i32_0 : i32, i32
  }
  func.func @transform_9(%arg0: i32) -> (i32, i32) {
    %c0_i32 = arith.constant 0 : i32
    %c0_i32_0 = arith.constant 0 : i32
    return %arg0, %c0_i32 : i32, i32
  }
}

</mosaic_0001>

<bundles_post_ra>
// kernel: tpu_custom_call.1
= control target key start
LH: loop header
LB: loop body
LE: loop exit
PB: predicated region body
PF: predicated region fallthrough
CT: control target
= control target key end

     0   :  { %14 = vsyncpa [#allocation3], 0  ;;  %s5619_s0 = inlined_call_operand.hbm [shape: f32[16,64], index: 0, kind: input, shape index: {}]   ;;  %s5620_s1 = inlined_call_operand.hbm [shape: bf16[64,1024], index: 1, kind: input, shape index: {}]   ;;  %s5621_s2 = inlined_call_operand.hbm [shape: f32[1,1024], index: 2, kind: input, shape index: {}]   ;;  %s5622_s3 = inlined_call_operand.hbm [shape: bf16[1024,512], index: 3, kind: input, shape index: {}]   ;;  %s5623_s4 = inlined_call_operand.hbm [shape: f32[1,512], index: 4, kind: input, shape index: {}]   ;;  %s5624_s5 = inlined_call_operand.hbm [shape: bf16[512,256], index: 5, kind: input, shape index: {}]   ;;  %s5625_s6 = inlined_call_operand.vmem [shape: f32[1,256], index: 6, kind: input, shape index: {}]   ;;  %s5626_s7 = inlined_call_operand.hbm [shape: bf16[256,128], index: 7, kind: input, shape index: {}]   ;;  %s5627_s8 = inlined_call_operand.vmem [shape: f32[1,128], index: 8, kind: input, shape index: {}]   ;;  %s5628_s9 = inlined_call_operand.hbm [shape: bf16[16,128], index: 9, kind: output, shape index: {}]  }
   0x1   :  { %15 = vsyncpa [#allocation6], 0 }
   0x2   :  { %16 = vsyncpa [#allocation9], 0 }
   0x3   :  { %17 = vsyncpa [#allocation12], 0  ;;  %s36_s11 = sshll.u32 %s5620_s1, 4  ;;  %s37_s11 = int_to_ptr.hbm [resolvable:$true] %s36_s11 }
   0x4   :  { %18 = vsyncpa [#allocation4], 0  ;;  %s5368_s12 = smov [#allocation5]   ;;  %s60_s16 = sshll.u32 %s5622_s3, 4  ;;  %s61_s16 = int_to_ptr.hbm [resolvable:$true] %s60_s16 }
   0x5   :  { %s38_s13 = sshll.u32 %s5368_s12, 4  ;;  %s5369_s17 = smov 512   ;;  %s39_s13 = int_to_ptr.vmem [resolvable:$true] %s38_s13 }
   0x6   :  { %s5370_s18 = smov 32   ;;  %s5371_s19 = smov [#allocation8]  }
   0x7   :  { %44 = dma.hbm_to_vmem [thread:$0]  %s37_s11, 4096, %s39_s13, [#allocation6], %s5369_s17, %s5369_s17, %s5370_s18  }
   0x8   :  { %s62_s20 = sshll.u32 %s5371_s19, 4  ;;  %s5372_s21 = smov 256   ;;  %s63_s20 = int_to_ptr.vmem [resolvable:$true] %s62_s20 }
   0x9   :  { %s5373_s22 = smov 16   ;;  %s84_s24 = sshll.u32 %s5624_s5, 4  ;;  %s85_s24 = int_to_ptr.hbm [resolvable:$true] %s84_s24 }
   0xa   :  { %68 = dma.hbm_to_vmem [thread:$0]  %s61_s16, 32768, %s63_s20, [#allocation9], %s5372_s21, %s5372_s21, %s5373_s22  }
   0xb   :  { %s5374_s25 = smov [#allocation11]   ;;  %s23_s28 = sshll.u32 %s5619_s0, 4  ;;  %s24_s28 = int_to_ptr.hbm [resolvable:$true] %s23_s28 }
   0xc   :  { %s86_s26 = sshll.u32 %s5374_s25, 4  ;;  %s5375_s29 = smov 128   ;;  %s87_s26 = int_to_ptr.vmem [resolvable:$true] %s86_s26 }
   0xd   :  { %s5376_s30 = smov 8   ;;  %s5377_s10 = smov [#allocation2]  }
   0xe   :  { %92 = dma.hbm_to_vmem [thread:$0]  %s85_s24, 8192, %s87_s26, [#allocation12], %s5375_s29, %s5375_s29, %s5376_s30  }
   0xf   :  { %s25_s11 = sshll.u32 %s5377_s10, 4  ;;  %s50_s14 = sshll.u32 %s5621_s2, 4  ;;  %s26_s11 = int_to_ptr.vmem [resolvable:$true] %s25_s11  ;;  %s51_s14 = int_to_ptr.hbm [resolvable:$true] %s50_s14 }
  0x10   :  { %31 = dma.hbm_to_vmem [thread:$0]  %s24_s28, 256, %s26_s11, [#allocation3], %s5375_s29, %s5375_s29, %s5376_s30  }
  0x11   :  { %s74_s16 = sshll.u32 %s5623_s4, 4  ;;  %s5378_s17 = smov [#allocation7]   ;;  %s75_s16 = int_to_ptr.hbm [resolvable:$true] %s74_s16 }
  0x12   :  { %s52_s18 = sshll.u32 %s5378_s17, 4  ;;  %s5379_s0 = smov [#allocation10]   ;;  %s53_s18 = int_to_ptr.vmem [resolvable:$true] %s52_s18 }
  0x13   :  { %55 = dma.hbm_to_vmem [thread:$0]  %s51_s14, 128, %s53_s18, [#allocation6]  }
  0x14   :  { %s76_s19 = sshll.u32 %s5379_s0, 4  ;;  %s99_s22 = sshll.u32 %s5626_s7, 4  ;;  %s77_s19 = int_to_ptr.vmem [resolvable:$true] %s76_s19  ;;  %s100_s22 = int_to_ptr.hbm [resolvable:$true] %s99_s22 }
  0x15   :  { %79 = dma.hbm_to_vmem [thread:$0]  %s75_s16, 64, %s77_s19, [#allocation9]  }
  0x16   :  { %s5380_s2 = smov [#allocation13]   ;;  %s5381_s23 = smov 64  }
  0x17   :  { %s101_s1 = sshll.u32 %s5380_s2, 4  ;;  %s5382_s24 = smov 4   ;;  %s102_s1 = int_to_ptr.vmem [resolvable:$true] %s101_s1 }
  0x18   :  { %107 = dma.hbm_to_vmem [thread:$0]  %s100_s22, 2048, %s102_s1, [#allocation12], %s5381_s23, %s5381_s23, %s5382_s24  }
  0x19   :  { %5358 = dma.done.wait [#allocation3], 256  }
  0x1a   :  { %5359 = vsyncadd [#allocation3], 4294967040 }
  0x1b   :  { %5360 = dma.done.wait [#allocation6], 4224  }
  0x1c   :  { %5361 = vsyncadd [#allocation6], 4294963072 }
  0x1d   :  { %5362 = dma.done.wait [#allocation9], 32832  }
  0x1e   :  { %5363 = vsyncadd [#allocation9], 4294934464 }
  0x1f   :  { %5364 = dma.done.wait [#allocation12], 10240  }
  0x20   :  { %5365 = vsyncadd [#allocation12], 4294957056  ;;  %v3384_v0 = vld [vmem:[#allocation5 + $0xc0] sm:$0xf]  ;;  %v4792_v2 = vld [vmem:[#allocation5 + $0xc4] sm:$0xf] }
  0x21   :  { %v4796_v1 = vld [vmem:[#allocation5 + $0xdc] sm:$0xf0]  ;;  %v3386_v4 = vld [vmem:[#allocation5 + $0xe0] sm:$0xf0]  ;;  %v3392_v22 = vld [vmem:[#allocation5 + $0xc8] sm:$0xf] }
  0x22   :  { %v3385_v3 = vor.u32 %v4796_v1, %v3384_v0  ;;  %v3352_v5 = vld [vmem:[#allocation5 + $0x80] sm:$0xf]  ;;  %v3389_v7 = vor.u32 %v4792_v2, %v3386_v4  ;;  %v4784_v8 = vld [vmem:[#allocation5 + $0x84] sm:$0xf]  ;;  %v4797_v23 = vld [vmem:[#allocation5 + $0xe4] sm:$0xf0] }
  0x23   :  { %v4788_v6 = vld [vmem:[#allocation5 + $0x9c] sm:$0xf0]  ;;  %v3354_v9 = vld [vmem:[#allocation5 + $0xa0] sm:$0xf0]  ;;  %v3400_v24 = vld [vmem:[#allocation5 + $0xd0] sm:$0xf]  ;;  %v3393_v38 = vor.u32 %v4797_v23, %v3392_v22 }
  0x24   :  { %360 = vmatpush.bf16.msra.mxu2 %v3385_v3  ;;  %v3353_v10 = vor.u32 %v4788_v6, %v3352_v5  ;;  %374 = vmatpush.bf16.msra.mxu3 %v3389_v7  ;;  %v3357_v11 = vor.u32 %v4784_v8, %v3354_v9  ;;  %v3320_v12 = vld [vmem:[#allocation5 + $0x40] sm:$0xf]  ;;  %v4776_v14 = vld [vmem:[#allocation5 + $0x44] sm:$0xf]  ;;  %v4798_v25 = vld [vmem:[#allocation5 + $0xec] sm:$0xf0] }
  0x25   :  { %v4780_v13 = vld [vmem:[#allocation5 + $0x5c] sm:$0xf0]  ;;  %v3322_v15 = vld [vmem:[#allocation5 + $0x60] sm:$0xf0]  ;;  %v4794_v26 = vld [vmem:[#allocation5 + $0xd4] sm:$0xf]  ;;  %v3401_v31 = vor.u32 %v4798_v25, %v3400_v24 }
  0x26   :  { %v3288_v16 = vld [vmem:[#allocation5] sm:$0xf]  ;;  %v3321_v17 = vor.u32 %v4780_v13, %v3320_v12  ;;  %v4768_v19 = vld [vmem:[#allocation5 + $0x4] sm:$0xf]  ;;  %v3325_v21 = vor.u32 %v4776_v14, %v3322_v15  ;;  %v3402_v27 = vld [vmem:[#allocation5 + $0xf0] sm:$0xf0] }
  0x27   :  { %v4772_v18 = vld [vmem:[#allocation5 + $0x1c] sm:$0xf0]  ;;  %v3290_v20 = vld [vmem:[#allocation5 + $0x20] sm:$0xf0]  ;;  %v139_v28 = vld [vmem:[#allocation2] sm:$0xff]  ;;  %v3405_v32 = vor.u32 %v4794_v26, %v3402_v27  ;;  %416 = vmatpush.bf16.msra.mxu0 %v3401_v31  ;;  %vm352_vm0 = vcmask 523264  }
  0x28   :  { %361 = vmatpush.bf16.msra.mxu2 %v3353_v10  ;;  %375 = vmatpush.bf16.msra.mxu3 %v3357_v11  ;;  %v4793_v29 = vld [vmem:[#allocation5 + $0xcc] sm:$0xf]  ;;  %v3289_v33 = vor.u32 %v4772_v18, %v3288_v16  ;;  %v140_v34 = vld [vmem:[#allocation2 + $0x8] sm:$0xff]  ;;  %v3368_v35 = vld [vmem:[#allocation5 + $0x90] sm:$0xf]  ;;  %v3293_v37 = vor.u32 %v4768_v19, %v3290_v20  ;;  %s3270_s28 = sshll.u32 %s5628_s9, 4  ;;  %s3271_s28 = int_to_ptr.hbm [resolvable:$true] %s3270_s28 }
  0x29   :  { %v3394_v30 = vld [vmem:[#allocation5 + $0xe8] sm:$0xf0]  ;;  %v4790_v36 = vld [vmem:[#allocation5 + $0xac] sm:$0xf0]  ;;  %v4786_v39 = vld [vmem:[#allocation5 + $0x94] sm:$0xf]  ;;  %430 = vmatpush.bf16.msra.mxu1 %v3405_v32  ;;  %v5458_v46 = vpack.c.bf16 %v140_v34, %v139_v28 }
  0x2a   :  { %v3370_v40 = vld [vmem:[#allocation5 + $0xb0] sm:$0xf0]  ;;  %v3397_v41 = vor.u32 %v4793_v29, %v3394_v30  ;;  %v3360_v42 = vld [vmem:[#allocation5 + $0x88] sm:$0xf]  ;;  %v4785_v44 = vld [vmem:[#allocation5 + $0x8c] sm:$0xf]  ;;  %v3369_v45 = vor.u32 %v4790_v36, %v3368_v35 }
  0x2b   :  { %v4789_v43 = vld [vmem:[#allocation5 + $0xa4] sm:$0xf0]  ;;  %v3362_v47 = vld [vmem:[#allocation5 + $0xa8] sm:$0xf0]  ;;  %v3373_v48 = vor.u32 %v4786_v39, %v3370_v40  ;;  %v3336_v49 = vld [vmem:[#allocation5 + $0x50] sm:$0xf] }
  0x2c   :  { %362 = vmatpush.bf16.msra.mxu2 %v3321_v17  ;;  %376 = vmatpush.bf16.msra.mxu3 %v3325_v21  ;;  %v4782_v50 = vld [vmem:[#allocation5 + $0x6c] sm:$0xf0]  ;;  %v4778_v51 = vld [vmem:[#allocation5 + $0x54] sm:$0xf]  ;;  %v3361_v53 = vor.u32 %v4789_v43, %v3360_v42  ;;  %v3365_v54 = vor.u32 %v4785_v44, %v3362_v47  ;;  %v3328_v55 = vld [vmem:[#allocation5 + $0x48] sm:$0xf] }
  0x2d   :  { %v3338_v52 = vld [vmem:[#allocation5 + $0x70] sm:$0xf0]  ;;  %v4781_v56 = vld [vmem:[#allocation5 + $0x64] sm:$0xf0]  ;;  %v4777_v57 = vld [vmem:[#allocation5 + $0x4c] sm:$0xf]  ;;  %417 = vmatpush.bf16.msra.mxu0 %v3369_v45  ;;  %v3337_v58 = vor.u32 %v4782_v50, %v3336_v49  ;;  %431 = vmatpush.bf16.msra.mxu1 %v3373_v48 }
  0x2e   :  { %v3330_v59 = vld [vmem:[#allocation5 + $0x68] sm:$0xf0]  ;;  %v3341_v60 = vor.u32 %v4778_v51, %v3338_v52  ;;  %v3304_v61 = vld [vmem:[#allocation5 + $0x10] sm:$0xf]  ;;  %v3296_v63 = vld [vmem:[#allocation5 + $0x8] sm:$0xf]  ;;  %v3329_v2 = vor.u32 %v4781_v56, %v3328_v55 }
  0x2f   :  { %v4774_v62 = vld [vmem:[#allocation5 + $0x2c] sm:$0xf0]  ;;  %v4770_v0 = vld [vmem:[#allocation5 + $0x14] sm:$0xf]  ;;  %v4773_v3 = vld [vmem:[#allocation5 + $0x24] sm:$0xf0]  ;;  %v3333_v6 = vor.u32 %v4777_v57, %v3330_v59 }
  0x30   :  { %363 = vmatpush.bf16.msra.mxu2 %v3289_v33  ;;  %377 = vmatpush.bf16.msra.mxu3 %v3293_v37  ;;  %v3306_v1 = vld [vmem:[#allocation5 + $0x30] sm:$0xf0]  ;;  %v4769_v4 = vld [vmem:[#allocation5 + $0xc] sm:$0xf]  ;;  %v3408_v7 = vld [vmem:[#allocation5 + $0xd8] sm:$0xf]  ;;  %v3305_v10 = vor.u32 %v4774_v62, %v3304_v61  ;;  %v3297_v19 = vor.u32 %v4773_v3, %v3296_v63 }
  0x31   :  { %v3298_v5 = vld [vmem:[#allocation5 + $0x28] sm:$0xf0]  ;;  %418 = vmatpush.bf16.msra.mxu0 %v3337_v58  ;;  %v4799_v8 = vld [vmem:[#allocation5 + $0xf4] sm:$0xf0]  ;;  %v4795_v9 = vld [vmem:[#allocation5 + $0xdc] sm:$0xf]  ;;  %432 = vmatpush.bf16.msra.mxu1 %v3341_v60  ;;  %v3309_v11 = vor.u32 %v4770_v0, %v3306_v1 }
  0x32   :  { %v3536_v12 = vld [vmem:[#allocation8 + $0xe0] sm:$0xf]  ;;  %v4830_v13 = vld [vmem:[#allocation8 + $0xec] sm:$0xf0]  ;;  %v3410_v15 = vld [vmem:[#allocation5 + $0xf8] sm:$0xf0]  ;;  %v3301_v24 = vor.u32 %v4769_v4, %v3298_v5  ;;  %v3409_v25 = vor.u32 %v4799_v8, %v3408_v7 }
  0x33   :  { %3414 = vmatmul.msk.bf16.vlgmr.msra.gmra.mxu2 %vm352_vm0, %v5458_v46  ;;  %3415 = vmatmul.msk.bf16.vlgmr.msra.gmra.mxu3 %vm352_vm0, %v5458_v46  ;;  %v3664_v14 = vld [vmem:[#allocation8 + $0x1e0] sm:$0xf]  ;;  %v3537_v16 = vor.u32 %v4830_v13, %v3536_v12  ;;  %v4862_v17 = vld [vmem:[#allocation8 + $0x1ec] sm:$0xf0]  ;;  %v3413_v26 = vor.u32 %v4795_v9, %v3410_v15  ;;  %v4787_v29 = vld [vmem:[#allocation5 + $0x9c] sm:$0xf] }
  0x34   :  { %388 = vmatpush.bf16.msrb.mxu2 %v3393_v38  ;;  %402 = vmatpush.bf16.msrb.mxu3 %v3397_v41  ;;  %v3520_v18 = vld [vmem:[#allocation8 + $0xc0] sm:$0xf]  ;;  %v3665_v20 = vor.u32 %v4862_v17, %v3664_v14  ;;  %v4826_v21 = vld [vmem:[#allocation8 + $0xcc] sm:$0xf0]  ;;  %v3378_v30 = vld [vmem:[#allocation5 + $0xb8] sm:$0xf0] }
  0x35   :  { %v3648_v22 = vld [vmem:[#allocation8 + $0x1c0] sm:$0xf]  ;;  %v4858_v23 = vld [vmem:[#allocation8 + $0x1cc] sm:$0xf0]  ;;  %419 = vmatpush.bf16.msra.mxu0 %v3305_v10  ;;  %433 = vmatpush.bf16.msra.mxu1 %v3309_v11  ;;  %v3521_v31 = vor.u32 %v4826_v21, %v3520_v18  ;;  %v3381_v38 = vor.u32 %v4787_v29, %v3378_v30  ;;  %v4779_v41 = vld [vmem:[#allocation5 + $0x5c] sm:$0xf] }
  0x36   :  { %v3376_v27 = vld [vmem:[#allocation5 + $0x98] sm:$0xf]  ;;  %v3649_v32 = vor.u32 %v4858_v23, %v3648_v22  ;;  %v3504_v33 = vld [vmem:[#allocation8 + $0xa0] sm:$0xf]  ;;  %v3346_v42 = vld [vmem:[#allocation5 + $0x78] sm:$0xf0] }
  0x37   :  { %v4791_v28 = vld [vmem:[#allocation5 + $0xb4] sm:$0xf0]  ;;  %v3632_v36 = vld [vmem:[#allocation8 + $0x1a0] sm:$0xf]  ;;  %v3349_v52 = vor.u32 %v4779_v41, %v3346_v42  ;;  %v3314_v55 = vld [vmem:[#allocation5 + $0x38] sm:$0xf0] }
  0x38   :  { %389 = vmatpush.bf16.msrb.mxu2 %v3361_v53  ;;  %403 = vmatpush.bf16.msrb.mxu3 %v3365_v54  ;;  %v4822_v34 = vld [vmem:[#allocation8 + $0xac] sm:$0xf0]  ;;  %v3377_v35 = vor.u32 %v4791_v28, %v3376_v27  ;;  %v3488_v45 = vld [vmem:[#allocation8 + $0x80] sm:$0xf]  ;;  %v4771_v54 = vld [vmem:[#allocation5 + $0x1c] sm:$0xf] }
  0x39   :  { %2070 = vmatpush.bf16.msrb.mxu0 %v3537_v16  ;;  %2084 = vmatpush.bf16.msrb.mxu1 %v3665_v20  ;;  %v4854_v37 = vld [vmem:[#allocation8 + $0x1ac] sm:$0xf0]  ;;  %v3505_v43 = vor.u32 %v4822_v34, %v3504_v33  ;;  %v3616_v50 = vld [vmem:[#allocation8 + $0x180] sm:$0xf]  ;;  %v3317_v3 = vor.u32 %v4771_v54, %v3314_v55 }
  0x3a   :  { %3418 = vmatmul.msk.bf16.vlgmr.msra.gmra.mxu0 %vm352_vm0, %v5458_v46  ;;  %3419 = vmatmul.msk.bf16.vlgmr.msra.gmra.mxu1 %vm352_vm0, %v5458_v46  ;;  %v3344_v39 = vld [vmem:[#allocation5 + $0x58] sm:$0xf]  ;;  %v3633_v44 = vor.u32 %v4854_v37, %v3632_v36  ;;  %v3472_v57 = vld [vmem:[#allocation8 + $0x60] sm:$0xf] }
  0x3b   :  { %v4783_v40 = vld [vmem:[#allocation5 + $0x74] sm:$0xf0]  ;;  %v3792_v58 = vld [vmem:[#allocation8 + $0x2e0] sm:$0xf] }
  0x3c   :  { %390 = vmatpush.bf16.msrb.mxu2 %v3329_v2  ;;  %404 = vmatpush.bf16.msrb.mxu3 %v3333_v6  ;;  %v4818_v47 = vld [vmem:[#allocation8 + $0x8c] sm:$0xf0]  ;;  %v3345_v48 = vor.u32 %v4783_v40, %v3344_v39  ;;  %v3920_v62 = vld [vmem:[#allocation8 + $0x3e0] sm:$0xf] }
  0x3d   :  { %2071 = vmatpush.bf16.msrb.mxu0 %v3521_v31  ;;  %2085 = vmatpush.bf16.msrb.mxu1 %v3649_v32  ;;  %v3312_v49 = vld [vmem:[#allocation5 + $0x18] sm:$0xf]  ;;  %v3489_v56 = vor.u32 %v4818_v47, %v3488_v45  ;;  %v3600_v1 = vld [vmem:[#allocation8 + $0x160] sm:$0xf] }
  0x3e   :  { %v4850_v51 = vld [vmem:[#allocation8 + $0x18c] sm:$0xf0]  ;;  %v3456_v7 = vld [vmem:[#allocation8 + $0x40] sm:$0xf] }
  0x3f   :  { %v4775_v53 = vld [vmem:[#allocation5 + $0x34] sm:$0xf0]  ;;  %v3617_v60 = vor.u32 %v4850_v51, %v3616_v50  ;;  %v3776_v8 = vld [vmem:[#allocation8 + $0x2c0] sm:$0xf] }
  0x40   :  { %391 = vmatpush.bf16.msrb.mxu2 %v3297_v19  ;;  %405 = vmatpush.bf16.msrb.mxu3 %v3301_v24  ;;  %v4894_v59 = vld [vmem:[#allocation8 + $0x2ec] sm:$0xf0]  ;;  %v3313_v0 = vor.u32 %v4775_v53, %v3312_v49  ;;  %v3904_v12 = vld [vmem:[#allocation8 + $0x3c0] sm:$0xf] }
  0x41   :  { %2072 = vmatpush.bf16.msrb.mxu0 %v3505_v43  ;;  %2086 = vmatpush.bf16.msrb.mxu1 %v3633_v44  ;;  %v4814_v61 = vld [vmem:[#allocation8 + $0x6c] sm:$0xf0]  ;;  %v3793_v4 = vor.u32 %v4894_v59, %v3792_v58  ;;  %v3584_v14 = vld [vmem:[#allocation8 + $0x140] sm:$0xf] }
  0x42   :  { %v4926_v63 = vld [vmem:[#allocation8 + $0x3ec] sm:$0xf0]  ;;  %v3473_v5 = vor.u32 %v4814_v61, %v3472_v57  ;;  %v3440_v20 = vld [vmem:[#allocation8 + $0x20] sm:$0xf] }
  0x43   :  { %3416 = vmatmul.msk.bf16.vlgmr.msrb.gmra.mxu2 %vm352_vm0, %v5458_v46  ;;  %3417 = vmatmul.msk.bf16.vlgmr.msrb.gmra.mxu3 %vm352_vm0, %v5458_v46  ;;  %v4846_v2 = vld [vmem:[#allocation8 + $0x16c] sm:$0xf0]  ;;  %v3921_v6 = vor.u32 %v4926_v63, %v3920_v62  ;;  %v3568_v22 = vld [vmem:[#allocation8 + $0x120] sm:$0xf] }
  0x44   :  { %444 = vmatpush.bf16.msra.mxu2 %v3409_v25  ;;  %458 = vmatpush.bf16.msra.mxu3 %v3413_v26  ;;  %v4890_v9 = vld [vmem:[#allocation8 + $0x2cc] sm:$0xf0]  ;;  %v3601_v10 = vor.u32 %v4846_v2, %v3600_v1  ;;  %v3760_v24 = vld [vmem:[#allocation8 + $0x2a0] sm:$0xf] }
  0x45   :  { %2073 = vmatpush.bf16.msrb.mxu0 %v3489_v56  ;;  %2087 = vmatpush.bf16.msrb.mxu1 %v3617_v60  ;;  %v4810_v11 = vld [vmem:[#allocation8 + $0x4c] sm:$0xf0]  ;;  %v3777_v16 = vor.u32 %v4890_v9, %v3776_v8  ;;  %v3888_v26 = vld [vmem:[#allocation8 + $0x3a0] sm:$0xf] }
  0x46   :  { %v4922_v13 = vld [vmem:[#allocation8 + $0x3cc] sm:$0xf0]  ;;  %v3457_v17 = vor.u32 %v4810_v11, %v3456_v7  ;;  %v3424_v29 = vld [vmem:[#allocation8] sm:$0xf] }
  0x47   :  { %v4842_v15 = vld [vmem:[#allocation8 + $0x14c] sm:$0xf0]  ;;  %v3905_v18 = vor.u32 %v4922_v13, %v3904_v12  ;;  %v3552_v33 = vld [vmem:[#allocation8 + $0x100] sm:$0xf] }
  0x48   :  { %445 = vmatpush.bf16.msra.mxu2 %v3377_v35  ;;  %459 = vmatpush.bf16.msra.mxu3 %v3381_v38  ;;  %v3585_v19 = vor.u32 %v4842_v15, %v3584_v14  ;;  %v4806_v21 = vld [vmem:[#allocation8 + $0x2c] sm:$0xf0]  ;;  %v3744_v36 = vld [vmem:[#allocation8 + $0x280] sm:$0xf] }
  0x49   :  { %2074 = vmatpush.bf16.msrb.mxu0 %v3473_v5  ;;  %2088 = vmatpush.bf16.msrb.mxu1 %v3601_v10  ;;  %v4838_v23 = vld [vmem:[#allocation8 + $0x12c] sm:$0xf0]  ;;  %v3441_v28 = vor.u32 %v4806_v21, %v3440_v20  ;;  %v3872_v38 = vld [vmem:[#allocation8 + $0x380] sm:$0xf] }
  0x4a   :  { %v4886_v25 = vld [vmem:[#allocation8 + $0x2ac] sm:$0xf0]  ;;  %v3569_v30 = vor.u32 %v4838_v23, %v3568_v22  ;;  %v4048_v40 = vld [vmem:[#allocation8 + $0x4e0] sm:$0xf] }
  0x4b   :  { %v4918_v27 = vld [vmem:[#allocation8 + $0x3ac] sm:$0xf0]  ;;  %v3761_v31 = vor.u32 %v4886_v25, %v3760_v24  ;;  %v4176_v43 = vld [vmem:[#allocation8 + $0x5e0] sm:$0xf] }
  0x4c   :  { %446 = vmatpush.bf16.msra.mxu2 %v3345_v48  ;;  %460 = vmatpush.bf16.msra.mxu3 %v3349_v52  ;;  %v4802_v32 = vld [vmem:[#allocation8 + $0xc] sm:$0xf0]  ;;  %v3889_v35 = vor.u32 %v4918_v27, %v3888_v26  ;;  %v3728_v50 = vld [vmem:[#allocation8 + $0x260] sm:$0xf] }
  0x4d   :  { %2075 = vmatpush.bf16.msrb.mxu0 %v3457_v17  ;;  %2089 = vmatpush.bf16.msrb.mxu1 %v3585_v19  ;;  %v4834_v34 = vld [vmem:[#allocation8 + $0x10c] sm:$0xf0]  ;;  %v3425_v42 = vor.u32 %v4802_v32, %v3424_v29  ;;  %v3856_v52 = vld [vmem:[#allocation8 + $0x360] sm:$0xf] }
  0x4e   :  { %v4882_v37 = vld [vmem:[#allocation8 + $0x28c] sm:$0xf0]  ;;  %v3553_v45 = vor.u32 %v4834_v34, %v3552_v33  ;;  %v4032_v55 = vld [vmem:[#allocation8 + $0x4c0] sm:$0xf] }
  0x4f   :  { %v4914_v39 = vld [vmem:[#allocation8 + $0x38c] sm:$0xf0]  ;;  %v3745_v47 = vor.u32 %v4882_v37, %v3744_v36  ;;  %v3712_v61 = vld [vmem:[#allocation8 + $0x240] sm:$0xf] }
  0x50   :  { %447 = vmatpush.bf16.msra.mxu2 %v3313_v0  ;;  %461 = vmatpush.bf16.msra.mxu3 %v3317_v3  ;;  %v4958_v41 = vld [vmem:[#allocation8 + $0x4ec] sm:$0xf0]  ;;  %v3873_v48 = vor.u32 %v4914_v39, %v3872_v38  ;;  %v3840_v63 = vld [vmem:[#allocation8 + $0x340] sm:$0xf] }
  0x51   :  { %2076 = vmatpush.bf16.msrb.mxu0 %v3441_v28  ;;  %v4990_v44 = vld [vmem:[#allocation8 + $0x5ec] sm:$0xf0]  ;;  %2090 = vmatpush.bf16.msrb.mxu1 %v3569_v30  ;;  %v4049_v49 = vor.u32 %v4958_v41, %v4048_v40  ;;  %v4016_v2 = vld [vmem:[#allocation8 + $0x4a0] sm:$0xf] }
  0x52   :  { %v4878_v51 = vld [vmem:[#allocation8 + $0x26c] sm:$0xf0]  ;;  %v4177_v53 = vor.u32 %v4990_v44, %v4176_v43  ;;  %v3696_v9 = vld [vmem:[#allocation8 + $0x220] sm:$0xf] }
  0x53   :  { %3420 = vmatmul.msk.bf16.vlgmr.msra.gmra.mxu2 %vm352_vm0, %v5458_v46  ;;  %3421 = vmatmul.msk.bf16.vlgmr.msra.gmra.mxu3 %vm352_vm0, %v5458_v46  ;;  %v4910_v54 = vld [vmem:[#allocation8 + $0x36c] sm:$0xf0]  ;;  %v4160_v46 = vld [vmem:[#allocation8 + $0x5c0] sm:$0xf]  ;;  %v3729_v58 = vor.u32 %v4878_v51, %v3728_v50 }
  0x54   :  { %2098 = vmatpush.bf16.msrb.mxu2 %v3793_v4  ;;  %2112 = vmatpush.bf16.msrb.mxu3 %v3921_v6  ;;  %v4954_v56 = vld [vmem:[#allocation8 + $0x4cc] sm:$0xf0]  ;;  %v3857_v59 = vor.u32 %v4910_v54, %v3856_v52  ;;  %v4144_v4 = vld [vmem:[#allocation8 + $0x5a0] sm:$0xf] }
  0x55   :  { %2077 = vmatpush.bf16.msrb.mxu0 %v3425_v42  ;;  %v4986_v57 = vld [vmem:[#allocation8 + $0x5cc] sm:$0xf0]  ;;  %2091 = vmatpush.bf16.msrb.mxu1 %v3553_v45  ;;  %v4033_v60 = vor.u32 %v4954_v56, %v4032_v55  ;;  %v3824_v11 = vld [vmem:[#allocation8 + $0x320] sm:$0xf] }
  0x56   :  { %v4874_v62 = vld [vmem:[#allocation8 + $0x24c] sm:$0xf0]  ;;  %v4161_v0 = vor.u32 %v4986_v57, %v4160_v46  ;;  %v4000_v14 = vld [vmem:[#allocation8 + $0x480] sm:$0xf] }
  0x57   :  { %v4906_v1 = vld [vmem:[#allocation8 + $0x34c] sm:$0xf0]  ;;  %v3713_v6 = vor.u32 %v4874_v62, %v3712_v61  ;;  %v3680_v22 = vld [vmem:[#allocation8 + $0x200] sm:$0xf] }
  0x58   :  { %2099 = vmatpush.bf16.msrb.mxu2 %v3777_v16  ;;  %2113 = vmatpush.bf16.msrb.mxu3 %v3905_v18  ;;  %v4950_v3 = vld [vmem:[#allocation8 + $0x4ac] sm:$0xf0]  ;;  %v3841_v7 = vor.u32 %v4906_v1, %v3840_v63  ;;  %v4128_v16 = vld [vmem:[#allocation8 + $0x580] sm:$0xf] }
  0x59   :  { %2126 = vmatpush.bf16.msra.mxu0 %v4049_v49  ;;  %2140 = vmatpush.bf16.msra.mxu1 %v4177_v53  ;;  %v4982_v5 = vld [vmem:[#allocation8 + $0x5ac] sm:$0xf0]  ;;  %v4017_v8 = vor.u32 %v4950_v3, %v4016_v2  ;;  %v3808_v25 = vld [vmem:[#allocation8 + $0x300] sm:$0xf] }
  0x5a   :  { %v4870_v10 = vld [vmem:[#allocation8 + $0x22c] sm:$0xf0]  ;;  %v4145_v12 = vor.u32 %v4982_v5, %v4144_v4  ;;  %v3984_v27 = vld [vmem:[#allocation8 + $0x460] sm:$0xf] }
  0x5b   :  { %v4902_v13 = vld [vmem:[#allocation8 + $0x32c] sm:$0xf0]  ;;  %v3697_v18 = vor.u32 %v4870_v10, %v3696_v9  ;;  %v4112_v30 = vld [vmem:[#allocation8 + $0x560] sm:$0xf] }
  0x5c   :  { %2100 = vmatpush.bf16.msrb.mxu2 %v3761_v31  ;;  %2114 = vmatpush.bf16.msrb.mxu3 %v3889_v35  ;;  %v4946_v15 = vld [vmem:[#allocation8 + $0x48c] sm:$0xf0]  ;;  %v3825_v19 = vor.u32 %v4902_v13, %v3824_v11  ;;  %v4304_v34 = vld [vmem:[#allocation8 + $0x6e0] sm:$0xf] }
  0x5d   :  { %2127 = vmatpush.bf16.msra.mxu0 %v4033_v60  ;;  %2141 = vmatpush.bf16.msra.mxu1 %v4161_v0  ;;  %v4978_v17 = vld [vmem:[#allocation8 + $0x58c] sm:$0xf0]  ;;  %v4001_v20 = vor.u32 %v4946_v15, %v4000_v14  ;;  %v4432_v36 = vld [vmem:[#allocation8 + $0x7e0] sm:$0xf] }
  0x5e   :  { %v4129_v21 = vor.u32 %v4978_v17, %v4128_v16  ;;  %v4866_v23 = vld [vmem:[#allocation8 + $0x20c] sm:$0xf0]  ;;  %v3968_v40 = vld [vmem:[#allocation8 + $0x440] sm:$0xf] }
  0x5f   :  { %v3681_v24 = vor.u32 %v4866_v23, %v3680_v22  ;;  %v4898_v26 = vld [vmem:[#allocation8 + $0x30c] sm:$0xf0]  ;;  %v4096_v42 = vld [vmem:[#allocation8 + $0x540] sm:$0xf] }
  0x60   :  { %2101 = vmatpush.bf16.msrb.mxu2 %v3745_v47  ;;  %2115 = vmatpush.bf16.msrb.mxu3 %v3873_v48  ;;  %v3809_v28 = vor.u32 %v4898_v26, %v3808_v25  ;;  %v4942_v29 = vld [vmem:[#allocation8 + $0x46c] sm:$0xf0]  ;;  %v4288_v45 = vld [vmem:[#allocation8 + $0x6c0] sm:$0xf] }
  0x61   :  { %2128 = vmatpush.bf16.msra.mxu0 %v4017_v8  ;;  %2142 = vmatpush.bf16.msra.mxu1 %v4145_v12  ;;  %v4974_v31 = vld [vmem:[#allocation8 + $0x56c] sm:$0xf0]  ;;  %v3985_v32 = vor.u32 %v4942_v29, %v3984_v27  ;;  %v4416_v50 = vld [vmem:[#allocation8 + $0x7c0] sm:$0xf] }
  0x62   :  { %v4113_v33 = vor.u32 %v4974_v31, %v4112_v30  ;;  %v5022_v35 = vld [vmem:[#allocation8 + $0x6ec] sm:$0xf0]  ;;  %v3952_v53 = vld [vmem:[#allocation8 + $0x420] sm:$0xf]  ;;  %v5476_v30 = vld [vmem:[#allocation7] sm:$0xff] }
  0x63   :  { %v4305_v37 = vor.u32 %v5022_v35, %v4304_v34  ;;  %v5054_v38 = vld [vmem:[#allocation8 + $0x7ec] sm:$0xf0]  ;;  %v4080_v55 = vld [vmem:[#allocation8 + $0x520] sm:$0xf] }
  0x64   :  { %2102 = vmatpush.bf16.msrb.mxu2 %v3729_v58  ;;  %2116 = vmatpush.bf16.msrb.mxu3 %v3857_v59  ;;  %v4433_v39 = vor.u32 %v5054_v38, %v4432_v36  ;;  %v4938_v41 = vld [vmem:[#allocation8 + $0x44c] sm:$0xf0]  ;;  %v4272_v57 = vld [vmem:[#allocation8 + $0x6a0] sm:$0xf]  ;;  %v176_v38 = vperm.slane %v5476_v30, 0 }
  0x65   :  { %2129 = vmatpush.bf16.msra.mxu0 %v4001_v20  ;;  %2143 = vmatpush.bf16.msra.mxu1 %v4129_v21  ;;  %v3969_v43 = vor.u32 %v4938_v41, %v3968_v40  ;;  %v4970_v44 = vld [vmem:[#allocation8 + $0x54c] sm:$0xf0]  ;;  %v4400_v61 = vld [vmem:[#allocation8 + $0x7a0] sm:$0xf]  ;;  %v177_v40 = vperm.slane %v5476_v30, 1 }
  0x66   :  { %v5018_v47 = vld [vmem:[#allocation8 + $0x6cc] sm:$0xf0]  ;;  %v4097_v48 = vor.u32 %v4970_v44, %v4096_v42  ;;  %v3936_v0 = vld [vmem:[#allocation8 + $0x400] sm:$0xf] }
  0x67   :  { %v4289_v49 = vor.u32 %v5018_v47, %v4288_v45  ;;  %v5050_v51 = vld [vmem:[#allocation8 + $0x7cc] sm:$0xf0]  ;;  %v4064_v2 = vld [vmem:[#allocation8 + $0x500] sm:$0xf] }
  0x68   :  { %2103 = vmatpush.bf16.msrb.mxu2 %v3713_v6  ;;  %2117 = vmatpush.bf16.msrb.mxu3 %v3841_v7  ;;  %v4417_v52 = vor.u32 %v5050_v51, %v4416_v50  ;;  %v4934_v54 = vld [vmem:[#allocation8 + $0x42c] sm:$0xf0]  ;;  %v4256_v5 = vld [vmem:[#allocation8 + $0x680] sm:$0xf]  ;;  %v4828_v50 = vld [vmem:[#allocation8 + $0xe4] sm:$0xf] }
  0x69   :  { %2130 = vmatpush.bf16.msra.mxu0 %v3985_v32  ;;  %2144 = vmatpush.bf16.msra.mxu1 %v4113_v33  ;;  %v3953_v56 = vor.u32 %v4934_v54, %v3952_v53  ;;  %v4966_v46 = vld [vmem:[#allocation8 + $0x52c] sm:$0xf0]  ;;  %v4384_v9 = vld [vmem:[#allocation8 + $0x780] sm:$0xf]  ;;  %v3538_v51 = vld [vmem:[#allocation8 + $0xf0] sm:$0xf0] }
  0x6a   :  { %v5014_v58 = vld [vmem:[#allocation8 + $0x6ac] sm:$0xf0]  ;;  %v4081_v59 = vor.u32 %v4966_v46, %v4080_v55  ;;  %v4240_v12 = vld [vmem:[#allocation8 + $0x660] sm:$0xf]  ;;  %v4860_v54 = vld [vmem:[#allocation8 + $0x1e4] sm:$0xf] }
  0x6b   :  { %v4273_v60 = vor.u32 %v5014_v58, %v4272_v57  ;;  %v5046_v62 = vld [vmem:[#allocation8 + $0x7ac] sm:$0xf0]  ;;  %v4368_v14 = vld [vmem:[#allocation8 + $0x760] sm:$0xf]  ;;  %v180_v57 = vperm.slane %v5476_v30, 4 }
  0x6c   :  { %2104 = vmatpush.bf16.msrb.mxu2 %v3697_v18  ;;  %2118 = vmatpush.bf16.msrb.mxu3 %v3825_v19  ;;  %v4401_v63 = vor.u32 %v5046_v62, %v4400_v61  ;;  %v4930_v1 = vld [vmem:[#allocation8 + $0x40c] sm:$0xf0]  ;;  %v4224_v18 = vld [vmem:[#allocation8 + $0x640] sm:$0xf]  ;;  %v3541_v61 = vor.u32 %v4828_v50, %v3538_v51  ;;  %v3602_v50 = vld [vmem:[#allocation8 + $0x170] sm:$0xf0] }
  0x6d   :  { %2131 = vmatpush.bf16.msra.mxu0 %v3969_v43  ;;  %2145 = vmatpush.bf16.msra.mxu1 %v4097_v48  ;;  %v3937_v3 = vor.u32 %v4930_v1, %v3936_v0  ;;  %v4962_v4 = vld [vmem:[#allocation8 + $0x50c] sm:$0xf0]  ;;  %v4352_v21 = vld [vmem:[#allocation8 + $0x740] sm:$0xf] }
  0x6e   :  { %v5010_v6 = vld [vmem:[#allocation8 + $0x68c] sm:$0xf0]  ;;  %v4065_v7 = vor.u32 %v4962_v4, %v4064_v2  ;;  %v4336_v26 = vld [vmem:[#allocation8 + $0x720] sm:$0xf]  ;;  %v4824_v2 = vld [vmem:[#allocation8 + $0xc4] sm:$0xf] }
  0x6f   :  { %v4257_v8 = vor.u32 %v5010_v6, %v4256_v5  ;;  %v5042_v10 = vld [vmem:[#allocation8 + $0x78c] sm:$0xf0]  ;;  %v4192_v31 = vld [vmem:[#allocation8 + $0x600] sm:$0xf]  ;;  %v4856_v6 = vld [vmem:[#allocation8 + $0x1c4] sm:$0xf] }
  0x70   :  { %2105 = vmatpush.bf16.msrb.mxu2 %v3681_v24  ;;  %2119 = vmatpush.bf16.msrb.mxu3 %v3809_v28  ;;  %v4385_v11 = vor.u32 %v5042_v10, %v4384_v9  ;;  %v5006_v13 = vld [vmem:[#allocation8 + $0x66c] sm:$0xf0]  ;;  %v4208_v24 = vld [vmem:[#allocation8 + $0x620] sm:$0xf]  ;;  %v178_v9 = vperm.slane %v5476_v30, 2 }
  0x71   :  { %2132 = vmatpush.bf16.msra.mxu0 %v3953_v56  ;;  %2146 = vmatpush.bf16.msra.mxu1 %v4081_v59  ;;  %v4241_v15 = vor.u32 %v5006_v13, %v4240_v12  ;;  %v5038_v16 = vld [vmem:[#allocation8 + $0x76c] sm:$0xf0]  ;;  %v4320_v33 = vld [vmem:[#allocation8 + $0x700] sm:$0xf]  ;;  %v3666_v56 = vld [vmem:[#allocation8 + $0x1f0] sm:$0xf0] }
  0x72   :  { %v4369_v17 = vor.u32 %v5038_v16, %v4368_v14  ;;  %v5002_v19 = vld [vmem:[#allocation8 + $0x64c] sm:$0xf0]  ;;  %v3669_v1 = vor.u32 %v4860_v54, %v3666_v56  ;;  %v4820_v12 = vld [vmem:[#allocation8 + $0xa4] sm:$0xf] }
  0x73   :  { %v4225_v20 = vor.u32 %v5002_v19, %v4224_v18  ;;  %v5034_v22 = vld [vmem:[#allocation8 + $0x74c] sm:$0xf0]  ;;  %v4852_v18 = vld [vmem:[#allocation8 + $0x1a4] sm:$0xf]  ;;  %v3634_v19 = vld [vmem:[#allocation8 + $0x1b0] sm:$0xf0] }
  0x74   :  { %2154 = vmatpush.bf16.msra.mxu2 %v4305_v37  ;;  %2168 = vmatpush.bf16.msra.mxu3 %v4433_v39  ;;  %v4353_v23 = vor.u32 %v5034_v22, %v4352_v21  ;;  %v4998_v25 = vld [vmem:[#allocation8 + $0x62c] sm:$0xf0]  ;;  %v4892_v54 = vld [vmem:[#allocation8 + $0x2e4] sm:$0xf] }
  0x75   :  { %2133 = vmatpush.bf16.msra.mxu0 %v3937_v3  ;;  %2147 = vmatpush.bf16.msra.mxu1 %v4065_v7  ;;  %v4209_v27 = vor.u32 %v4998_v25, %v4208_v24  ;;  %v5030_v28 = vld [vmem:[#allocation8 + $0x72c] sm:$0xf0]  ;;  %v3522_v3 = vld [vmem:[#allocation8 + $0xd0] sm:$0xf0] }
  0x76   :  { %v4337_v29 = vor.u32 %v5030_v28, %v4336_v26  ;;  %v4994_v32 = vld [vmem:[#allocation8 + $0x60c] sm:$0xf0]  ;;  %v3650_v7 = vld [vmem:[#allocation8 + $0x1d0] sm:$0xf0]  ;;  %v4848_v28 = vld [vmem:[#allocation8 + $0x184] sm:$0xf] }
  0x77   :  { %v4193_v34 = vor.u32 %v4994_v32, %v4192_v31  ;;  %v5026_v35 = vld [vmem:[#allocation8 + $0x70c] sm:$0xf0]  ;;  %v3653_v21 = vor.u32 %v4856_v6, %v3650_v7  ;;  %v3490_v24 = vld [vmem:[#allocation8 + $0x90] sm:$0xf0]  ;;  %v183_v6 = vperm.slane %v5476_v30, 7 }
  0x78   :  { %2155 = vmatpush.bf16.msra.mxu2 %v4289_v49  ;;  %2169 = vmatpush.bf16.msra.mxu3 %v4417_v52  ;;  %v4321_v37 = vor.u32 %v5026_v35, %v4320_v33  ;;  %v4808_v7 = vld [vmem:[#allocation8 + $0x44] sm:$0xf] }
  0x7c   :  { %2156 = vmatpush.bf16.msra.mxu2 %v4273_v60  ;;  %2170 = vmatpush.bf16.msra.mxu3 %v4401_v63  ;;  %v181_v60 = vperm.slane %v5476_v30, 5 }
  0x80   :  { %2157 = vmatpush.bf16.msra.mxu2 %v4257_v8  ;;  %2171 = vmatpush.bf16.msra.mxu3 %v4385_v11 }
  0x84   :  { %2158 = vmatpush.bf16.msra.mxu2 %v4241_v15  ;;  %2172 = vmatpush.bf16.msra.mxu3 %v4369_v17  ;;  %v3525_v15 = vor.u32 %v4824_v2, %v3522_v3  ;;  %v3506_v17 = vld [vmem:[#allocation8 + $0xb0] sm:$0xf0] }
  0x85   :  { %v3509_v26 = vor.u32 %v4820_v12, %v3506_v17  ;;  %v4840_v12 = vld [vmem:[#allocation8 + $0x144] sm:$0xf] }
  0x86   :  { %v4920_v17 = vld [vmem:[#allocation8 + $0x3c4] sm:$0xf] }
  0x88   :  { %2159 = vmatpush.bf16.msra.mxu2 %v4225_v20  ;;  %2173 = vmatpush.bf16.msra.mxu3 %v4353_v23  ;;  %v179_v20 = vperm.slane %v5476_v30, 3  ;;  %v4816_v23 = vld [vmem:[#allocation8 + $0x84] sm:$0xf] }
  0x8c   :  { %2160 = vmatpush.bf16.msra.mxu2 %v4209_v27  ;;  %2174 = vmatpush.bf16.msra.mxu3 %v4337_v29  ;;  %v3637_v27 = vor.u32 %v4852_v18, %v3634_v19  ;;  %v3618_v29 = vld [vmem:[#allocation8 + $0x190] sm:$0xf0] }
  0x8d   :  { %v3906_v18 = vld [vmem:[#allocation8 + $0x3d0] sm:$0xf0] }
  0x90   :  { %2161 = vmatpush.bf16.msra.mxu2 %v4193_v34  ;;  %2175 = vmatpush.bf16.msra.mxu3 %v4321_v37 }
  0xb6   :  { %v365_v36 = vpop.f32.mrf.mxu2  ;;  %v379_v39 = vpop.f32.mrf.mxu3 }
  0xb7   :  { %v421_v41 = vpop.f32.mrf.mxu0  ;;  %v366_v42 = vadd.f32 %v365_v36, %v176_v38  ;;  %v380_v43 = vadd.f32 %v379_v39, %v177_v40  ;;  %v435_v44 = vpop.f32.mrf.mxu1  ;;  %v3621_v39 = vor.u32 %v4848_v28, %v3618_v29  ;;  %v3570_v28 = vld [vmem:[#allocation8 + $0x130] sm:$0xf0]  ;;  %v4884_v29 = vld [vmem:[#allocation8 + $0x2a4] sm:$0xf] }
  0xb8   :  { %v422_v11 = vadd.f32 %v421_v41, %v180_v57  ;;  %v436_v14 = vadd.f32 %v435_v44, %v181_v60  ;;  %v4812_v41 = vld [vmem:[#allocation8 + $0x64] sm:$0xf] }
  0xb9   :  { %v484_v47 = vmul.f32 0.2, %v366_v42  ;;  %vm468_vm1 = vcmp.gt.f32.partialorder %v366_v42, 0.0  ;;  %v485_v52 = vmul.f32 0.2, %v380_v43  ;;  %vm469_vm2 = vcmp.gt.f32.partialorder %v380_v43, 0.0 }
  0xba   :  { %v488_v25 = vmul.f32 0.2, %v422_v11  ;;  %vm472_vm5 = vcmp.gt.f32.partialorder %v422_v11, 0.0  ;;  %v489_v32 = vmul.f32 0.2, %v436_v14  ;;  %vm473_vm6 = vcmp.gt.f32.partialorder %v436_v14, 0.0 }
  0xbb   :  { %v500_v58 = vsel %vm468_vm1, %v366_v42, %v484_v47  ;;  %v501_v62 = vsel %vm469_vm2, %v380_v43, %v485_v52  ;;  %v3474_v42 = vld [vmem:[#allocation8 + $0x70] sm:$0xf0] }
  0xbc   :  { %v504_v36 = vsel %vm472_vm5, %v422_v11, %v488_v25  ;;  %v505_v44 = vsel %vm473_vm6, %v436_v14, %v489_v32  ;;  %v4888_v14 = vld [vmem:[#allocation8 + $0x2c4] sm:$0xf] }
  0xbe   :  { %v367_v45 = vpop.f32.mrf.mxu2  ;;  %v381_v49 = vpop.f32.mrf.mxu3 }
  0xbf   :  { %v368_v48 = vadd.f32 %v367_v45, %v176_v38  ;;  %v382_v53 = vadd.f32 %v381_v49, %v177_v40  ;;  %v423_v4 = vpop.f32.mrf.mxu0  ;;  %v437_v8 = vpop.f32.mrf.mxu1  ;;  %v3493_v38 = vor.u32 %v4816_v23, %v3490_v24  ;;  %v182_v40 = vperm.slane %v5476_v30, 6  ;;  %v4844_v49 = vld [vmem:[#allocation8 + $0x164] sm:$0xf]  ;;  %v3442_v23 = vld [vmem:[#allocation8 + $0x30] sm:$0xf0] }
  0xc0   :  { %v424_v16 = vadd.f32 %v423_v4, %v180_v57  ;;  %v438_v22 = vadd.f32 %v437_v8, %v181_v60  ;;  %v3922_v60 = vld [vmem:[#allocation8 + $0x3f0] sm:$0xf0]  ;;  %v4836_v24 = vld [vmem:[#allocation8 + $0x124] sm:$0xf] }
  0xc1   :  { %vm476_vm3 = vcmp.gt.f32.partialorder %v368_v48, 0.0  ;;  %v492_v55 = vmul.f32 0.2, %v368_v48  ;;  %vm477_vm4 = vcmp.gt.f32.partialorder %v382_v53, 0.0  ;;  %v493_v46 = vmul.f32 0.2, %v382_v53 }
  0xc2   :  { %v496_v33 = vmul.f32 0.2, %v424_v16  ;;  %vm480_vm7 = vcmp.gt.f32.partialorder %v424_v16, 0.0  ;;  %v497_v35 = vmul.f32 0.2, %v438_v22  ;;  %vm481_vm8 = vcmp.gt.f32.partialorder %v438_v22, 0.0 }
  0xc3   :  { %v508_v59 = vsel %vm476_vm3, %v368_v48, %v492_v55  ;;  %v509_v0 = vsel %vm477_vm4, %v382_v53, %v493_v46  ;;  %v3794_v55 = vld [vmem:[#allocation8 + $0x2f0] sm:$0xf0]  ;;  %v4924_v46 = vld [vmem:[#allocation8 + $0x3e4] sm:$0xf] }
  0xc4   :  { %v5482_v63 = vpack.c.bf16 %v508_v59, %v500_v58  ;;  %v5484_v5 = vpack.c.bf16 %v509_v0, %v501_v62  ;;  %v512_v48 = vsel %vm480_vm7, %v424_v16, %v496_v33  ;;  %v513_v53 = vsel %vm481_vm8, %v438_v22, %v497_v35  ;;  %v3458_v8 = vld [vmem:[#allocation8 + $0x50] sm:$0xf0]  ;;  %v4804_v22 = vld [vmem:[#allocation8 + $0x24] sm:$0xf] }
  0xc5   :  { %v5492_v58 = vpack.c.bf16 %v512_v48, %v504_v36  ;;  %v3477_v59 = vor.u32 %v4812_v41, %v3474_v42  ;;  %v5495_v0 = vpack.c.bf16 %v513_v53, %v505_v44  ;;  %v3925_v11 = vor.u32 %v4924_v46, %v3922_v60  ;;  %v3778_v16 = vld [vmem:[#allocation8 + $0x2d0] sm:$0xf0]  ;;  %v4916_v33 = vld [vmem:[#allocation8 + $0x3a4] sm:$0xf] }
  0xc6   :  { %v393_v10 = vpop.f32.mrf.mxu2  ;;  %2078 = vmatmul.bf16.vlgmr.msrb.gmra.mxu0 %v5482_v63  ;;  %v407_v13 = vpop.f32.mrf.mxu3  ;;  %2092 = vmatmul.bf16.vlgmr.msrb.gmra.mxu1 %v5484_v5  ;;  %v4800_v35 = vld [vmem:[#allocation8 + $0x4] sm:$0xf]  ;;  %v3426_v36 = vld [vmem:[#allocation8 + $0x10] sm:$0xf0]  ;;  %v3573_v41 = vor.u32 %v4836_v24, %v3570_v28 }
  0xc7   :  { %2182 = vmatpush.bf16.msrb.mxu0 %v3541_v61  ;;  %2196 = vmatpush.bf16.msrb.mxu1 %v3669_v1  ;;  %v394_v31 = vadd.f32 %v393_v10, %v178_v9  ;;  %v408_v34 = vadd.f32 %v407_v13, %v179_v20  ;;  %v3605_v1 = vor.u32 %v4844_v49, %v3602_v50  ;;  %v3586_v13 = vld [vmem:[#allocation8 + $0x150] sm:$0xf0]  ;;  %v4880_v42 = vld [vmem:[#allocation8 + $0x284] sm:$0xf] }
  0xc8   :  { %v3797_v10 = vor.u32 %v4892_v54, %v3794_v55  ;;  %v4912_v44 = vld [vmem:[#allocation8 + $0x384] sm:$0xf]  ;;  %v3874_v49 = vld [vmem:[#allocation8 + $0x390] sm:$0xf0] }
  0xc9   :  { %v486_v43 = vmul.f32 0.2, %v394_v31  ;;  %vm470_vm9 = vcmp.gt.f32.partialorder %v394_v31, 0.0  ;;  %v487_v51 = vmul.f32 0.2, %v408_v34  ;;  %vm471_vm10 = vcmp.gt.f32.partialorder %v408_v34, 0.0 }
  0xca   :  { %v4956_v50 = vld [vmem:[#allocation8 + $0x4e4] sm:$0xf]  ;;  %v4050_v53 = vld [vmem:[#allocation8 + $0x4f0] sm:$0xf0] }
  0xcb   :  { %2183 = vmatpush.bf16.msrb.mxu0 %v3525_v15  ;;  %2197 = vmatpush.bf16.msrb.mxu1 %v3653_v21  ;;  %v502_v61 = vsel %vm470_vm9, %v394_v31, %v486_v43  ;;  %v503_v2 = vsel %vm471_vm10, %v408_v34, %v487_v51  ;;  %v3589_v21 = vor.u32 %v4840_v12, %v3586_v13  ;;  %v3762_v31 = vld [vmem:[#allocation8 + $0x2b0] sm:$0xf0]  ;;  %v4952_v12 = vld [vmem:[#allocation8 + $0x4c4] sm:$0xf] }
  0xcc   :  { %v3890_v34 = vld [vmem:[#allocation8 + $0x3b0] sm:$0xf0]  ;;  %v4948_v28 = vld [vmem:[#allocation8 + $0x4a4] sm:$0xf] }
  0xcd   :  { %v3746_v43 = vld [vmem:[#allocation8 + $0x290] sm:$0xf0]  ;;  %v3893_v48 = vor.u32 %v4916_v33, %v3890_v34 }
  0xce   :  { %v395_v37 = vpop.f32.mrf.mxu2  ;;  %v409_v47 = vpop.f32.mrf.mxu3 }
  0xcf   :  { %v396_v45 = vadd.f32 %v395_v37, %v178_v9  ;;  %2184 = vmatpush.bf16.msrb.mxu0 %v3509_v26  ;;  %v410_v52 = vadd.f32 %v409_v47, %v179_v20  ;;  %2198 = vmatpush.bf16.msrb.mxu1 %v3637_v27  ;;  %v3461_v20 = vor.u32 %v4808_v7, %v3458_v8  ;;  %v4832_v37 = vld [vmem:[#allocation8 + $0x104] sm:$0xf] }
  0xd0   :  { %v3781_v26 = vor.u32 %v4888_v14, %v3778_v16  ;;  %v3909_v27 = vor.u32 %v4920_v17, %v3906_v18  ;;  %v3765_v47 = vor.u32 %v4884_v29, %v3762_v31  ;;  %v4034_v14 = vld [vmem:[#allocation8 + $0x4d0] sm:$0xf0]  ;;  %v4980_v31 = vld [vmem:[#allocation8 + $0x5a4] sm:$0xf] }
  0xd1   :  { %vm478_vm11 = vcmp.gt.f32.partialorder %v396_v45, 0.0  ;;  %v494_v56 = vmul.f32 0.2, %v396_v45  ;;  %vm479_vm12 = vcmp.gt.f32.partialorder %v410_v52, 0.0  ;;  %v495_v57 = vmul.f32 0.2, %v410_v52 }
  0xd2   :  { %v4162_v16 = vld [vmem:[#allocation8 + $0x5d0] sm:$0xf0]  ;;  %v4037_v24 = vor.u32 %v4952_v12, %v4034_v14  ;;  %v5016_v12 = vld [vmem:[#allocation8 + $0x6c4] sm:$0xf] }
  0xd3   :  { %v510_v62 = vsel %vm478_vm11, %v396_v45, %v494_v56  ;;  %2185 = vmatpush.bf16.msrb.mxu0 %v3493_v38  ;;  %v511_v4 = vsel %vm479_vm12, %v410_v52, %v495_v57  ;;  %2199 = vmatpush.bf16.msrb.mxu1 %v3621_v39  ;;  %v3554_v38 = vld [vmem:[#allocation8 + $0x110] sm:$0xf0]  ;;  %v3445_v39 = vor.u32 %v4804_v22, %v3442_v23  ;;  %v4988_v57 = vld [vmem:[#allocation8 + $0x5e4] sm:$0xf] }
  0xd4   :  { %v5497_v3 = vpack.c.bf16 %v510_v62, %v502_v61  ;;  %v5500_v9 = vpack.c.bf16 %v511_v4, %v503_v2  ;;  %v3429_v56 = vor.u32 %v4800_v35, %v3426_v36  ;;  %v3557_v46 = vor.u32 %v4832_v37, %v3554_v38  ;;  %v3730_v2 = vld [vmem:[#allocation8 + $0x270] sm:$0xf0]  ;;  %v4908_v4 = vld [vmem:[#allocation8 + $0x364] sm:$0xf] }
  0xd5   :  { %v3749_v61 = vor.u32 %v4880_v42, %v3746_v43  ;;  %v3877_v62 = vor.u32 %v4912_v44, %v3874_v49  ;;  %v4872_v22 = vld [vmem:[#allocation8 + $0x244] sm:$0xf]  ;;  %v3714_v23 = vld [vmem:[#allocation8 + $0x250] sm:$0xf0] }
  0xd6   :  { %v449_v15 = vpop.f32.mrf.mxu2  ;;  %2106 = vmatmul.bf16.vlgmr.msrb.gmra.mxu2 %v5497_v3  ;;  %2134 = vmatmul.bf16.vlgmr.msra.gmra.mxu0 %v5492_v58  ;;  %v463_v19 = vpop.f32.mrf.mxu3  ;;  %v4018_v29 = vld [vmem:[#allocation8 + $0x4b0] sm:$0xf0]  ;;  %v3717_v33 = vor.u32 %v4872_v22, %v3714_v23  ;;  %v4868_v35 = vld [vmem:[#allocation8 + $0x224] sm:$0xf] }
  0xd7   :  { %2120 = vmatmul.bf16.vlgmr.msrb.gmra.mxu3 %v5500_v9  ;;  %2148 = vmatmul.bf16.vlgmr.msra.gmra.mxu1 %v5495_v0  ;;  %v450_v25 = vadd.f32 %v449_v15, %v182_v40  ;;  %v464_v32 = vadd.f32 %v463_v19, %v183_v6  ;;  %v4984_v15 = vld [vmem:[#allocation8 + $0x5c4] sm:$0xf]  ;;  %v3698_v36 = vld [vmem:[#allocation8 + $0x230] sm:$0xf0]  ;;  %v4021_v37 = vor.u32 %v4948_v28, %v4018_v29 }
  0xd8   :  { %2186 = vmatpush.bf16.msrb.mxu0 %v3477_v59  ;;  %2200 = vmatpush.bf16.msrb.mxu1 %v3605_v1  ;;  %v4178_v59 = vld [vmem:[#allocation8 + $0x5f0] sm:$0xf0]  ;;  %v4876_v1 = vld [vmem:[#allocation8 + $0x264] sm:$0xf] }
  0xd9   :  { %2210 = vmatpush.bf16.msrb.mxu2 %v3797_v10  ;;  %2224 = vmatpush.bf16.msrb.mxu3 %v3925_v11  ;;  %v490_v45 = vmul.f32 0.2, %v450_v25  ;;  %vm474_vm13 = vcmp.gt.f32.partialorder %v450_v25, 0.0  ;;  %v491_v51 = vmul.f32 0.2, %v464_v32  ;;  %vm475_vm14 = vcmp.gt.f32.partialorder %v464_v32, 0.0 }
  0xda   :  { %v3858_v10 = vld [vmem:[#allocation8 + $0x370] sm:$0xf0]  ;;  %v4944_v42 = vld [vmem:[#allocation8 + $0x484] sm:$0xf] }
  0xdb   :  { %v506_v7 = vsel %vm474_vm13, %v450_v25, %v490_v45  ;;  %v507_v11 = vsel %vm475_vm14, %v464_v32, %v491_v51  ;;  %v4165_v25 = vor.u32 %v4984_v15, %v4162_v16  ;;  %v4146_v32 = vld [vmem:[#allocation8 + $0x5b0] sm:$0xf0]  ;;  %v4976_v44 = vld [vmem:[#allocation8 + $0x584] sm:$0xf] }
  0xdc   :  { %2187 = vmatpush.bf16.msrb.mxu0 %v3461_v20  ;;  %2201 = vmatpush.bf16.msrb.mxu1 %v3589_v21  ;;  %v3733_v20 = vor.u32 %v4876_v1, %v3730_v2  ;;  %v3861_v21 = vor.u32 %v4908_v4, %v3858_v10  ;;  %v4149_v38 = vor.u32 %v4980_v31, %v4146_v32  ;;  %v4002_v43 = vld [vmem:[#allocation8 + $0x490] sm:$0xf0]  ;;  %v4864_v49 = vld [vmem:[#allocation8 + $0x204] sm:$0xf] }
  0xdd   :  { %2211 = vmatpush.bf16.msrb.mxu2 %v3781_v26  ;;  %2225 = vmatpush.bf16.msrb.mxu3 %v3909_v27  ;;  %v4904_v26 = vld [vmem:[#allocation8 + $0x344] sm:$0xf]  ;;  %v3842_v27 = vld [vmem:[#allocation8 + $0x350] sm:$0xf0] }
  0xde   :  { %v451_v52 = vpop.f32.mrf.mxu2  ;;  %v465_v55 = vpop.f32.mrf.mxu3  ;;  %v3845_v34 = vor.u32 %v4904_v26, %v3842_v27  ;;  %v4130_v45 = vld [vmem:[#allocation8 + $0x590] sm:$0xf0]  ;;  %v4896_v51 = vld [vmem:[#allocation8 + $0x304] sm:$0xf] }
  0xdf   :  { %v452_v54 = vadd.f32 %v451_v52, %v182_v40  ;;  %v466_v60 = vadd.f32 %v465_v55, %v183_v6  ;;  %v4053_v40 = vor.u32 %v4956_v50, %v4050_v53  ;;  %v4181_v6 = vor.u32 %v4988_v57, %v4178_v59  ;;  %v3682_v50 = vld [vmem:[#allocation8 + $0x210] sm:$0xf0]  ;;  %v4940_v55 = vld [vmem:[#allocation8 + $0x464] sm:$0xf] }
  0xe0   :  { %2188 = vmatpush.bf16.msrb.mxu0 %v3445_v39  ;;  %2202 = vmatpush.bf16.msrb.mxu1 %v3573_v41  ;;  %v4900_v39 = vld [vmem:[#allocation8 + $0x324] sm:$0xf]  ;;  %v3826_v41 = vld [vmem:[#allocation8 + $0x330] sm:$0xf0]  ;;  %v4005_v52 = vor.u32 %v4944_v42, %v4002_v43  ;;  %v4133_v53 = vor.u32 %v4976_v44, %v4130_v45  ;;  %v3685_v1 = vor.u32 %v4864_v49, %v3682_v50  ;;  %v3544_v44 = vld [vmem:[#allocation8 + $0xe8] sm:$0xf] }
  0xe1   :  { %vm482_vm15 = vcmp.gt.f32.partialorder %v452_v54, 0.0  ;;  %v498_v8 = vmul.f32 0.2, %v452_v54  ;;  %2212 = vmatpush.bf16.msrb.mxu2 %v3765_v47  ;;  %2226 = vmatpush.bf16.msrb.mxu3 %v3893_v48  ;;  %vm483_vm0 = vcmp.gt.f32.partialorder %v466_v60, 0.0  ;;  %v499_v30 = vmul.f32 0.2, %v466_v60 }
  0xe2   :  { %v3701_v47 = vor.u32 %v4868_v35, %v3698_v36  ;;  %v3829_v48 = vor.u32 %v4900_v39, %v3826_v41  ;;  %v4114_v57 = vld [vmem:[#allocation8 + $0x570] sm:$0xf0]  ;;  %v5020_v59 = vld [vmem:[#allocation8 + $0x6e4] sm:$0xf]  ;;  %v4831_v45 = vld [vmem:[#allocation8 + $0xf4] sm:$0xf0] }
  0xe3   :  { %v514_v13 = vsel %vm482_vm15, %v452_v54, %v498_v8  ;;  %v515_v18 = vsel %vm483_vm0, %v466_v60, %v499_v30  ;;  %v3810_v54 = vld [vmem:[#allocation8 + $0x310] sm:$0xf0]  ;;  %v4936_v8 = vld [vmem:[#allocation8 + $0x444] sm:$0xf] }
  0xe4   :  { %v5516_v17 = vpack.c.bf16 %v514_v13, %v506_v7  ;;  %2189 = vmatpush.bf16.msrb.mxu0 %v3429_v56  ;;  %2203 = vmatpush.bf16.msrb.mxu1 %v3557_v46  ;;  %v5518_v19 = vpack.c.bf16 %v515_v18, %v507_v11  ;;  %v3986_v56 = vld [vmem:[#allocation8 + $0x470] sm:$0xf0]  ;;  %v4972_v46 = vld [vmem:[#allocation8 + $0x564] sm:$0xf]  ;;  %v3813_v2 = vor.u32 %v4896_v51, %v3810_v54 }
  0xe5   :  { %2213 = vmatpush.bf16.msrb.mxu2 %v3749_v61  ;;  %2227 = vmatpush.bf16.msrb.mxu3 %v3877_v62  ;;  %v4306_v60 = vld [vmem:[#allocation8 + $0x6f0] sm:$0xf0]  ;;  %v5052_v61 = vld [vmem:[#allocation8 + $0x7e4] sm:$0xf]  ;;  %v3989_v4 = vor.u32 %v4940_v55, %v3986_v56  ;;  %v4117_v7 = vor.u32 %v4972_v46, %v4114_v57  ;;  %v3545_v55 = vor.u32 %v4831_v45, %v3544_v44  ;;  %v3928_v44 = vld [vmem:[#allocation8 + $0x3e8] sm:$0xf] }
  0xe6   :  { %2162 = vmatmul.bf16.vlgmr.msra.gmra.mxu2 %v5516_v17  ;;  %v4434_v62 = vld [vmem:[#allocation8 + $0x7f0] sm:$0xf0]  ;;  %v4309_v10 = vor.u32 %v5020_v59, %v4306_v60  ;;  %v4968_v30 = vld [vmem:[#allocation8 + $0x544] sm:$0xf]  ;;  %v3528_v59 = vld [vmem:[#allocation8 + $0xc8] sm:$0xf] }
  0xe7   :  { %2176 = vmatmul.bf16.vlgmr.msra.gmra.mxu3 %v5518_v19  ;;  %2190 = vmatmul.bf16.vlgmr.msrb.gmra.mxu0 %v5482_v63  ;;  %v4437_v11 = vor.u32 %v5052_v61, %v4434_v62  ;;  %v4290_v13 = vld [vmem:[#allocation8 + $0x6d0] sm:$0xf0]  ;;  %v5048_v14 = vld [vmem:[#allocation8 + $0x7c4] sm:$0xf]  ;;  %v4827_v60 = vld [vmem:[#allocation8 + $0xd4] sm:$0xf0] }
  0xe8   :  { %2238 = vmatpush.bf16.msra.mxu0 %v4053_v40  ;;  %2252 = vmatpush.bf16.msra.mxu1 %v4181_v6  ;;  %v3970_v40 = vld [vmem:[#allocation8 + $0x450] sm:$0xf0]  ;;  %v4293_v22 = vor.u32 %v5016_v12, %v4290_v13  ;;  %v5012_v26 = vld [vmem:[#allocation8 + $0x6a4] sm:$0xf]  ;;  %v3656_v61 = vld [vmem:[#allocation8 + $0x1c8] sm:$0xf] }
  0xe9   :  { %2204 = vmatmul.bf16.vlgmr.msrb.gmra.mxu1 %v5484_v5  ;;  %2214 = vmatpush.bf16.msrb.mxu2 %v3733_v20  ;;  %v4098_v6 = vld [vmem:[#allocation8 + $0x550] sm:$0xf0]  ;;  %v3973_v16 = vor.u32 %v4936_v8, %v3970_v40  ;;  %v4932_v20 = vld [vmem:[#allocation8 + $0x424] sm:$0xf]  ;;  %v4859_v62 = vld [vmem:[#allocation8 + $0x1d4] sm:$0xf0]  ;;  %v3529_v8 = vor.u32 %v4827_v60, %v3528_v59 }
  0xea   :  { %2228 = vmatpush.bf16.msrb.mxu3 %v3861_v21  ;;  %v4418_v15 = vld [vmem:[#allocation8 + $0x7d0] sm:$0xf0]  ;;  %v4101_v18 = vor.u32 %v4968_v30, %v4098_v6  ;;  %v5044_v28 = vld [vmem:[#allocation8 + $0x7a4] sm:$0xf]  ;;  %v3657_v40 = vor.u32 %v4859_v62, %v3656_v61  ;;  %v3512_v30 = vld [vmem:[#allocation8 + $0xa8] sm:$0xf] }
  0xeb   :  { %v3954_v21 = vld [vmem:[#allocation8 + $0x430] sm:$0xf0]  ;;  %v4421_v23 = vor.u32 %v5048_v14, %v4418_v15  ;;  %v4960_v35 = vld [vmem:[#allocation8 + $0x504] sm:$0xf]  ;;  %v4823_v6 = vld [vmem:[#allocation8 + $0xb4] sm:$0xf0] }
  0xec   :  { %2239 = vmatpush.bf16.msra.mxu0 %v4037_v24  ;;  %2253 = vmatpush.bf16.msra.mxu1 %v4165_v25  ;;  %v4964_v24 = vld [vmem:[#allocation8 + $0x524] sm:$0xf]  ;;  %v4082_v25 = vld [vmem:[#allocation8 + $0x530] sm:$0xf0]  ;;  %v3957_v31 = vor.u32 %v4932_v20, %v3954_v21  ;;  %v3640_v12 = vld [vmem:[#allocation8 + $0x1a8] sm:$0xf]  ;;  %v3513_v20 = vor.u32 %v4823_v6, %v3512_v30 }
  0xed   :  { %2215 = vmatpush.bf16.msrb.mxu2 %v3717_v33  ;;  %v4274_v27 = vld [vmem:[#allocation8 + $0x6b0] sm:$0xf0]  ;;  %v4085_v32 = vor.u32 %v4964_v24, %v4082_v25  ;;  %v4928_v33 = vld [vmem:[#allocation8 + $0x404] sm:$0xf]  ;;  %v4855_v13 = vld [vmem:[#allocation8 + $0x1b4] sm:$0xf0] }
  0xee   :  { %2229 = vmatpush.bf16.msrb.mxu3 %v3845_v34  ;;  %v4402_v29 = vld [vmem:[#allocation8 + $0x7b0] sm:$0xf0]  ;;  %v4277_v36 = vor.u32 %v5012_v26, %v4274_v27  ;;  %v5008_v39 = vld [vmem:[#allocation8 + $0x684] sm:$0xf]  ;;  %v3641_v21 = vor.u32 %v4855_v13, %v3640_v12  ;;  %v3496_v24 = vld [vmem:[#allocation8 + $0x88] sm:$0xf] }
  0xef   :  { %v3938_v34 = vld [vmem:[#allocation8 + $0x410] sm:$0xf0]  ;;  %v5040_v42 = vld [vmem:[#allocation8 + $0x784] sm:$0xf]  ;;  %v4819_v25 = vld [vmem:[#allocation8 + $0x94] sm:$0xf0] }
  0xf0   :  { %2240 = vmatpush.bf16.msra.mxu0 %v4021_v37  ;;  %2254 = vmatpush.bf16.msra.mxu1 %v4149_v38  ;;  %v4405_v37 = vor.u32 %v5044_v28, %v4402_v29  ;;  %v4066_v38 = vld [vmem:[#allocation8 + $0x510] sm:$0xf0]  ;;  %v3941_v49 = vor.u32 %v4928_v33, %v3938_v34  ;;  %v5036_v46 = vld [vmem:[#allocation8 + $0x764] sm:$0xf]  ;;  %v3624_v26 = vld [vmem:[#allocation8 + $0x188] sm:$0xf]  ;;  %v3497_v34 = vor.u32 %v4819_v25, %v3496_v24 }
  0xf1   :  { %2216 = vmatpush.bf16.msrb.mxu2 %v3701_v47  ;;  %v4258_v41 = vld [vmem:[#allocation8 + $0x690] sm:$0xf0]  ;;  %v3672_v47 = vld [vmem:[#allocation8 + $0x1e8] sm:$0xf]  ;;  %v4069_v50 = vor.u32 %v4960_v35, %v4066_v38  ;;  %v4851_v27 = vld [vmem:[#allocation8 + $0x194] sm:$0xf0] }
  0xf2   :  { %2230 = vmatpush.bf16.msrb.mxu3 %v3829_v48  ;;  %v4386_v43 = vld [vmem:[#allocation8 + $0x790] sm:$0xf0]  ;;  %v4863_v48 = vld [vmem:[#allocation8 + $0x1f4] sm:$0xf0]  ;;  %v4261_v51 = vor.u32 %v5008_v39, %v4258_v41  ;;  %v5024_v33 = vld [vmem:[#allocation8 + $0x704] sm:$0xf]  ;;  %v3625_v35 = vor.u32 %v4851_v27, %v3624_v26 }
  0xf3   :  { %v4242_v54 = vld [vmem:[#allocation8 + $0x670] sm:$0xf0]  ;;  %v3673_v56 = vor.u32 %v4863_v48, %v3672_v47  ;;  %v4815_v38 = vld [vmem:[#allocation8 + $0x74] sm:$0xf0]  ;;  %v3608_v39 = vld [vmem:[#allocation8 + $0x168] sm:$0xf] }
  0xf4   :  { %2241 = vmatpush.bf16.msra.mxu0 %v4005_v52  ;;  %2255 = vmatpush.bf16.msra.mxu1 %v4133_v53  ;;  %v4389_v52 = vor.u32 %v5040_v42, %v4386_v43  ;;  %v5004_v53 = vld [vmem:[#allocation8 + $0x664] sm:$0xf]  ;;  %v4370_v57 = vld [vmem:[#allocation8 + $0x770] sm:$0xf0]  ;;  %v4847_v41 = vld [vmem:[#allocation8 + $0x174] sm:$0xf0] }
  0xf5   :  { %2217 = vmatpush.bf16.msrb.mxu2 %v3685_v1  ;;  %v4245_v1 = vor.u32 %v5004_v53, %v4242_v54  ;;  %v3800_v42 = vld [vmem:[#allocation8 + $0x2e8] sm:$0xf]  ;;  %v4895_v43 = vld [vmem:[#allocation8 + $0x2f4] sm:$0xf0] }
  0xf6   :  { %2231 = vmatpush.bf16.msrb.mxu3 %v3813_v2  ;;  %v4373_v2 = vor.u32 %v5036_v46, %v4370_v57  ;;  %v4927_v45 = vld [vmem:[#allocation8 + $0x3f4] sm:$0xf0]  ;;  %v3801_v53 = vor.u32 %v4895_v43, %v3800_v42  ;;  %v3784_v46 = vld [vmem:[#allocation8 + $0x2c8] sm:$0xf] }
  0xf7   :  { %v3929_v54 = vor.u32 %v4927_v45, %v3928_v44  ;;  %v4891_v57 = vld [vmem:[#allocation8 + $0x2d4] sm:$0xf0]  ;;  %v3912_v59 = vld [vmem:[#allocation8 + $0x3c8] sm:$0xf] }
  0xf8   :  { %2242 = vmatpush.bf16.msra.mxu0 %v3989_v4  ;;  %2256 = vmatpush.bf16.msra.mxu1 %v4117_v7  ;;  %v5000_v4 = vld [vmem:[#allocation8 + $0x644] sm:$0xf]  ;;  %v4226_v7 = vld [vmem:[#allocation8 + $0x650] sm:$0xf0]  ;;  %v4923_v60 = vld [vmem:[#allocation8 + $0x3d4] sm:$0xf0] }
  0xf9   :  { %2266 = vmatpush.bf16.msra.mxu2 %v4309_v10  ;;  %2232 = vmatmul.bf16.vlgmr.msrb.gmra.mxu3 %v5500_v9  ;;  %v5032_v10 = vld [vmem:[#allocation8 + $0x744] sm:$0xf]  ;;  %v4229_v14 = vor.u32 %v5000_v4, %v4226_v7  ;;  %v3785_v4 = vor.u32 %v4891_v57, %v3784_v46  ;;  %v3913_v7 = vor.u32 %v4923_v60, %v3912_v59  ;;  %v3896_v30 = vld [vmem:[#allocation8 + $0x3a8] sm:$0xf]  ;;  %v4919_v6 = vld [vmem:[#allocation8 + $0x3b4] sm:$0xf0] }
  0xfa   :  { %2280 = vmatpush.bf16.msra.mxu3 %v4437_v11  ;;  %2218 = vmatmul.bf16.vlgmr.msrb.gmra.mxu2 %v5497_v3  ;;  %v4354_v11 = vld [vmem:[#allocation8 + $0x750] sm:$0xf0]  ;;  %v3880_v24 = vld [vmem:[#allocation8 + $0x388] sm:$0xf]  ;;  %v4915_v25 = vld [vmem:[#allocation8 + $0x394] sm:$0xf0] }
  0xfb   :  { %v4357_v15 = vor.u32 %v5032_v10, %v4354_v11  ;;  %v3768_v10 = vld [vmem:[#allocation8 + $0x2a8] sm:$0xf]  ;;  %v4887_v11 = vld [vmem:[#allocation8 + $0x2b4] sm:$0xf0] }
  0xfc   :  { %2243 = vmatpush.bf16.msra.mxu0 %v3973_v16  ;;  %2257 = vmatpush.bf16.msra.mxu1 %v4101_v18  ;;  %v4996_v16 = vld [vmem:[#allocation8 + $0x624] sm:$0xf]  ;;  %v4210_v18 = vld [vmem:[#allocation8 + $0x630] sm:$0xf0]  ;;  %v4056_v26 = vld [vmem:[#allocation8 + $0x4e8] sm:$0xf] }
  0xfd   :  { %2267 = vmatpush.bf16.msra.mxu2 %v4293_v22  ;;  %v5028_v22 = vld [vmem:[#allocation8 + $0x724] sm:$0xf]  ;;  %v4213_v28 = vor.u32 %v4996_v16, %v4210_v18  ;;  %v3560_v16 = vld [vmem:[#allocation8 + $0x108] sm:$0xf]  ;;  %v3769_v18 = vor.u32 %v4887_v11, %v3768_v10  ;;  %v4959_v27 = vld [vmem:[#allocation8 + $0x4f4] sm:$0xf0] }
  0xfe   :  { %2281 = vmatpush.bf16.msra.mxu3 %v4421_v23  ;;  %v4338_v23 = vld [vmem:[#allocation8 + $0x730] sm:$0xf0]  ;;  %v4040_v42 = vld [vmem:[#allocation8 + $0x4c8] sm:$0xf]  ;;  %v4955_v43 = vld [vmem:[#allocation8 + $0x4d4] sm:$0xf0] }
  0xff   :  { %v4341_v29 = vor.u32 %v5028_v22, %v4338_v23  ;;  %v3752_v22 = vld [vmem:[#allocation8 + $0x288] sm:$0xf]  ;;  %v4883_v23 = vld [vmem:[#allocation8 + $0x294] sm:$0xf0] }
 0x100   :  { %2244 = vmatpush.bf16.msra.mxu0 %v3957_v31  ;;  %2258 = vmatpush.bf16.msra.mxu1 %v4085_v32  ;;  %v4992_v31 = vld [vmem:[#allocation8 + $0x604] sm:$0xf]  ;;  %v4194_v32 = vld [vmem:[#allocation8 + $0x610] sm:$0xf0]  ;;  %v4168_v44 = vld [vmem:[#allocation8 + $0x5c8] sm:$0xf] }
 0x101   :  { %2268 = vmatpush.bf16.msra.mxu2 %v4277_v36  ;;  %v4322_v36 = vld [vmem:[#allocation8 + $0x710] sm:$0xf0]  ;;  %v4197_v47 = vor.u32 %v4992_v31, %v4194_v32  ;;  %v4987_v45 = vld [vmem:[#allocation8 + $0x5d4] sm:$0xf0]  ;;  %v4152_v46 = vld [vmem:[#allocation8 + $0x5a8] sm:$0xf] }
 0x102   :  { %2282 = vmatpush.bf16.msra.mxu3 %v4405_v37  ;;  %v3480_v37 = vld [vmem:[#allocation8 + $0x68] sm:$0xf]  ;;  %v4325_v48 = vor.u32 %v5024_v33, %v4322_v36  ;;  %v3753_v33 = vor.u32 %v4883_v23, %v3752_v22  ;;  %v4879_v36 = vld [vmem:[#allocation8 + $0x274] sm:$0xf0] }
 0x103   :  { %v4983_v57 = vld [vmem:[#allocation8 + $0x5b4] sm:$0xf0]  ;;  %v4136_v10 = vld [vmem:[#allocation8 + $0x588] sm:$0xf] }
 0x104   :  { %2245 = vmatpush.bf16.msra.mxu0 %v3941_v49  ;;  %2259 = vmatpush.bf16.msra.mxu1 %v4069_v50  ;;  %v3481_v49 = vor.u32 %v4815_v38, %v3480_v37  ;;  %v3609_v50 = vor.u32 %v4847_v41, %v3608_v39  ;;  %v4057_v37 = vor.u32 %v4959_v27, %v4056_v26  ;;  %v3864_v39 = vld [vmem:[#allocation8 + $0x368] sm:$0xf]  ;;  %v4911_v41 = vld [vmem:[#allocation8 + $0x374] sm:$0xf0] }
 0x105   :  { %2269 = vmatpush.bf16.msra.mxu2 %v4261_v51  ;;  %v3464_v51 = vld [vmem:[#allocation8 + $0x48] sm:$0xf]  ;;  %v4979_v11 = vld [vmem:[#allocation8 + $0x594] sm:$0xf0] }
 0x106   :  { %2283 = vmatpush.bf16.msra.mxu3 %v4389_v52  ;;  %v4811_v52 = vld [vmem:[#allocation8 + $0x54] sm:$0xf0]  ;;  %v4120_v22 = vld [vmem:[#allocation8 + $0x568] sm:$0xf] }
 0x107   :  { %2246 = vmatmul.bf16.vlgmr.msra.gmra.mxu0 %v5492_v58  ;;  %2260 = vmatmul.bf16.vlgmr.msra.gmra.mxu1 %v5495_v0  ;;  %v3465_v61 = vor.u32 %v4811_v52, %v3464_v51  ;;  %v4041_v51 = vor.u32 %v4955_v43, %v4040_v42  ;;  %v4169_v52 = vor.u32 %v4987_v45, %v4168_v44  ;;  %v4975_v23 = vld [vmem:[#allocation8 + $0x574] sm:$0xf0]  ;;  %v4440_v26 = vld [vmem:[#allocation8 + $0x7e8] sm:$0xf] }
 0x108   :  { %2294 = vmatpush.bf16.msrb.mxu0 %v3545_v55  ;;  %2308 = vmatpush.bf16.msrb.mxu1 %v3673_v56  ;;  %v3592_v55 = vld [vmem:[#allocation8 + $0x148] sm:$0xf]  ;;  %v4843_v56 = vld [vmem:[#allocation8 + $0x154] sm:$0xf0] }
 0x109   :  { %2270 = vmatpush.bf16.msra.mxu2 %v4245_v1  ;;  %v3593_v62 = vor.u32 %v4843_v56, %v3592_v55  ;;  %v3448_v1 = vld [vmem:[#allocation8 + $0x28] sm:$0xf]  ;;  %v4951_v56 = vld [vmem:[#allocation8 + $0x4b4] sm:$0xf0] }
 0x10a   :  { %2284 = vmatpush.bf16.msra.mxu3 %v4373_v2  ;;  %v4807_v2 = vld [vmem:[#allocation8 + $0x34] sm:$0xf0]  ;;  %v4024_v55 = vld [vmem:[#allocation8 + $0x4a8] sm:$0xf] }
 0x10b   :  { %v3449_v12 = vor.u32 %v4807_v2, %v3448_v1  ;;  %v4025_v1 = vor.u32 %v4951_v56, %v4024_v55  ;;  %v4153_v2 = vor.u32 %v4983_v57, %v4152_v46  ;;  %v5055_v27 = vld [vmem:[#allocation8 + $0x7f4] sm:$0xf0]  ;;  %v4424_v42 = vld [vmem:[#allocation8 + $0x7c8] sm:$0xf] }
 0x10c   :  { %2295 = vmatpush.bf16.msrb.mxu0 %v3529_v8  ;;  %2309 = vmatpush.bf16.msrb.mxu1 %v3657_v40  ;;  %v3576_v8 = vld [vmem:[#allocation8 + $0x128] sm:$0xf]  ;;  %v4839_v40 = vld [vmem:[#allocation8 + $0x134] sm:$0xf0] }
 0x10d   :  { %2271 = vmatpush.bf16.msra.mxu2 %v4229_v14  ;;  %v3577_v13 = vor.u32 %v4839_v40, %v3576_v8  ;;  %v3432_v14 = vld [vmem:[#allocation8 + $0x8] sm:$0xf]  ;;  %v4947_v40 = vld [vmem:[#allocation8 + $0x494] sm:$0xf0] }
 0x10e   :  { %2285 = vmatpush.bf16.msra.mxu3 %v4357_v15  ;;  %v4803_v15 = vld [vmem:[#allocation8 + $0x14] sm:$0xf0]  ;;  %v4008_v8 = vld [vmem:[#allocation8 + $0x488] sm:$0xf] }
 0x10f   :  { %v3433_v31 = vor.u32 %v4803_v15, %v3432_v14  ;;  %v3816_v14 = vld [vmem:[#allocation8 + $0x308] sm:$0xf]  ;;  %v4009_v15 = vor.u32 %v4947_v40, %v4008_v8  ;;  %v5051_v43 = vld [vmem:[#allocation8 + $0x7d4] sm:$0xf0] }
 0x110   :  { %2296 = vmatpush.bf16.msrb.mxu0 %v3513_v20  ;;  %2310 = vmatpush.bf16.msrb.mxu1 %v3641_v21  ;;  %v3897_v20 = vor.u32 %v4919_v6, %v3896_v30  ;;  %v4835_v21 = vld [vmem:[#allocation8 + $0x114] sm:$0xf0]  ;;  %v4408_v55 = vld [vmem:[#allocation8 + $0x7a8] sm:$0xf] }
 0x111   :  { %2272 = vmatpush.bf16.msra.mxu2 %v4213_v28  ;;  %v4184_v28 = vld [vmem:[#allocation8 + $0x5e8] sm:$0xf]  ;;  %v3561_v32 = vor.u32 %v4835_v21, %v3560_v16  ;;  %v4137_v16 = vor.u32 %v4979_v11, %v4136_v10  ;;  %v4943_v21 = vld [vmem:[#allocation8 + $0x474] sm:$0xf0]  ;;  %v4829_v10 = vld [vmem:[#allocation8 + $0xec] sm:$0xf] }
 0x112   :  { %2286 = vmatpush.bf16.msra.mxu3 %v4341_v29  ;;  %v4991_v29 = vld [vmem:[#allocation8 + $0x5f4] sm:$0xf0]  ;;  %v4392_v8 = vld [vmem:[#allocation8 + $0x788] sm:$0xf]  ;;  %v3546_v11 = vld [vmem:[#allocation8 + $0xf8] sm:$0xf0] }
 0x113   :  { %v4185_v38 = vor.u32 %v4991_v29, %v4184_v28  ;;  %v5047_v56 = vld [vmem:[#allocation8 + $0x7b4] sm:$0xf0] }
 0x114   :  { %2297 = vmatpush.bf16.msrb.mxu0 %v3497_v34  ;;  %2311 = vmatpush.bf16.msrb.mxu1 %v3625_v35  ;;  %v3881_v34 = vor.u32 %v4915_v25, %v3880_v24  ;;  %v3736_v35 = vld [vmem:[#allocation8 + $0x268] sm:$0xf]  ;;  %v5023_v25 = vld [vmem:[#allocation8 + $0x6f4] sm:$0xf0] }
 0x115   :  { %2273 = vmatpush.bf16.msra.mxu2 %v4197_v47  ;;  %v3737_v47 = vor.u32 %v4879_v36, %v3736_v35  ;;  %v4312_v24 = vld [vmem:[#allocation8 + $0x6e8] sm:$0xf]  ;;  %v4441_v36 = vor.u32 %v5055_v27, %v4440_v26  ;;  %v5043_v40 = vld [vmem:[#allocation8 + $0x794] sm:$0xf0]  ;;  %v4857_v26 = vld [vmem:[#allocation8 + $0x1cc] sm:$0xf] }
 0x116   :  { %2287 = vmatpush.bf16.msra.mxu3 %v4325_v48  ;;  %v3865_v48 = vor.u32 %v4911_v41, %v3864_v39  ;;  %v4313_v35 = vor.u32 %v5023_v25, %v4312_v24  ;;  %v4296_v39 = vld [vmem:[#allocation8 + $0x6c8] sm:$0xf]  ;;  %v5019_v41 = vld [vmem:[#allocation8 + $0x6d4] sm:$0xf0]  ;;  %v4825_v24 = vld [vmem:[#allocation8 + $0xcc] sm:$0xf] }
 0x117   :  { %v3530_v25 = vld [vmem:[#allocation8 + $0xd8] sm:$0xf0] }
 0x118   :  { %2298 = vmatpush.bf16.msrb.mxu0 %v3481_v49  ;;  %2312 = vmatpush.bf16.msrb.mxu1 %v3609_v50  ;;  %v3720_v49 = vld [vmem:[#allocation8 + $0x248] sm:$0xf]  ;;  %v4875_v50 = vld [vmem:[#allocation8 + $0x254] sm:$0xf0]  ;;  %v3658_v27 = vld [vmem:[#allocation8 + $0x1d8] sm:$0xf0] }
 0x119   :  { %2322 = vmatpush.bf16.msrb.mxu2 %v3801_v53  ;;  %2288 = vmatmul.bf16.vlgmr.msra.gmra.mxu3 %v5518_v19  ;;  %v3848_v53 = vld [vmem:[#allocation8 + $0x348] sm:$0xf]  ;;  %v3721_v59 = vor.u32 %v4875_v50, %v3720_v49  ;;  %v4297_v49 = vor.u32 %v5019_v41, %v4296_v39  ;;  %v4425_v50 = vor.u32 %v5051_v43, %v4424_v42  ;;  %v4853_v39 = vld [vmem:[#allocation8 + $0x1ac] sm:$0xf]  ;;  %v3642_v41 = vld [vmem:[#allocation8 + $0x1b8] sm:$0xf0] }
 0x11a   :  { %2336 = vmatpush.bf16.msrb.mxu3 %v3929_v54  ;;  %2274 = vmatmul.bf16.vlgmr.msra.gmra.mxu2 %v5516_v17  ;;  %v4907_v54 = vld [vmem:[#allocation8 + $0x354] sm:$0xf0] }
 0x11b   :  { %v3849_v60 = vor.u32 %v4907_v54, %v3848_v53  ;;  %v4280_v53 = vld [vmem:[#allocation8 + $0x6a8] sm:$0xf]  ;;  %v5015_v54 = vld [vmem:[#allocation8 + $0x6b4] sm:$0xf0] }
 0x11c   :  { %2299 = vmatpush.bf16.msrb.mxu0 %v3465_v61  ;;  %2313 = vmatpush.bf16.msrb.mxu1 %v3593_v62  ;;  %v3704_v61 = vld [vmem:[#allocation8 + $0x228] sm:$0xf]  ;;  %v4871_v62 = vld [vmem:[#allocation8 + $0x234] sm:$0xf0] }
 0x11d   :  { %2323 = vmatpush.bf16.msrb.mxu2 %v3785_v4  ;;  %v3832_v4 = vld [vmem:[#allocation8 + $0x328] sm:$0xf]  ;;  %v3705_v30 = vor.u32 %v4871_v62, %v3704_v61  ;;  %v4281_v62 = vor.u32 %v5015_v54, %v4280_v53  ;;  %v4849_v53 = vld [vmem:[#allocation8 + $0x18c] sm:$0xf]  ;;  %v3626_v54 = vld [vmem:[#allocation8 + $0x198] sm:$0xf0] }
 0x11e   :  { %2337 = vmatpush.bf16.msrb.mxu3 %v3913_v7  ;;  %v4903_v7 = vld [vmem:[#allocation8 + $0x334] sm:$0xf0]  ;;  %v4072_v61 = vld [vmem:[#allocation8 + $0x508] sm:$0xf] }
 0x11f   :  { %v3833_v6 = vor.u32 %v4903_v7, %v3832_v4  ;;  %v4264_v4 = vld [vmem:[#allocation8 + $0x688] sm:$0xf]  ;;  %v5011_v7 = vld [vmem:[#allocation8 + $0x694] sm:$0xf0] }
 0x120   :  { %2300 = vmatpush.bf16.msrb.mxu0 %v3449_v12  ;;  %2314 = vmatpush.bf16.msrb.mxu1 %v3577_v13  ;;  %v3688_v12 = vld [vmem:[#allocation8 + $0x208] sm:$0xf]  ;;  %v4867_v13 = vld [vmem:[#allocation8 + $0x214] sm:$0xf0] }
 0x121   :  { %2324 = vmatpush.bf16.msrb.mxu2 %v3769_v18  ;;  %v4899_v18 = vld [vmem:[#allocation8 + $0x314] sm:$0xf0]  ;;  %v3689_v28 = vor.u32 %v4867_v13, %v3688_v12 }
 0x122   :  { %2338 = vmatpush.bf16.msrb.mxu3 %v3897_v20  ;;  %v3992_v20 = vld [vmem:[#allocation8 + $0x468] sm:$0xf]  ;;  %v3817_v29 = vor.u32 %v4899_v18, %v3816_v14  ;;  %v4265_v14 = vor.u32 %v5011_v7, %v4264_v4  ;;  %v5007_v18 = vld [vmem:[#allocation8 + $0x674] sm:$0xf0]  ;;  %v4845_v4 = vld [vmem:[#allocation8 + $0x16c] sm:$0xf] }
 0x123   :  { %v3610_v7 = vld [vmem:[#allocation8 + $0x178] sm:$0xf0] }
 0x124   :  { %2301 = vmatpush.bf16.msrb.mxu0 %v3433_v31  ;;  %2315 = vmatpush.bf16.msrb.mxu1 %v3561_v32  ;;  %v3993_v31 = vor.u32 %v4943_v21, %v3992_v20  ;;  %v4121_v32 = vor.u32 %v4975_v23, %v4120_v22  ;;  %v3549_v20 = vor.u32 %v4829_v10, %v3546_v11  ;;  %v4376_v22 = vld [vmem:[#allocation8 + $0x768] sm:$0xf]  ;;  %v5039_v23 = vld [vmem:[#allocation8 + $0x774] sm:$0xf0]  ;;  %v4925_v10 = vld [vmem:[#allocation8 + $0x3ec] sm:$0xf] }
 0x125   :  { %2325 = vmatpush.bf16.msrb.mxu2 %v3753_v33  ;;  %v3976_v33 = vld [vmem:[#allocation8 + $0x448] sm:$0xf]  ;;  %v3930_v11 = vld [vmem:[#allocation8 + $0x3f8] sm:$0xf0] }
 0x126   :  { %2339 = vmatpush.bf16.msrb.mxu3 %v3881_v34  ;;  %v4939_v34 = vld [vmem:[#allocation8 + $0x454] sm:$0xf0] }
 0x127   :  { %2302 = vmatmul.bf16.vlgmr.msrb.gmra.mxu0 %v5482_v63  ;;  %2316 = vmatmul.bf16.vlgmr.msrb.gmra.mxu1 %v5484_v5  ;;  %v3977_v44 = vor.u32 %v4939_v34, %v3976_v33  ;;  %v3533_v33 = vor.u32 %v4825_v24, %v3530_v25  ;;  %v3661_v34 = vor.u32 %v4857_v26, %v3658_v27  ;;  %v4921_v24 = vld [vmem:[#allocation8 + $0x3cc] sm:$0xf]  ;;  %v3914_v25 = vld [vmem:[#allocation8 + $0x3d8] sm:$0xf0] }
 0x128   :  { %2350 = vmatpush.bf16.msra.mxu0 %v4057_v37  ;;  %2364 = vmatpush.bf16.msra.mxu1 %v4185_v38  ;;  %v4104_v37 = vld [vmem:[#allocation8 + $0x548] sm:$0xf]  ;;  %v4971_v38 = vld [vmem:[#allocation8 + $0x554] sm:$0xf0] }
 0x129   :  { %2326 = vmatpush.bf16.msrb.mxu2 %v3737_v47  ;;  %v4105_v45 = vor.u32 %v4971_v38, %v4104_v37  ;;  %v3960_v47 = vld [vmem:[#allocation8 + $0x428] sm:$0xf]  ;;  %v4821_v37 = vld [vmem:[#allocation8 + $0xac] sm:$0xf]  ;;  %v3514_v38 = vld [vmem:[#allocation8 + $0xb8] sm:$0xf0] }
 0x12a   :  { %2340 = vmatpush.bf16.msrb.mxu3 %v3865_v48  ;;  %v4935_v48 = vld [vmem:[#allocation8 + $0x434] sm:$0xf0] }
 0x12b   :  { %v3961_v46 = vor.u32 %v4935_v48, %v3960_v47  ;;  %v3517_v47 = vor.u32 %v4821_v37, %v3514_v38  ;;  %v3645_v48 = vor.u32 %v4853_v39, %v3642_v41  ;;  %v4917_v37 = vld [vmem:[#allocation8 + $0x3ac] sm:$0xf]  ;;  %v3898_v38 = vld [vmem:[#allocation8 + $0x3b8] sm:$0xf0] }
 0x12c   :  { %2351 = vmatpush.bf16.msra.mxu0 %v4041_v51  ;;  %2365 = vmatpush.bf16.msra.mxu1 %v4169_v52  ;;  %v4088_v51 = vld [vmem:[#allocation8 + $0x528] sm:$0xf]  ;;  %v4967_v52 = vld [vmem:[#allocation8 + $0x534] sm:$0xf0] }
 0x12d   :  { %2327 = vmatpush.bf16.msrb.mxu2 %v3721_v59  ;;  %v4089_v57 = vor.u32 %v4967_v52, %v4088_v51  ;;  %v3944_v59 = vld [vmem:[#allocation8 + $0x408] sm:$0xf]  ;;  %v4817_v51 = vld [vmem:[#allocation8 + $0x8c] sm:$0xf]  ;;  %v3498_v52 = vld [vmem:[#allocation8 + $0x98] sm:$0xf0] }
 0x12e   :  { %2341 = vmatpush.bf16.msrb.mxu3 %v3849_v60  ;;  %v4931_v60 = vld [vmem:[#allocation8 + $0x414] sm:$0xf0] }
 0x12f   :  { %v3945_v12 = vor.u32 %v4931_v60, %v3944_v59  ;;  %v4328_v59 = vld [vmem:[#allocation8 + $0x708] sm:$0xf]  ;;  %v3501_v60 = vor.u32 %v4817_v51, %v3498_v52  ;;  %v3754_v51 = vld [vmem:[#allocation8 + $0x298] sm:$0xf0]  ;;  %v4913_v52 = vld [vmem:[#allocation8 + $0x38c] sm:$0xf] }
 0x130   :  { %2352 = vmatpush.bf16.msra.mxu0 %v4025_v1  ;;  %2366 = vmatpush.bf16.msra.mxu1 %v4153_v2  ;;  %v4409_v1 = vor.u32 %v5047_v56, %v4408_v55  ;;  %v4963_v2 = vld [vmem:[#allocation8 + $0x514] sm:$0xf0] }
 0x131   :  { %2328 = vmatpush.bf16.msrb.mxu2 %v3705_v30  ;;  %v4861_v30 = vld [vmem:[#allocation8 + $0x1ec] sm:$0xf]  ;;  %v4073_v13 = vor.u32 %v4963_v2, %v4072_v61  ;;  %v3629_v61 = vor.u32 %v4849_v53, %v3626_v54  ;;  %v3482_v2 = vld [vmem:[#allocation8 + $0x78] sm:$0xf0] }
 0x132   :  { %2342 = vmatpush.bf16.msrb.mxu3 %v3833_v6  ;;  %v3674_v6 = vld [vmem:[#allocation8 + $0x1f8] sm:$0xf0]  ;;  %v4957_v54 = vld [vmem:[#allocation8 + $0x4ec] sm:$0xf] }
 0x133   :  { %v3677_v21 = vor.u32 %v4861_v30, %v3674_v6  ;;  %v3882_v53 = vld [vmem:[#allocation8 + $0x398] sm:$0xf0] }
 0x134   :  { %2353 = vmatpush.bf16.msra.mxu0 %v4009_v15  ;;  %2367 = vmatpush.bf16.msra.mxu1 %v4137_v16  ;;  %v4393_v15 = vor.u32 %v5043_v40, %v4392_v8  ;;  %v4248_v16 = vld [vmem:[#allocation8 + $0x668] sm:$0xf]  ;;  %v4893_v8 = vld [vmem:[#allocation8 + $0x2ec] sm:$0xf]  ;;  %v3802_v40 = vld [vmem:[#allocation8 + $0x2f8] sm:$0xf0] }
 0x135   :  { %2329 = vmatpush.bf16.msrb.mxu2 %v3689_v28  ;;  %v4249_v28 = vor.u32 %v5007_v18, %v4248_v16  ;;  %v3805_v16 = vor.u32 %v4893_v8, %v3802_v40  ;;  %v3933_v18 = vor.u32 %v4925_v10, %v3930_v11  ;;  %v3866_v8 = vld [vmem:[#allocation8 + $0x378] sm:$0xf0]  ;;  %v4953_v40 = vld [vmem:[#allocation8 + $0x4cc] sm:$0xf] }
 0x136   :  { %2343 = vmatpush.bf16.msrb.mxu3 %v3817_v29  ;;  %v4377_v29 = vor.u32 %v5039_v23, %v4376_v22  ;;  %v4889_v22 = vld [vmem:[#allocation8 + $0x2cc] sm:$0xf]  ;;  %v3786_v23 = vld [vmem:[#allocation8 + $0x2d8] sm:$0xf0] }
 0x137   :  { %v4042_v11 = vld [vmem:[#allocation8 + $0x4d8] sm:$0xf0] }
 0x138   :  { %2354 = vmatpush.bf16.msra.mxu0 %v3993_v31  ;;  %2368 = vmatpush.bf16.msra.mxu1 %v4121_v32  ;;  %v4232_v31 = vld [vmem:[#allocation8 + $0x648] sm:$0xf]  ;;  %v5003_v32 = vld [vmem:[#allocation8 + $0x654] sm:$0xf0] }
 0x139   :  { %2378 = vmatpush.bf16.msra.mxu2 %v4313_v35  ;;  %2344 = vmatmul.bf16.vlgmr.msrb.gmra.mxu3 %v5500_v9  ;;  %v4360_v35 = vld [vmem:[#allocation8 + $0x748] sm:$0xf]  ;;  %v4233_v42 = vor.u32 %v5003_v32, %v4232_v31  ;;  %v3789_v31 = vor.u32 %v4889_v22, %v3786_v23  ;;  %v3917_v32 = vor.u32 %v4921_v24, %v3914_v25  ;;  %v3850_v22 = vld [vmem:[#allocation8 + $0x358] sm:$0xf0]  ;;  %v4949_v23 = vld [vmem:[#allocation8 + $0x4ac] sm:$0xf] }
 0x13a   :  { %2392 = vmatpush.bf16.msra.mxu3 %v4441_v36  ;;  %2330 = vmatmul.bf16.vlgmr.msrb.gmra.mxu2 %v5497_v3  ;;  %v5035_v36 = vld [vmem:[#allocation8 + $0x754] sm:$0xf0] }
 0x13b   :  { %v4361_v43 = vor.u32 %v5035_v36, %v4360_v35  ;;  %v4885_v35 = vld [vmem:[#allocation8 + $0x2ac] sm:$0xf]  ;;  %v3770_v36 = vld [vmem:[#allocation8 + $0x2b8] sm:$0xf0] }
 0x13c   :  { %2355 = vmatpush.bf16.msra.mxu0 %v3977_v44  ;;  %2369 = vmatpush.bf16.msra.mxu1 %v4105_v45  ;;  %v4216_v44 = vld [vmem:[#allocation8 + $0x628] sm:$0xf]  ;;  %v4999_v45 = vld [vmem:[#allocation8 + $0x634] sm:$0xf0] }
 0x13d   :  { %2379 = vmatpush.bf16.msra.mxu2 %v4297_v49  ;;  %v4344_v49 = vld [vmem:[#allocation8 + $0x728] sm:$0xf]  ;;  %v4217_v55 = vor.u32 %v4999_v45, %v4216_v44  ;;  %v3434_v44 = vld [vmem:[#allocation8 + $0x18] sm:$0xf0]  ;;  %v4833_v45 = vld [vmem:[#allocation8 + $0x10c] sm:$0xf] }
 0x13e   :  { %2393 = vmatpush.bf16.msra.mxu3 %v4425_v50  ;;  %v5031_v50 = vld [vmem:[#allocation8 + $0x734] sm:$0xf0] }
 0x13f   :  { %v4345_v56 = vor.u32 %v5031_v50, %v4344_v49  ;;  %v3562_v49 = vld [vmem:[#allocation8 + $0x118] sm:$0xf0]  ;;  %v4881_v50 = vld [vmem:[#allocation8 + $0x28c] sm:$0xf] }
 0x140   :  { %2356 = vmatpush.bf16.msra.mxu0 %v3961_v46  ;;  %2370 = vmatpush.bf16.msra.mxu1 %v4089_v57  ;;  %v4200_v46 = vld [vmem:[#allocation8 + $0x608] sm:$0xf]  ;;  %v4995_v57 = vld [vmem:[#allocation8 + $0x614] sm:$0xf0] }
 0x141   :  { %2380 = vmatpush.bf16.msra.mxu2 %v4281_v62  ;;  %v5027_v62 = vld [vmem:[#allocation8 + $0x714] sm:$0xf0]  ;;  %v4201_v30 = vor.u32 %v4995_v57, %v4200_v46  ;;  %v4186_v46 = vld [vmem:[#allocation8 + $0x5f8] sm:$0xf0] }
 0x142   :  { %2394 = vmatpush.bf16.msra.mxu3 %v4409_v1  ;;  %v4813_v1 = vld [vmem:[#allocation8 + $0x6c] sm:$0xf]  ;;  %v4329_v6 = vor.u32 %v5027_v62, %v4328_v59  ;;  %v3565_v59 = vor.u32 %v4833_v45, %v3562_v49 }
 0x143   :  { %v5538_v39 = vpop.f32.mrf.mxu0  ;;  %v4877_v62 = vld [vmem:[#allocation8 + $0x26c] sm:$0xf]  ;;  %v5540_v10 = vpop.f32.mrf.mxu1 }
 0x144   :  { %2357 = vmatpush.bf16.msra.mxu0 %v3945_v12  ;;  %2371 = vmatpush.bf16.msra.mxu1 %v4073_v13  ;;  %v3485_v12 = vor.u32 %v4813_v1, %v3482_v2  ;;  %v3613_v13 = vor.u32 %v4845_v4, %v3610_v7  ;;  %v3738_v1 = vld [vmem:[#allocation8 + $0x278] sm:$0xf0]  ;;  %v4909_v7 = vld [vmem:[#allocation8 + $0x36c] sm:$0xf] }
 0x145   :  { %2381 = vmatpush.bf16.msra.mxu2 %v4265_v14  ;;  %v4809_v14 = vld [vmem:[#allocation8 + $0x4c] sm:$0xf] }
 0x146   :  { %2395 = vmatpush.bf16.msra.mxu3 %v4393_v15  ;;  %v3466_v15 = vld [vmem:[#allocation8 + $0x58] sm:$0xf0]  ;;  %v4865_v45 = vld [vmem:[#allocation8 + $0x20c] sm:$0xf] }
 0x147   :  { %2358 = vmatmul.bf16.vlgmr.msra.gmra.mxu0 %v5492_v58  ;;  %2372 = vmatmul.bf16.vlgmr.msra.gmra.mxu1 %v5495_v0  ;;  %v3469_v26 = vor.u32 %v4809_v14, %v3466_v15  ;;  %v4873_v14 = vld [vmem:[#allocation8 + $0x24c] sm:$0xf]  ;;  %v3722_v15 = vld [vmem:[#allocation8 + $0x258] sm:$0xf0] }
 0x148   :  { %2406 = vmatpush.bf16.msrb.mxu0 %v3549_v20  ;;  %2420 = vmatpush.bf16.msrb.mxu1 %v3677_v21  ;;  %v4841_v20 = vld [vmem:[#allocation8 + $0x14c] sm:$0xf]  ;;  %v3594_v21 = vld [vmem:[#allocation8 + $0x158] sm:$0xf0] }
 0x149   :  { %2382 = vmatpush.bf16.msra.mxu2 %v4249_v28  ;;  %v3597_v27 = vor.u32 %v4841_v20, %v3594_v21  ;;  %v4805_v28 = vld [vmem:[#allocation8 + $0x2c] sm:$0xf] }
 0x14a   :  { %2396 = vmatpush.bf16.msra.mxu3 %v4377_v29  ;;  %v3450_v29 = vld [vmem:[#allocation8 + $0x38] sm:$0xf0]  ;;  %v4905_v21 = vld [vmem:[#allocation8 + $0x34c] sm:$0xf] }
 0x14b   :  { %v3453_v41 = vor.u32 %v4805_v28, %v3450_v29  ;;  %v4154_v28 = vld [vmem:[#allocation8 + $0x5b8] sm:$0xf0]  ;;  %v3725_v29 = vor.u32 %v4873_v14, %v3722_v15  ;;  %v5049_v15 = vld [vmem:[#allocation8 + $0x7cc] sm:$0xf] }
 0x14c   :  { %2407 = vmatpush.bf16.msrb.mxu0 %v3533_v33  ;;  %2421 = vmatpush.bf16.msrb.mxu1 %v3661_v34  ;;  %v4837_v33 = vld [vmem:[#allocation8 + $0x12c] sm:$0xf]  ;;  %v3578_v34 = vld [vmem:[#allocation8 + $0x138] sm:$0xf0] }
 0x14d   :  { %2383 = vmatpush.bf16.msra.mxu2 %v4233_v42  ;;  %v3581_v42 = vor.u32 %v4837_v33, %v3578_v34  ;;  %v3706_v33 = vld [vmem:[#allocation8 + $0x238] sm:$0xf0] }
 0x14e   :  { %2397 = vmatpush.bf16.msra.mxu3 %v4361_v43  ;;  %v4801_v43 = vld [vmem:[#allocation8 + $0xc] sm:$0xf]  ;;  %v4298_v14 = vld [vmem:[#allocation8 + $0x6d8] sm:$0xf0] }
 0x14f   :  { %v3437_v57 = vor.u32 %v4801_v43, %v3434_v44 }
 0x150   :  { %2408 = vmatpush.bf16.msrb.mxu0 %v3517_v47  ;;  %2422 = vmatpush.bf16.msrb.mxu1 %v3645_v48  ;;  %v3773_v47 = vor.u32 %v4885_v35, %v3770_v36  ;;  %v3901_v48 = vor.u32 %v4917_v37, %v3898_v38  ;;  %v4901_v36 = vld [vmem:[#allocation8 + $0x32c] sm:$0xf]  ;;  %v3834_v37 = vld [vmem:[#allocation8 + $0x338] sm:$0xf0] }
 0x151   :  { %2384 = vmatpush.bf16.msra.mxu2 %v4217_v55  ;;  %v4058_v55 = vld [vmem:[#allocation8 + $0x4f8] sm:$0xf0]  ;;  %v4945_v38 = vld [vmem:[#allocation8 + $0x48c] sm:$0xf]  ;;  %v3837_v44 = vor.u32 %v4901_v36, %v3834_v37 }
 0x152   :  { %2398 = vmatpush.bf16.msra.mxu3 %v4345_v56  ;;  %v4989_v56 = vld [vmem:[#allocation8 + $0x5ec] sm:$0xf]  ;;  %v4061_v2 = vor.u32 %v4957_v54, %v4058_v55  ;;  %v4122_v55 = vld [vmem:[#allocation8 + $0x578] sm:$0xf0] }
 0x153   :  { %v4189_v4 = vor.u32 %v4989_v56, %v4186_v46  ;;  %v4973_v54 = vld [vmem:[#allocation8 + $0x56c] sm:$0xf]  ;;  %v4410_v36 = vld [vmem:[#allocation8 + $0x7b8] sm:$0xf0] }
 0x154   :  { %2409 = vmatpush.bf16.msrb.mxu0 %v3501_v60  ;;  %2423 = vmatpush.bf16.msrb.mxu1 %v3629_v61  ;;  %v3757_v60 = vor.u32 %v4881_v50, %v3754_v51  ;;  %v3885_v61 = vor.u32 %v4913_v52, %v3882_v53  ;;  %v3818_v51 = vld [vmem:[#allocation8 + $0x318] sm:$0xf0]  ;;  %v4941_v52 = vld [vmem:[#allocation8 + $0x46c] sm:$0xf] }
 0x155   :  { %2385 = vmatpush.bf16.msra.mxu2 %v4201_v30  ;;  %v4985_v30 = vld [vmem:[#allocation8 + $0x5cc] sm:$0xf]  ;;  %v3994_v53 = vld [vmem:[#allocation8 + $0x478] sm:$0xf0] }
 0x156   :  { %2399 = vmatpush.bf16.msra.mxu3 %v4329_v6  ;;  %v4170_v6 = vld [vmem:[#allocation8 + $0x5d8] sm:$0xf0]  ;;  %v5021_v56 = vld [vmem:[#allocation8 + $0x6ec] sm:$0xf] }
 0x157   :  { %v4173_v20 = vor.u32 %v4985_v30, %v4170_v6  ;;  %v4969_v6 = vld [vmem:[#allocation8 + $0x54c] sm:$0xf] }
 0x158   :  { %2410 = vmatpush.bf16.msrb.mxu0 %v3485_v12  ;;  %2424 = vmatpush.bf16.msrb.mxu1 %v3613_v13  ;;  %v3741_v12 = vor.u32 %v4877_v62, %v3738_v1  ;;  %v3869_v13 = vor.u32 %v4909_v7, %v3866_v8  ;;  %v4125_v7 = vor.u32 %v4973_v54, %v4122_v55  ;;  %v4937_v8 = vld [vmem:[#allocation8 + $0x44c] sm:$0xf]  ;;  %v5071_v54 = vld [vmem:[#allocation11 + $0x74] sm:$0xf0]  ;;  %v4568_v55 = vld [vmem:[#allocation11 + $0xf0] sm:$0xf] }
 0x159   :  { %2434 = vmatpush.bf16.msrb.mxu2 %v3805_v16  ;;  %2400 = vmatmul.bf16.vlgmr.msra.gmra.mxu3 %v5518_v19  ;;  %v5542_v16 = vpop.f32.mrf.mxu0  ;;  %v5544_v24 = vpop.f32.mrf.mxu2 }
 0x15a   :  { %2448 = vmatpush.bf16.msrb.mxu3 %v3933_v18  ;;  %2386 = vmatmul.bf16.vlgmr.msra.gmra.mxu2 %v5516_v17  ;;  %v4045_v18 = vor.u32 %v4953_v40, %v4042_v11  ;;  %v5546_v25 = vpop.f32.mrf.mxu3  ;;  %v3978_v40 = vld [vmem:[#allocation8 + $0x458] sm:$0xf0] }
 0x15c   :  { %2411 = vmatpush.bf16.msrb.mxu0 %v3469_v26  ;;  %2425 = vmatpush.bf16.msrb.mxu1 %v3597_v27  ;;  %v4026_v26 = vld [vmem:[#allocation8 + $0x4b8] sm:$0xf0]  ;;  %v4981_v27 = vld [vmem:[#allocation8 + $0x5ac] sm:$0xf] }
 0x15d   :  { %2435 = vmatpush.bf16.msrb.mxu2 %v3789_v31  ;;  %v3853_v31 = vor.u32 %v4905_v21, %v3850_v22  ;;  %v4029_v34 = vor.u32 %v4949_v23, %v4026_v26  ;;  %v4157_v35 = vor.u32 %v4981_v27, %v4154_v28  ;;  %v3981_v21 = vor.u32 %v4937_v8, %v3978_v40  ;;  %v4933_v23 = vld [vmem:[#allocation8 + $0x42c] sm:$0xf]  ;;  %v3962_v26 = vld [vmem:[#allocation8 + $0x438] sm:$0xf0] }
 0x15e   :  { %2449 = vmatpush.bf16.msrb.mxu3 %v3917_v32  ;;  %v4869_v32 = vld [vmem:[#allocation8 + $0x22c] sm:$0xf]  ;;  %v4250_v8 = vld [vmem:[#allocation8 + $0x678] sm:$0xf0] }
 0x15f   :  { %v3709_v43 = vor.u32 %v4869_v32, %v3706_v33  ;;  %v4090_v32 = vld [vmem:[#allocation8 + $0x538] sm:$0xf0]  ;;  %v5013_v33 = vld [vmem:[#allocation8 + $0x6ac] sm:$0xf] }
 0x160   :  { %2412 = vmatpush.bf16.msrb.mxu0 %v3453_v41  ;;  %2426 = vmatpush.bf16.msrb.mxu1 %v3581_v42  ;;  %v4010_v41 = vld [vmem:[#allocation8 + $0x498] sm:$0xf0] }
 0x161   :  { %2436 = vmatpush.bf16.msrb.mxu2 %v3773_v47  ;;  %v4138_v42 = vld [vmem:[#allocation8 + $0x598] sm:$0xf0]  ;;  %v4013_v49 = vor.u32 %v4945_v38, %v4010_v41  ;;  %v5552_v46 = vpop.f32.mrf.mxu0  ;;  %v3965_v41 = vor.u32 %v4933_v23, %v3962_v26  ;;  %v5001_v23 = vld [vmem:[#allocation8 + $0x64c] sm:$0xf] }
 0x162   :  { %2450 = vmatpush.bf16.msrb.mxu3 %v3901_v48  ;;  %v3690_v47 = vld [vmem:[#allocation8 + $0x218] sm:$0xf0]  ;;  %v4897_v48 = vld [vmem:[#allocation8 + $0x30c] sm:$0xf]  ;;  %v5556_v62 = vpop.f32.mrf.mxu3 }
 0x163   :  { %v3693_v1 = vor.u32 %v4865_v45, %v3690_v47  ;;  %v4234_v26 = vld [vmem:[#allocation8 + $0x658] sm:$0xf0] }
 0x164   :  { %2413 = vmatpush.bf16.msrb.mxu0 %v3437_v57  ;;  %2427 = vmatpush.bf16.msrb.mxu1 %v3565_v59  ;;  %v4314_v57 = vld [vmem:[#allocation8 + $0x6f8] sm:$0xf0]  ;;  %v5053_v59 = vld [vmem:[#allocation8 + $0x7ec] sm:$0xf] }
 0x165   :  { %2437 = vmatpush.bf16.msrb.mxu2 %v3757_v60  ;;  %v4442_v60 = vld [vmem:[#allocation8 + $0x7f8] sm:$0xf0]  ;;  %v4317_v11 = vor.u32 %v5021_v56, %v4314_v57 }
 0x166   :  { %2451 = vmatpush.bf16.msrb.mxu3 %v3885_v61  ;;  %v5554_v61 = vpop.f32.mrf.mxu2  ;;  %v4445_v30 = vor.u32 %v5053_v59, %v4442_v60  ;;  %v5087_v56 = vld [vmem:[#allocation11 + $0xf4] sm:$0xf0] }
 0x167   :  { %2414 = vmatmul.bf16.vlgmr.msrb.gmra.mxu0 %v5482_v63  ;;  %2428 = vmatmul.bf16.vlgmr.msrb.gmra.mxu1 %v5484_v5  ;;  %v4977_v63 = vld [vmem:[#allocation8 + $0x58c] sm:$0xf]  ;;  %v5550_v5 = vpop.f32.mrf.mxu1 }
 0x168   :  { %2462 = vmatpush.bf16.msra.mxu0 %v4061_v2  ;;  %2476 = vmatpush.bf16.msra.mxu1 %v4189_v4  ;;  %v4141_v50 = vor.u32 %v4977_v63, %v4138_v42  ;;  %v3821_v2 = vor.u32 %v4897_v48, %v3818_v51  ;;  %v3997_v4 = vor.u32 %v4941_v52, %v3994_v53  ;;  %v4929_v42 = vld [vmem:[#allocation8 + $0x40c] sm:$0xf]  ;;  %v4074_v48 = vld [vmem:[#allocation8 + $0x518] sm:$0xf0]  ;;  %v4504_v53 = vld [vmem:[#allocation11 + $0x70] sm:$0xf] }
 0x169   :  { %2438 = vmatpush.bf16.msrb.mxu2 %v3741_v12  ;;  %v4106_v12 = vld [vmem:[#allocation8 + $0x558] sm:$0xf0]  ;;  %v5565_v38 = vpop.f32.mrf.mxu0  ;;  %v5041_v51 = vld [vmem:[#allocation8 + $0x78c] sm:$0xf]  ;;  %v4505_v40 = vor.u32 %v5071_v54, %v4504_v53 }
 0x16a   :  { %2452 = vmatpush.bf16.msrb.mxu3 %v3869_v13  ;;  %v5017_v13 = vld [vmem:[#allocation8 + $0x6cc] sm:$0xf]  ;;  %v4109_v22 = vor.u32 %v4969_v6, %v4106_v12  ;;  %v5569_v47 = vpop.f32.mrf.mxu3  ;;  %v4394_v52 = vld [vmem:[#allocation8 + $0x798] sm:$0xf0]  ;;  %v4496_v6 = vld [vmem:[#allocation11 + $0x60] sm:$0xf]  ;;  %v4569_v12 = vor.u32 %v5087_v56, %v4568_v55 }
 0x16b   :  { %v4301_v28 = vor.u32 %v5017_v13, %v4298_v14  ;;  %v4560_v14 = vld [vmem:[#allocation11 + $0xe0] sm:$0xf]  ;;  %v4993_v56 = vld [vmem:[#allocation8 + $0x60c] sm:$0xf] }
 0x16c   :  { %2463 = vmatpush.bf16.msra.mxu0 %v4045_v18  ;;  %2477 = vmatpush.bf16.msra.mxu1 %v4173_v20  ;;  %v4426_v18 = vld [vmem:[#allocation8 + $0x7d8] sm:$0xf0]  ;;  %v5558_v20 = vld [vmem:[#allocation10] sm:$0xf] }
 0x16d   :  { %2439 = vmatpush.bf16.msrb.mxu2 %v3725_v29  ;;  %v4429_v29 = vor.u32 %v5049_v15, %v4426_v18  ;;  %v782_v37 = vperm.slane %v5558_v20, 0  ;;  %v5085_v15 = vld [vmem:[#allocation11 + $0xe4] sm:$0xf0] }
 0x16e   :  { %2453 = vmatpush.bf16.msrb.mxu3 %v3853_v31  ;;  %v4965_v31 = vld [vmem:[#allocation8 + $0x52c] sm:$0xf]  ;;  %v5567_v45 = vpop.f32.mrf.mxu2 }
 0x16f   :  { %v5560_v27 = vpop.f32.mrf.mxu1  ;;  %v4093_v63 = vor.u32 %v4965_v31, %v4090_v32  ;;  %v2082_v57 = vadd.f32 %v5542_v16, %v782_v37  ;;  %v5069_v16 = vld [vmem:[#allocation11 + $0x64] sm:$0xf0] }
 0x170   :  { %2464 = vmatpush.bf16.msra.mxu0 %v4029_v34  ;;  %2478 = vmatpush.bf16.msra.mxu1 %v4157_v35  ;;  %v4282_v34 = vld [vmem:[#allocation8 + $0x6b8] sm:$0xf0]  ;;  %v5045_v35 = vld [vmem:[#allocation8 + $0x7ac] sm:$0xf]  ;;  %v4497_v31 = vor.u32 %v5069_v16, %v4496_v6 }
 0x171   :  { %2440 = vmatpush.bf16.msrb.mxu2 %v3709_v43  ;;  %v3946_v43 = vld [vmem:[#allocation8 + $0x418] sm:$0xf0]  ;;  %v2096_v18 = vadd.f32 %v5550_v5, %v2082_v57  ;;  %v5033_v32 = vld [vmem:[#allocation8 + $0x74c] sm:$0xf]  ;;  %v4488_v5 = vld [vmem:[#allocation11 + $0x50] sm:$0xf] }
 0x172   :  { %2454 = vmatpush.bf16.msrb.mxu3 %v3837_v44  ;;  %v4961_v44 = vld [vmem:[#allocation8 + $0x50c] sm:$0xf]  ;;  %v3949_v59 = vor.u32 %v4929_v42, %v3946_v43  ;;  %v4202_v57 = vld [vmem:[#allocation8 + $0x618] sm:$0xf0] }
 0x173   :  { %v4077_v60 = vor.u32 %v4961_v44, %v4074_v48  ;;  %v4997_v43 = vld [vmem:[#allocation8 + $0x62c] sm:$0xf]  ;;  %v4218_v44 = vld [vmem:[#allocation8 + $0x638] sm:$0xf0] }
 0x174   :  { %2465 = vmatpush.bf16.msra.mxu0 %v4013_v49  ;;  %2479 = vmatpush.bf16.msra.mxu1 %v4141_v50  ;;  %v5009_v49 = vld [vmem:[#allocation8 + $0x68c] sm:$0xf]  ;;  %v4266_v50 = vld [vmem:[#allocation8 + $0x698] sm:$0xf0]  ;;  %v4221_v54 = vor.u32 %v4997_v43, %v4218_v44  ;;  %v5070_v44 = vld [vmem:[#allocation11 + $0x74] sm:$0xf] }
 0x175   :  { %2441 = vmatpush.bf16.msrb.mxu2 %v3693_v1  ;;  %v2080_v1 = vadd.f32 %v5538_v39, %v782_v37  ;;  %v4552_v37 = vld [vmem:[#allocation11 + $0xd0] sm:$0xf]  ;;  %v4346_v48 = vld [vmem:[#allocation8 + $0x738] sm:$0xf0]  ;;  %v5057_v43 = vld [vmem:[#allocation11 + $0x4] sm:$0xf0] }
 0x176   :  { %2455 = vmatpush.bf16.msrb.mxu3 %v3821_v2  ;;  %v4269_v2 = vor.u32 %v5009_v49, %v4266_v50  ;;  %v4480_v49 = vld [vmem:[#allocation11 + $0x40] sm:$0xf]  ;;  %v5065_v50 = vld [vmem:[#allocation11 + $0x44] sm:$0xf0] }
 0x177   :  { %v5573_v13 = vpop.f32.mrf.mxu1  ;;  %v2094_v39 = vadd.f32 %v5540_v10, %v2080_v1  ;;  %v5581_v10 = vpop.f32.mrf.mxu2  ;;  %v4330_v1 = vld [vmem:[#allocation8 + $0x718] sm:$0xf0] }
 0x178   :  { %2466 = vmatpush.bf16.msra.mxu0 %v3997_v4  ;;  %2480 = vmatpush.bf16.msra.mxu1 %v4125_v7  ;;  %v4397_v4 = vor.u32 %v5041_v51, %v4394_v52  ;;  %v5005_v7 = vld [vmem:[#allocation8 + $0x66c] sm:$0xf]  ;;  %v4544_v51 = vld [vmem:[#allocation11 + $0xc0] sm:$0xf] }
 0x179   :  { %2490 = vmatpush.bf16.msra.mxu2 %v4317_v11  ;;  %2456 = vmatmul.bf16.vlgmr.msrb.gmra.mxu3 %v5500_v9  ;;  %v4413_v9 = vor.u32 %v5045_v35, %v4410_v36  ;;  %v5037_v11 = vld [vmem:[#allocation8 + $0x76c] sm:$0xf]  ;;  %v2108_v35 = vadd.f32 %v5544_v24, %v2094_v39  ;;  %v5583_v36 = vpop.f32.mrf.mxu3 }
 0x17a   :  { %2504 = vmatpush.bf16.msra.mxu3 %v4445_v30  ;;  %2442 = vmatmul.bf16.vlgmr.msrb.gmra.mxu2 %v5497_v3  ;;  %v4285_v3 = vor.u32 %v5013_v33, %v4282_v34  ;;  %v4378_v30 = vld [vmem:[#allocation8 + $0x778] sm:$0xf0]  ;;  %v4561_v34 = vor.u32 %v5085_v15, %v4560_v14  ;;  %v5081_v52 = vld [vmem:[#allocation11 + $0xc4] sm:$0xf0] }
 0x17b   :  { %v4362_v33 = vld [vmem:[#allocation8 + $0x758] sm:$0xf0] }
 0x17c   :  { %2467 = vmatpush.bf16.msra.mxu0 %v3981_v21  ;;  %2481 = vmatpush.bf16.msra.mxu1 %v4109_v22  ;;  %v4253_v21 = vor.u32 %v5005_v7, %v4250_v8  ;;  %v4381_v22 = vor.u32 %v5037_v11, %v4378_v30  ;;  %v4365_v42 = vor.u32 %v5033_v32, %v4362_v33  ;;  %v5063_v7 = vld [vmem:[#allocation11 + $0x34] sm:$0xf0]  ;;  %v4536_v8 = vld [vmem:[#allocation11 + $0xb0] sm:$0xf]  ;;  %v783_v11 = vperm.slane %v5558_v20, 1 }
 0x17d   :  { %2491 = vmatpush.bf16.msra.mxu2 %v4301_v28  ;;  %v2110_v28 = vadd.f32 %v5554_v61, %v2096_v18  ;;  %v5067_v61 = vld [vmem:[#allocation11 + $0x54] sm:$0xf0]  ;;  %v4464_v18 = vld [vmem:[#allocation11 + $0x20] sm:$0xf]  ;;  %v4456_v32 = vld [vmem:[#allocation11 + $0x10] sm:$0xf] }
 0x17e   :  { %2505 = vmatpush.bf16.msra.mxu3 %v4429_v29  ;;  %v5578_v29 = vpop.f32.mrf.mxu0  ;;  %v4489_v24 = vor.u32 %v5067_v61, %v4488_v5 }
 0x17f   :  { %v2205_v53 = vpop.f32.mrf.mxu1  ;;  %v2219_v6 = vpop.f32.mrf.mxu2 }
 0x180   :  { %2468 = vmatpush.bf16.msra.mxu0 %v3965_v41  ;;  %2482 = vmatpush.bf16.msra.mxu1 %v4093_v63  ;;  %v5083_v41 = vld [vmem:[#allocation11 + $0xd4] sm:$0xf0]  ;;  %v4237_v63 = vor.u32 %v5001_v23, %v4234_v26  ;;  %v5077_v23 = vld [vmem:[#allocation11 + $0xa4] sm:$0xf0]  ;;  %v2192_v26 = vadd.f32 %v5578_v29, %v783_v11 }
 0x181   :  { %2492 = vmatpush.bf16.msra.mxu2 %v4285_v3  ;;  %v2124_v3 = vadd.f32 %v5556_v62, %v2110_v28 }
 0x182   :  { %2506 = vmatpush.bf16.msra.mxu3 %v4413_v9  ;;  %v5029_v9 = vld [vmem:[#allocation8 + $0x72c] sm:$0xf]  ;;  %v2206_v61 = vadd.f32 %v2205_v53, %v2192_v26  ;;  %v5064_v26 = vld [vmem:[#allocation11 + $0x44] sm:$0xf] }
 0x183   :  { %v4349_v55 = vor.u32 %v5029_v9, %v4346_v48  ;;  %v2138_v62 = vadd.f32 %v5565_v38, %v2124_v3  ;;  %v4205_v38 = vor.u32 %v4993_v56, %v4202_v57  ;;  %v4506_v48 = vld [vmem:[#allocation11 + $0x78] sm:$0xf0] }
 0x184   :  { %2469 = vmatpush.bf16.msra.mxu0 %v3949_v59  ;;  %2483 = vmatpush.bf16.msra.mxu1 %v4077_v60  ;;  %v4481_v59 = vor.u32 %v5065_v50, %v4480_v49  ;;  %v5025_v60 = vld [vmem:[#allocation8 + $0x70c] sm:$0xf] }
 0x185   :  { %2493 = vmatpush.bf16.msra.mxu2 %v4269_v2  ;;  %v4472_v2 = vld [vmem:[#allocation11 + $0x30] sm:$0xf]  ;;  %v4333_v16 = vor.u32 %v5025_v60, %v4330_v1  ;;  %v2152_v14 = vadd.f32 %v5573_v13, %v2138_v62  ;;  %v5073_v49 = vld [vmem:[#allocation11 + $0x84] sm:$0xf0]  ;;  %v4498_v60 = vld [vmem:[#allocation11 + $0x68] sm:$0xf0] }
 0x186   :  { %2507 = vmatpush.bf16.msra.mxu3 %v4397_v4  ;;  %v4545_v4 = vor.u32 %v5081_v52, %v4544_v51  ;;  %v2193_v30 = vpop.f32.mrf.mxu0  ;;  %v4473_v15 = vor.u32 %v5063_v7, %v4472_v2  ;;  %v5084_v1 = vld [vmem:[#allocation11 + $0xe4] sm:$0xf]  ;;  %v4562_v2 = vld [vmem:[#allocation11 + $0xe8] sm:$0xf0] }
 0x187   :  { %2470 = vmatmul.bf16.vlgmr.msra.gmra.mxu0 %v5492_v58  ;;  %2484 = vmatmul.bf16.vlgmr.msra.gmra.mxu1 %v5495_v0  ;;  %v4553_v58 = vor.u32 %v5083_v41, %v4552_v37  ;;  %v2122_v0 = vadd.f32 %v5546_v25, %v2108_v35  ;;  %v2166_v28 = vadd.f32 %v5581_v10, %v2152_v14  ;;  %v2207_v5 = vpop.f32.mrf.mxu1  ;;  %v4520_v35 = vld [vmem:[#allocation11 + $0x90] sm:$0xf] }
 0x188   :  { %2936 = vmatpush.bf16.msrb.mxu0 %v4505_v40  ;;  %2950 = vmatpush.bf16.msrb.mxu1 %v4569_v12  ;;  %v5079_v40 = vld [vmem:[#allocation11 + $0xb4] sm:$0xf0]  ;;  %v2233_v12 = vpop.f32.mrf.mxu3  ;;  %v2194_v29 = vadd.f32 %v2193_v30, %v783_v11  ;;  %v2220_v10 = vadd.f32 %v2219_v6, %v2206_v61  ;;  %v5066_v30 = vld [vmem:[#allocation11 + $0x54] sm:$0xf]  ;;  %v4490_v6 = vld [vmem:[#allocation11 + $0x58] sm:$0xf0] }
 0x189   :  { %2494 = vmatpush.bf16.msra.mxu2 %v4253_v21  ;;  %v2136_v25 = vadd.f32 %v5552_v46, %v2122_v0  ;;  %v4537_v39 = vor.u32 %v5079_v40, %v4536_v8  ;;  %v5061_v21 = vld [vmem:[#allocation11 + $0x24] sm:$0xf0]  ;;  %v2180_v37 = vadd.f32 %v5583_v36, %v2166_v28  ;;  %v4512_v36 = vld [vmem:[#allocation11 + $0x80] sm:$0xf]  ;;  %v4570_v0 = vld [vmem:[#allocation11 + $0xf8] sm:$0xf0] }
 0x18a   :  { %2508 = vmatpush.bf16.msra.mxu3 %v4381_v22  ;;  %v4528_v22 = vld [vmem:[#allocation11 + $0xa0] sm:$0xf]  ;;  %v4465_v13 = vor.u32 %v5061_v21, %v4464_v18  ;;  %v2234_v50 = vadd.f32 %v2233_v12, %v2220_v10  ;;  %v4513_v52 = vor.u32 %v5073_v49, %v4512_v36  ;;  %v4565_v12 = vor.u32 %v5084_v1, %v4562_v2  ;;  %v4632_v18 = vld [vmem:[#allocation11 + $0x170] sm:$0xf]  ;;  %v4482_v28 = vld [vmem:[#allocation11 + $0x48] sm:$0xf0] }
 0x18b   :  { %v2150_v46 = vadd.f32 %v5560_v27, %v2136_v25  ;;  %v4529_v33 = vor.u32 %v5077_v23, %v4528_v22  ;;  %v5075_v27 = vld [vmem:[#allocation11 + $0x94] sm:$0xf0]  ;;  %vm2522_vm1 = vcmp.gt.f32.partialorder %v2180_v37, 0.0  ;;  %v4493_v23 = vor.u32 %v5066_v30, %v4490_v6  ;;  %v5060_v49 = vld [vmem:[#allocation11 + $0x24] sm:$0xf] }
 0x18c   :  { %2937 = vmatpush.bf16.msrb.mxu0 %v4497_v31  ;;  %2951 = vmatpush.bf16.msrb.mxu1 %v4561_v34  ;;  %v5059_v34 = vld [vmem:[#allocation11 + $0x14] sm:$0xf0]  ;;  %v4521_v3 = vor.u32 %v5075_v27, %v4520_v35  ;;  %v4458_v2 = vld [vmem:[#allocation11 + $0x18] sm:$0xf0]  ;;  %v5056_v6 = vld [vmem:[#allocation11 + $0x4] sm:$0xf] }
 0x18d   :  { %2495 = vmatpush.bf16.msra.mxu2 %v4237_v63  ;;  %v2164_v31 = vadd.f32 %v5567_v45, %v2150_v46  ;;  %v4457_v63 = vor.u32 %v5059_v34, %v4456_v32  ;;  %v4546_v32 = vld [vmem:[#allocation11 + $0xc8] sm:$0xf0]  ;;  %v5101_v34 = vld [vmem:[#allocation11 + $0x164] sm:$0xf0]  ;;  %v5095_v1 = vld [vmem:[#allocation11 + $0x134] sm:$0xf0] }
 0x18e   :  { %2509 = vmatpush.bf16.msra.mxu3 %v4365_v42  ;;  %v2247_v41 = vpop.f32.mrf.mxu0  ;;  %v4448_v42 = vld [vmem:[#allocation11] sm:$0xf] }
 0x18f   :  { %v2178_v45 = vadd.f32 %v5569_v47, %v2164_v31  ;;  %v4449_v51 = vor.u32 %v5057_v43, %v4448_v42  ;;  %v2261_v53 = vpop.f32.mrf.mxu1  ;;  %v2248_v62 = vadd.f32 %v2247_v41, %v2234_v50  ;;  %v4485_v41 = vor.u32 %v5064_v26, %v4482_v28  ;;  %v4538_v43 = vld [vmem:[#allocation11 + $0xb8] sm:$0xf0]  ;;  %v5089_v26 = vld [vmem:[#allocation11 + $0x104] sm:$0xf0] }
 0x190   :  { %2938 = vmatpush.bf16.msrb.mxu0 %v4489_v24  ;;  %2952 = vmatpush.bf16.msrb.mxu1 %v4553_v58  ;;  %v2221_v24 = vpop.f32.mrf.mxu2  ;;  %v2235_v9 = vpop.f32.mrf.mxu3  ;;  %v2530_v58 = vmul.f32 0.2, %v2180_v37 }
 0x191   :  { %2496 = vmatpush.bf16.msra.mxu2 %v4221_v54  ;;  %v2526_v47 = vmul.f32 0.2, %v2178_v45  ;;  %vm2518_vm2 = vcmp.gt.f32.partialorder %v2178_v45, 0.0  ;;  %v4509_v54 = vor.u32 %v5070_v44, %v4506_v48  ;;  %v4616_v44 = vld [vmem:[#allocation11 + $0x150] sm:$0xf] }
 0x192   :  { %2510 = vmatpush.bf16.msra.mxu3 %v4349_v55  ;;  %v5068_v55 = vld [vmem:[#allocation11 + $0x64] sm:$0xf]  ;;  %v2538_v57 = vsel %vm2522_vm1, %v2180_v37, %v2530_v58  ;;  %v4466_v58 = vld [vmem:[#allocation11 + $0x28] sm:$0xf0] }
 0x193   :  { %v4501_v11 = vor.u32 %v5068_v55, %v4498_v60  ;;  %v4600_v60 = vld [vmem:[#allocation11 + $0x130] sm:$0xf] }
 0x194   :  { %2939 = vmatpush.bf16.msrb.mxu0 %v4481_v59  ;;  %2953 = vmatpush.bf16.msrb.mxu1 %v4545_v4  ;;  %v2534_v4 = vsel %vm2518_vm2, %v2178_v45, %v2526_v47  ;;  %v5062_v45 = vld [vmem:[#allocation11 + $0x34] sm:$0xf]  ;;  %v4530_v47 = vld [vmem:[#allocation11 + $0xa8] sm:$0xf0] }
 0x195   :  { %2497 = vmatpush.bf16.msra.mxu2 %v4205_v38  ;;  %v5601_v7 = vpack.c.bf16 %v2538_v57, %v2534_v4  ;;  %v5082_v38 = vld [vmem:[#allocation11 + $0xd4] sm:$0xf]  ;;  %v4469_v57 = vor.u32 %v5060_v49, %v4466_v58 }
 0x196   :  { %2511 = vmatpush.bf16.msra.mxu3 %v4333_v16  ;;  %v2249_v25 = vpop.f32.mrf.mxu0  ;;  %v2262_v16 = vadd.f32 %v2261_v53, %v2248_v62  ;;  %v5058_v62 = vld [vmem:[#allocation11 + $0x14] sm:$0xf] }
 0x197   :  { %v5074_v4 = vld [vmem:[#allocation11 + $0x94] sm:$0xf]  ;;  %v4461_v30 = vor.u32 %v5058_v62, %v4458_v2 }
 0x198   :  { %2940 = vmatpush.bf16.msrb.mxu0 %v4473_v15  ;;  %2954 = vmatpush.bf16.msrb.mxu1 %v4537_v39  ;;  %v4554_v15 = vld [vmem:[#allocation11 + $0xd8] sm:$0xf0]  ;;  %v5103_v39 = vld [vmem:[#allocation11 + $0x174] sm:$0xf0] }
 0x199   :  { %2498 = vmatmul.bf16.vlgmr.msra.gmra.mxu2 %v5516_v17  ;;  %2512 = vmatmul.bf16.vlgmr.msra.gmra.mxu3 %v5518_v19  ;;  %v5086_v17 = vld [vmem:[#allocation11 + $0xf4] sm:$0xf]  ;;  %v2208_v19 = vadd.f32 %v2207_v5, %v2194_v29  ;;  %v4633_v46 = vor.u32 %v5103_v39, %v4632_v18  ;;  %v4557_v31 = vor.u32 %v5082_v38, %v4554_v15  ;;  %v2263_v5 = vpop.f32.mrf.mxu1  ;;  %v4474_v29 = vld [vmem:[#allocation11 + $0x38] sm:$0xf0]  ;;  %v4450_v38 = vld [vmem:[#allocation11 + $0x8] sm:$0xf0] }
 0x19a   :  { %v4573_v56 = vor.u32 %v5086_v17, %v4570_v0  ;;  %v4477_v17 = vor.u32 %v5062_v45, %v4474_v29  ;;  %v4584_v18 = vld [vmem:[#allocation11 + $0x110] sm:$0xf]  ;;  %v5091_v39 = vld [vmem:[#allocation11 + $0x114] sm:$0xf0]  ;;  %v784_v45 = vperm.slane %v5558_v20, 2 }
 0x19b   :  { %v2222_v59 = vadd.f32 %v2221_v24, %v2208_v19  ;;  %2964 = vmatpush.bf16.msrb.mxu2 %v4633_v46  ;;  %v5076_v19 = vld [vmem:[#allocation11 + $0xa4] sm:$0xf]  ;;  %v4453_v46 = vor.u32 %v5056_v6, %v4450_v38 }
 0x19c   :  { %2941 = vmatpush.bf16.msrb.mxu0 %v4465_v13  ;;  %2955 = vmatpush.bf16.msrb.mxu1 %v4529_v33  ;;  %v2289_v40 = vpop.f32.mrf.mxu3  ;;  %v5080_v13 = vld [vmem:[#allocation11 + $0xc4] sm:$0xf]  ;;  %v4624_v33 = vld [vmem:[#allocation11 + $0x160] sm:$0xf] }
 0x19d   :  { %v2275_v8 = vpop.f32.mrf.mxu2  ;;  %v2236_v14 = vadd.f32 %v2235_v9, %v2222_v59  ;;  %v4625_v61 = vor.u32 %v5101_v34, %v4624_v33  ;;  %v4549_v10 = vor.u32 %v5080_v13, %v4546_v32  ;;  %v4533_v59 = vor.u32 %v5076_v19, %v4530_v47  ;;  %v4634_v13 = vld [vmem:[#allocation11 + $0x178] sm:$0xf0]  ;;  %v4626_v34 = vld [vmem:[#allocation11 + $0x168] sm:$0xf0] }
 0x19e   :  { %v2276_v22 = vadd.f32 %v2275_v8, %v2262_v16  ;;  %v4601_v8 = vor.u32 %v5095_v1, %v4600_v60  ;;  %v5072_v16 = vld [vmem:[#allocation11 + $0x84] sm:$0xf]  ;;  %v4578_v1 = vld [vmem:[#allocation11 + $0x108] sm:$0xf0] }
 0x19f   :  { %v2250_v21 = vadd.f32 %v2249_v25, %v2236_v14  ;;  %2965 = vmatpush.bf16.msrb.mxu2 %v4625_v61  ;;  %v4522_v25 = vld [vmem:[#allocation11 + $0x98] sm:$0xf0]  ;;  %v4514_v14 = vld [vmem:[#allocation11 + $0x88] sm:$0xf0]  ;;  %v5098_v61 = vld [vmem:[#allocation11 + $0x154] sm:$0xf] }
 0x1a0   :  { %2942 = vmatpush.bf16.msrb.mxu0 %v4457_v63  ;;  %2956 = vmatpush.bf16.msrb.mxu1 %v4521_v3  ;;  %v2290_v27 = vadd.f32 %v2289_v40, %v2276_v22  ;;  %v5078_v63 = vld [vmem:[#allocation11 + $0xb4] sm:$0xf]  ;;  %v5099_v3 = vld [vmem:[#allocation11 + $0x154] sm:$0xf0]  ;;  %v4592_v40 = vld [vmem:[#allocation11 + $0x120] sm:$0xf]  ;;  %v4585_v22 = vor.u32 %v5091_v39, %v4584_v18 }
 0x1a1   :  { %v2264_v35 = vadd.f32 %v2263_v5, %v2250_v21  ;;  %v4617_v9 = vor.u32 %v5099_v3, %v4616_v44  ;;  %v4541_v0 = vor.u32 %v5078_v63, %v4538_v43  ;;  %v4517_v21 = vor.u32 %v5072_v16, %v4514_v14  ;;  %v5100_v5 = vld [vmem:[#allocation11 + $0x164] sm:$0xf]  ;;  %v5094_v3 = vld [vmem:[#allocation11 + $0x134] sm:$0xf]  ;;  %v4688_v14 = vld [vmem:[#allocation11 + $0x1e0] sm:$0xf] }
 0x1a2   :  { %v2527_v48 = vmul.f32 0.2, %v2290_v27  ;;  %vm2519_vm3 = vcmp.gt.f32.partialorder %v2290_v27, 0.0  ;;  %v5088_v60 = vld [vmem:[#allocation11 + $0x104] sm:$0xf] }
 0x1a3   :  { %2966 = vmatpush.bf16.msrb.mxu2 %v4617_v9 }
 0x1a4   :  { %2943 = vmatpush.bf16.msrb.mxu0 %v4449_v51  ;;  %2957 = vmatpush.bf16.msrb.mxu1 %v4513_v52  ;;  %v2291_v24 = vpop.f32.mrf.mxu3  ;;  %v4608_v51 = vld [vmem:[#allocation11 + $0x140] sm:$0xf]  ;;  %v5097_v52 = vld [vmem:[#allocation11 + $0x144] sm:$0xf0]  ;;  %v2535_v53 = vsel %vm2519_vm3, %v2290_v27, %v2527_v48  ;;  %v2303_v32 = vpop.f32.mrf.mxu0  ;;  %v5092_v48 = vld [vmem:[#allocation11 + $0x124] sm:$0xf] }
 0x1a5   :  { %v2277_v37 = vpop.f32.mrf.mxu2  ;;  %v4609_v55 = vor.u32 %v5097_v52, %v4608_v51  ;;  %v2317_v27 = vpop.f32.mrf.mxu1  ;;  %v2304_v44 = vadd.f32 %v2303_v32, %v784_v45  ;;  %v4586_v51 = vld [vmem:[#allocation11 + $0x118] sm:$0xf0] }
 0x1a6   :  { %v2278_v42 = vadd.f32 %v2277_v37, %v2264_v35  ;;  %v4629_v35 = vor.u32 %v5100_v5, %v4626_v34  ;;  %v4618_v37 = vld [vmem:[#allocation11 + $0x158] sm:$0xf0]  ;;  %v4672_v5 = vld [vmem:[#allocation11 + $0x1c0] sm:$0xf]  ;;  %v5113_v34 = vld [vmem:[#allocation11 + $0x1c4] sm:$0xf0] }
 0x1a7   :  { %2944 = vmatmul.bf16.vlgmr.msrb.gmra.mxu0 %v5601_v7  ;;  %2967 = vmatpush.bf16.msrb.mxu2 %v4609_v55  ;;  %v2318_v58 = vadd.f32 %v2317_v27, %v2304_v44  ;;  %v5107_v44 = vld [vmem:[#allocation11 + $0x194] sm:$0xf0] }
 0x1a8   :  { %2992 = vmatpush.bf16.msra.mxu0 %v4509_v54  ;;  %3006 = vmatpush.bf16.msra.mxu1 %v4573_v56  ;;  %v2292_v36 = vadd.f32 %v2291_v24, %v2278_v42  ;;  %v5096_v42 = vld [vmem:[#allocation11 + $0x144] sm:$0xf]  ;;  %v4602_v24 = vld [vmem:[#allocation11 + $0x138] sm:$0xf0] }
 0x1a9   :  { %v4605_v9 = vor.u32 %v5094_v3, %v4602_v24  ;;  %v4640_v24 = vld [vmem:[#allocation11 + $0x180] sm:$0xf] }
 0x1aa   :  { %vm2523_vm4 = vcmp.gt.f32.partialorder %v2292_v36, 0.0  ;;  %v2531_v50 = vmul.f32 0.2, %v2292_v36 }
 0x1ab   :  { %2968 = vmatpush.bf16.msrb.mxu2 %v4601_v8  ;;  %v5119_v8 = vld [vmem:[#allocation11 + $0x1f4] sm:$0xf0] }
 0x1ac   :  { %2993 = vmatpush.bf16.msra.mxu0 %v4501_v11  ;;  %3007 = vmatpush.bf16.msra.mxu1 %v4565_v12  ;;  %v2539_v54 = vsel %vm2523_vm4, %v2292_v36, %v2531_v50  ;;  %v5093_v11 = vld [vmem:[#allocation11 + $0x124] sm:$0xf0]  ;;  %v4525_v12 = vor.u32 %v5074_v4, %v4522_v25  ;;  %v2305_v29 = vpop.f32.mrf.mxu0  ;;  %v4594_v36 = vld [vmem:[#allocation11 + $0x128] sm:$0xf0]  ;;  %v5090_v50 = vld [vmem:[#allocation11 + $0x114] sm:$0xf]  ;;  %v4581_v4 = vor.u32 %v5088_v60, %v4578_v1 }
 0x1ad   :  { %v2543_v56 = vpack.c.bf16 %v2539_v54, %v2535_v53  ;;  %v4593_v15 = vor.u32 %v5093_v11, %v4592_v40  ;;  %v2319_v49 = vpop.f32.mrf.mxu1  ;;  %v2306_v19 = vadd.f32 %v2305_v29, %v784_v45  ;;  %v4589_v54 = vor.u32 %v5090_v50, %v4586_v51  ;;  %v4696_v25 = vld [vmem:[#allocation11 + $0x1f0] sm:$0xf]  ;;  %v5111_v45 = vld [vmem:[#allocation11 + $0x1b4] sm:$0xf0]  ;;  %v5114_v50 = vld [vmem:[#allocation11 + $0x1d4] sm:$0xf] }
 0x1ae   :  { %v4682_v51 = vld [vmem:[#allocation11 + $0x1d8] sm:$0xf0]  ;;  %v5110_v1 = vld [vmem:[#allocation11 + $0x1b4] sm:$0xf] }
 0x1af   :  { %2958 = vmatmul.bf16.vlgmr.msrb.gmra.mxu1 %v2543_v56  ;;  %2969 = vmatpush.bf16.msrb.mxu2 %v4593_v15  ;;  %v2320_v55 = vadd.f32 %v2319_v49, %v2306_v19  ;;  %v5117_v15 = vld [vmem:[#allocation11 + $0x1e4] sm:$0xf0]  ;;  %v4698_v49 = vld [vmem:[#allocation11 + $0x1f8] sm:$0xf0]  ;;  %v4690_v19 = vld [vmem:[#allocation11 + $0x1e8] sm:$0xf0] }
 0x1b0   :  { %2994 = vmatpush.bf16.msra.mxu0 %v4493_v23  ;;  %3008 = vmatpush.bf16.msra.mxu1 %v4557_v31  ;;  %v4576_v23 = vld [vmem:[#allocation11 + $0x100] sm:$0xf]  ;;  %v5102_v31 = vld [vmem:[#allocation11 + $0x174] sm:$0xf]  ;;  %v4689_v18 = vor.u32 %v5117_v15, %v4688_v14 }
 0x1b1   :  { %v4577_v28 = vor.u32 %v5089_v26, %v4576_v23  ;;  %v4637_v33 = vor.u32 %v5102_v31, %v4634_v13  ;;  %v5115_v23 = vld [vmem:[#allocation11 + $0x1d4] sm:$0xf0]  ;;  %v5106_v15 = vld [vmem:[#allocation11 + $0x194] sm:$0xf] }
 0x1b3   :  { %2970 = vmatpush.bf16.msrb.mxu2 %v4585_v22  ;;  %v4680_v22 = vld [vmem:[#allocation11 + $0x1d0] sm:$0xf] }
 0x1b4   :  { %2995 = vmatpush.bf16.msra.mxu0 %v4485_v41  ;;  %3009 = vmatpush.bf16.msra.mxu1 %v4549_v10  ;;  %v4621_v41 = vor.u32 %v5098_v61, %v4618_v37 }
 0x1b7   :  { %2971 = vmatpush.bf16.msrb.mxu2 %v4577_v28  ;;  %v4681_v28 = vor.u32 %v5115_v23, %v4680_v22 }
 0x1b8   :  { %2996 = vmatpush.bf16.msra.mxu0 %v4477_v17  ;;  %3010 = vmatpush.bf16.msra.mxu1 %v4541_v0  ;;  %v4597_v0 = vor.u32 %v5092_v48, %v4594_v36  ;;  %v5118_v36 = vld [vmem:[#allocation11 + $0x1f4] sm:$0xf] }
 0x1bb   :  { %3020 = vmatpush.bf16.msra.mxu2 %v4637_v33 }
 0x1bc   :  { %2997 = vmatpush.bf16.msra.mxu0 %v4469_v57  ;;  %3011 = vmatpush.bf16.msra.mxu1 %v4533_v59  ;;  %v2345_v63 = vpop.f32.mrf.mxu3 }
 0x1bd   :  { %v2331_v10 = vpop.f32.mrf.mxu2 }
 0x1be   :  { %v2332_v47 = vadd.f32 %v2331_v10, %v2318_v58  ;;  %v4701_v58 = vor.u32 %v5118_v36, %v4698_v49  ;;  %v5125_v36 = vld [vmem:[#allocation13 + $0x28] sm:$0xff]  ;;  %v5124_v49 = vld [vmem:[#allocation13 + $0x20] sm:$0xff] }
 0x1bf   :  { %3021 = vmatpush.bf16.msra.mxu2 %v4629_v35  ;;  %v4673_v35 = vor.u32 %v5113_v34, %v4672_v5 }
 0x1c0   :  { %2998 = vmatpush.bf16.msra.mxu0 %v4461_v30  ;;  %3012 = vmatpush.bf16.msra.mxu1 %v4525_v12  ;;  %v4697_v30 = vor.u32 %v5119_v8, %v4696_v25  ;;  %v5108_v8 = vld [vmem:[#allocation11 + $0x1a4] sm:$0xf] }
 0x1c2   :  { %2978 = vmatpush.bf16.msrb.mxu3 %v4697_v30 }
 0x1c3   :  { %3022 = vmatpush.bf16.msra.mxu2 %v4621_v41  ;;  %v4664_v41 = vld [vmem:[#allocation11 + $0x1b0] sm:$0xf] }
 0x1c4   :  { %2999 = vmatpush.bf16.msra.mxu0 %v4453_v46  ;;  %3013 = vmatpush.bf16.msra.mxu1 %v4517_v21  ;;  %v2359_v17 = vpop.f32.mrf.mxu0  ;;  %v2347_v53 = vpop.f32.mrf.mxu3  ;;  %v4665_v10 = vor.u32 %v5111_v45, %v4664_v41 }
 0x1c5   :  { %v2333_v52 = vpop.f32.mrf.mxu2  ;;  %v2373_v57 = vpop.f32.mrf.mxu1 }
 0x1c6   :  { %v2334_v59 = vadd.f32 %v2333_v52, %v2320_v55  ;;  %2979 = vmatpush.bf16.msrb.mxu3 %v4689_v18  ;;  %v4685_v52 = vor.u32 %v5114_v50, %v4682_v51  ;;  %v4674_v55 = vld [vmem:[#allocation11 + $0x1c8] sm:$0xf0]  ;;  %v4650_v18 = vld [vmem:[#allocation11 + $0x198] sm:$0xf0]  ;;  %v5120_v51 = vld [vmem:[#allocation13] sm:$0xff] }
 0x1c7   :  { %3000 = vmatmul.bf16.vlgmr.msra.gmra.mxu0 %v5601_v7  ;;  %3014 = vmatmul.bf16.vlgmr.msra.gmra.mxu1 %v2543_v56  ;;  %v4610_v7 = vld [vmem:[#allocation11 + $0x148] sm:$0xf0]  ;;  %v2346_v56 = vadd.f32 %v2345_v63, %v2332_v47  ;;  %v4656_v63 = vld [vmem:[#allocation11 + $0x1a0] sm:$0xf] }
 0x1c8   :  { %v4613_v43 = vor.u32 %v5096_v42, %v4610_v7  ;;  %v2348_v12 = vadd.f32 %v2347_v53, %v2334_v59  ;;  %v5109_v42 = vld [vmem:[#allocation11 + $0x1a4] sm:$0xf0] }
 0x1c9   :  { %v2360_v62 = vadd.f32 %v2359_v17, %v2346_v56  ;;  %v4657_v7 = vor.u32 %v5109_v42, %v4656_v63  ;;  %v785_v56 = vperm.slane %v5558_v20, 3  ;;  %v5133_v50 = vld [vmem:[#allocation13 + $0x68] sm:$0xff] }
 0x1ca   :  { %3023 = vmatpush.bf16.msra.mxu2 %v4613_v43  ;;  %2980 = vmatpush.bf16.msrb.mxu3 %v4681_v28  ;;  %v4648_v43 = vld [vmem:[#allocation11 + $0x190] sm:$0xf] }
 0x1cb   :  { %v2374_v6 = vadd.f32 %v2373_v57, %v2360_v62  ;;  %v4649_v3 = vor.u32 %v5107_v44, %v4648_v43 }
 0x1cc   :  { %v2361_v2 = vpop.f32.mrf.mxu0 }
 0x1cd   :  { %v2362_v38 = vadd.f32 %v2361_v2, %v2348_v12  ;;  %v2375_v39 = vpop.f32.mrf.mxu1  ;;  %v4666_v2 = vld [vmem:[#allocation11 + $0x1b8] sm:$0xf0] }
 0x1ce   :  { %3024 = vmatpush.bf16.msra.mxu2 %v4605_v9  ;;  %2981 = vmatpush.bf16.msrb.mxu3 %v4673_v35  ;;  %v5105_v9 = vld [vmem:[#allocation11 + $0x184] sm:$0xf0]  ;;  %v4669_v25 = vor.u32 %v5110_v1, %v4666_v2  ;;  %v5128_v1 = vld [vmem:[#allocation13 + $0x40] sm:$0xff] }
 0x1cf   :  { %v2376_v46 = vadd.f32 %v2375_v39, %v2362_v38  ;;  %v4641_v48 = vor.u32 %v5105_v9, %v4640_v24  ;;  %v5104_v39 = vld [vmem:[#allocation11 + $0x184] sm:$0xf]  ;;  %v5127_v9 = vld [vmem:[#allocation13 + $0x38] sm:$0xff] }
 0x1d0   :  { %3194 = vmatpush.bf16.msrb.mxu0 %v5127_v9 }
 0x1d2   :  { %3025 = vmatpush.bf16.msra.mxu2 %v4597_v0  ;;  %2982 = vmatpush.bf16.msrb.mxu3 %v4665_v10  ;;  %v5116_v0 = vld [vmem:[#allocation11 + $0x1e4] sm:$0xf] }
 0x1d3   :  { %v4693_v47 = vor.u32 %v5116_v0, %v4690_v19  ;;  %v5122_v0 = vld [vmem:[#allocation13 + $0x10] sm:$0xff] }
 0x1d4   :  { %v5134_v19 = vld [vmem:[#allocation13 + $0x70] sm:$0xff] }
 0x1d6   :  { %3026 = vmatpush.bf16.msra.mxu2 %v4589_v54  ;;  %2983 = vmatpush.bf16.msrb.mxu3 %v4657_v7  ;;  %v5112_v54 = vld [vmem:[#allocation11 + $0x1c4] sm:$0xf] }
 0x1d7   :  { %v4677_v62 = vor.u32 %v5112_v54, %v4674_v55  ;;  %v5130_v54 = vld [vmem:[#allocation13 + $0x50] sm:$0xff] }
 0x1da   :  { %3027 = vmatpush.bf16.msra.mxu2 %v4581_v4  ;;  %2984 = vmatpush.bf16.msrb.mxu3 %v4649_v3 }
 0x1dc   :  { %v2401_v11 = vpop.f32.mrf.mxu3 }
 0x1dd   :  { %v2387_v40 = vpop.f32.mrf.mxu2 }
 0x1de   :  { %v2388_v16 = vadd.f32 %v2387_v40, %v2374_v6  ;;  %2985 = vmatpush.bf16.msrb.mxu3 %v4641_v48  ;;  %v4658_v40 = vld [vmem:[#allocation11 + $0x1a8] sm:$0xf0]  ;;  %v5126_v48 = vld [vmem:[#allocation13 + $0x30] sm:$0xff] }
 0x1df   :  { %3195 = vmatpush.bf16.msrb.mxu0 %v5126_v48 }
 0x1e0   :  { %v2402_v21 = vadd.f32 %v2401_v11, %v2388_v16  ;;  %v4661_v11 = vor.u32 %v5108_v8, %v4658_v40 }
 0x1e2   :  { %v2528_v32 = vmul.f32 0.2, %v2402_v21  ;;  %vm2520_vm5 = vcmp.gt.f32.partialorder %v2402_v21, 0.0  ;;  %3034 = vmatpush.bf16.msra.mxu3 %v4701_v58  ;;  %v5123_v58 = vld [vmem:[#allocation13 + $0x18] sm:$0xff] }
 0x1e3   :  { %3196 = vmatpush.bf16.msrb.mxu0 %v5125_v36 }
 0x1e4   :  { %v2403_v13 = vpop.f32.mrf.mxu3  ;;  %v2536_v61 = vsel %vm2520_vm5, %v2402_v21, %v2528_v32  ;;  %v2415_v17 = vpop.f32.mrf.mxu0  ;;  %v4642_v21 = vld [vmem:[#allocation11 + $0x188] sm:$0xf0] }
 0x1e5   :  { %v2389_v26 = vpop.f32.mrf.mxu2  ;;  %v2429_v53 = vpop.f32.mrf.mxu1  ;;  %v2416_v4 = vadd.f32 %v2415_v17, %v785_v56  ;;  %v5135_v17 = vld [vmem:[#allocation13 + $0x78] sm:$0xff] }
 0x1e6   :  { %v2390_v31 = vadd.f32 %v2389_v26, %v2376_v46  ;;  %3035 = vmatpush.bf16.msra.mxu3 %v4693_v47  ;;  %v4653_v46 = vor.u32 %v5106_v15, %v4650_v18  ;;  %v4645_v26 = vor.u32 %v5104_v39, %v4642_v21  ;;  %3208 = vmatpush.bf16.msrb.mxu1 %v5135_v17  ;;  %v5121_v47 = vld [vmem:[#allocation13 + $0x8] sm:$0xff] }
 0x1e7   :  { %v2430_v6 = vadd.f32 %v2429_v53, %v2416_v4  ;;  %3197 = vmatpush.bf16.msrb.mxu0 %v5124_v49  ;;  %v5131_v53 = vld [vmem:[#allocation13 + $0x58] sm:$0xff] }
 0x1e8   :  { %v2404_v33 = vadd.f32 %v2403_v13, %v2390_v31 }
 0x1ea   :  { %vm2524_vm6 = vcmp.gt.f32.partialorder %v2404_v33, 0.0  ;;  %v2532_v27 = vmul.f32 0.2, %v2404_v33  ;;  %3036 = vmatpush.bf16.msra.mxu3 %v4685_v52  ;;  %3209 = vmatpush.bf16.msrb.mxu1 %v5134_v19  ;;  %v5132_v52 = vld [vmem:[#allocation13 + $0x60] sm:$0xff] }
 0x1eb   :  { %3198 = vmatpush.bf16.msrb.mxu0 %v5123_v58 }
 0x1ec   :  { %v2540_v37 = vsel %vm2524_vm6, %v2404_v33, %v2532_v27  ;;  %v2417_v57 = vpop.f32.mrf.mxu0 }
 0x1ed   :  { %v2544_v29 = vpack.c.bf16 %v2540_v37, %v2536_v61  ;;  %v2431_v30 = vpop.f32.mrf.mxu1  ;;  %v2418_v38 = vadd.f32 %v2417_v57, %v785_v56 }
 0x1ee   :  { %3037 = vmatpush.bf16.msra.mxu3 %v4677_v62  ;;  %3210 = vmatpush.bf16.msrb.mxu1 %v5133_v50  ;;  %v5129_v62 = vld [vmem:[#allocation13 + $0x48] sm:$0xff] }
 0x1ef   :  { %2972 = vmatmul.bf16.vlgmr.msrb.gmra.mxu2 %v2544_v29  ;;  %v2432_v22 = vadd.f32 %v2431_v30, %v2418_v38  ;;  %3199 = vmatpush.bf16.msrb.mxu0 %v5122_v0 }
 0x1f2   :  { %3038 = vmatpush.bf16.msra.mxu3 %v4669_v25  ;;  %3211 = vmatpush.bf16.msrb.mxu1 %v5132_v52 }
 0x1f3   :  { %3200 = vmatpush.bf16.msrb.mxu0 %v5121_v47 }
 0x1f6   :  { %3039 = vmatpush.bf16.msra.mxu3 %v4661_v11  ;;  %3212 = vmatpush.bf16.msrb.mxu1 %v5131_v53 }
 0x1f7   :  { %3201 = vmatpush.bf16.msrb.mxu0 %v5120_v51 }
 0x1fa   :  { %3040 = vmatpush.bf16.msra.mxu3 %v4653_v46  ;;  %3213 = vmatpush.bf16.msrb.mxu1 %v5130_v54 }
 0x1fc   :  { %v2457_v60 = vpop.f32.mrf.mxu3 }
 0x1fd   :  { %v2443_v59 = vpop.f32.mrf.mxu2 }
 0x1fe   :  { %v2444_v16 = vadd.f32 %v2443_v59, %v2430_v6  ;;  %3041 = vmatpush.bf16.msra.mxu3 %v4645_v26  ;;  %v2610_v59 = vld [vmem:[%s5625_s6] sm:$0x3]  ;;  %3214 = vmatpush.bf16.msrb.mxu1 %v5129_v62 }
 0x1ff   :  { %3028 = vmatmul.bf16.vlgmr.msra.gmra.mxu2 %v2544_v29  ;;  %v2613_v21 = vperm.slane %v2610_v59, 1 }
 0x200   :  { %v2458_v23 = vadd.f32 %v2457_v60, %v2444_v16  ;;  %v2612_v60 = vperm.slane %v2610_v59, 0 }
 0x202   :  { %3215 = vmatpush.bf16.msrb.mxu1 %v5128_v1 }
 0x204   :  { %v2471_v12 = vpop.f32.mrf.mxu0  ;;  %v2459_v14 = vpop.f32.mrf.mxu3 }
 0x205   :  { %v2445_v20 = vpop.f32.mrf.mxu2  ;;  %v2485_v28 = vpop.f32.mrf.mxu1  ;;  %v2472_v31 = vadd.f32 %v2471_v12, %v2458_v23 }
 0x206   :  { %v2446_v13 = vadd.f32 %v2445_v20, %v2432_v22 }
 0x207   :  { %v2486_v34 = vadd.f32 %v2485_v28, %v2472_v31 }
 0x208   :  { %v2460_v35 = vadd.f32 %v2459_v14, %v2446_v13 }
 0x20c   :  { %v2473_v32 = vpop.f32.mrf.mxu0 }
 0x20d   :  { %v2474_v27 = vadd.f32 %v2473_v32, %v2460_v35  ;;  %v2487_v37 = vpop.f32.mrf.mxu1 }
 0x20f   :  { %v2488_v41 = vadd.f32 %v2487_v37, %v2474_v27 }
 0x21c   :  { %v2499_v33 = vpop.f32.mrf.mxu2  ;;  %v2513_v5 = vpop.f32.mrf.mxu3 }
 0x21d   :  { %v2500_v61 = vadd.f32 %v2499_v33, %v2486_v34 }
 0x21f   :  { %v2514_v45 = vadd.f32 %v2513_v5, %v2500_v61 }
 0x221   :  { %v2529_v42 = vmul.f32 0.2, %v2514_v45  ;;  %vm2521_vm7 = vcmp.gt.f32.partialorder %v2514_v45, 0.0 }
 0x223   :  { %v2537_v44 = vsel %vm2521_vm7, %v2514_v45, %v2529_v42 }
 0x224   :  { %v2501_v29 = vpop.f32.mrf.mxu2  ;;  %v2515_v63 = vpop.f32.mrf.mxu3 }
 0x225   :  { %v2502_v10 = vadd.f32 %v2501_v29, %v2488_v41  ;;  %v2945_v55 = vpop.f32.mrf.mxu0 }
 0x226   :  { %v2946_v25 = vadd.f32 %v2945_v55, %v2612_v60 }
 0x227   :  { %v2516_v7 = vadd.f32 %v2515_v63, %v2502_v10 }
 0x229   :  { %vm2525_vm8 = vcmp.gt.f32.partialorder %v2516_v7, 0.0  ;;  %v2533_v43 = vmul.f32 0.2, %v2516_v7 }
 0x22b   :  { %v2541_v3 = vsel %vm2525_vm8, %v2516_v7, %v2533_v43 }
 0x22c   :  { %v2545_v24 = vpack.c.bf16 %v2541_v3, %v2537_v44  ;;  %v2959_v56 = vpop.f32.mrf.mxu1  ;;  %v5157_v3 = vld [vmem:[%s5627_s8] ss:$0 sm:$0xff]  ;;  %s5383_s8 = smov [#allocation14]  }
 0x22d   :  { %v2947_v2 = vpop.f32.mrf.mxu0  ;;  %v2960_v11 = vadd.f32 %v2959_v56, %v2946_v25  ;;  %s3268_s26 = sshll.u32 %s5383_s8, 4  ;;  %s3269_s26 = int_to_ptr.vmem [resolvable:$true] %s3268_s26 }
 0x22e   :  { %2986 = vmatmul.bf16.vlgmr.msrb.gmra.mxu3 %v2545_v24  ;;  %v2948_v30 = vadd.f32 %v2947_v2, %v2612_v60 }
 0x234   :  { %v2961_v4 = vpop.f32.mrf.mxu1 }
 0x235   :  { %v2962_v12 = vadd.f32 %v2961_v4, %v2948_v30 }
 0x23e   :  { %3042 = vmatmul.bf16.vlgmr.msra.gmra.mxu3 %v2545_v24 }
 0x244   :  { %v3001_v16 = vpop.f32.mrf.mxu0  ;;  %v3015_v14 = vpop.f32.mrf.mxu1 }
 0x245   :  { %v3002_v31 = vadd.f32 %v3001_v16, %v2613_v21 }
 0x247   :  { %v3016_v33 = vadd.f32 %v3015_v14, %v3002_v31 }
 0x24c   :  { %v3003_v13 = vpop.f32.mrf.mxu0  ;;  %v3017_v5 = vpop.f32.mrf.mxu1 }
 0x24d   :  { %v3004_v34 = vadd.f32 %v3003_v13, %v2613_v21 }
 0x24f   :  { %v3018_v61 = vadd.f32 %v3017_v5, %v3004_v34 }
 0x272   :  { %v2973_v57 = vpop.f32.mrf.mxu2 }
 0x273   :  { %v2974_v6 = vadd.f32 %v2973_v57, %v2960_v11 }
 0x27a   :  { %v2975_v8 = vpop.f32.mrf.mxu2 }
 0x27b   :  { %v2976_v20 = vadd.f32 %v2975_v8, %v2962_v12 }
 0x282   :  { %v3029_v46 = vpop.f32.mrf.mxu2 }
 0x283   :  { %v3030_v35 = vadd.f32 %v3029_v46, %v3016_v33 }
 0x28a   :  { %v3031_v27 = vpop.f32.mrf.mxu2 }
 0x28b   :  { %v3032_v41 = vadd.f32 %v3031_v27, %v3018_v61 }
 0x2b1   :  { %v2987_v40 = vpop.f32.mrf.mxu3 }
 0x2b2   :  { %v2988_v38 = vadd.f32 %v2987_v40, %v2974_v6 }
 0x2b4   :  { %v3052_v18 = vmul.f32 0.2, %v2988_v38  ;;  %vm3048_vm9 = vcmp.gt.f32.partialorder %v2988_v38, 0.0 }
 0x2b6   :  { %v3056_v23 = vsel %vm3048_vm9, %v2988_v38, %v3052_v18 }
 0x2b9   :  { %v2989_v15 = vpop.f32.mrf.mxu3 }
 0x2ba   :  { %v2990_v39 = vadd.f32 %v2989_v15, %v2976_v20 }
 0x2bc   :  { %vm3050_vm10 = vcmp.gt.f32.partialorder %v2990_v39, 0.0  ;;  %v3054_v22 = vmul.f32 0.2, %v2990_v39 }
 0x2be   :  { %v3058_v26 = vsel %vm3050_vm10, %v2990_v39, %v3054_v22 }
 0x2bf   :  { %v3060_v28 = vpack.c.bf16 %v3058_v26, %v3056_v23 }
 0x2c1   :  { %v3043_v32 = vpop.f32.mrf.mxu3  ;;  %3202 = vmatmul.bf16.vlgmr.msrb.gmra.mxu0 %v3060_v28 }
 0x2c2   :  { %v3044_v37 = vadd.f32 %v3043_v32, %v3030_v35 }
 0x2c4   :  { %v3053_v29 = vmul.f32 0.2, %v3044_v37  ;;  %vm3049_vm11 = vcmp.gt.f32.partialorder %v3044_v37, 0.0 }
 0x2c6   :  { %v3057_v42 = vsel %vm3049_vm11, %v3044_v37, %v3053_v29 }
 0x2c9   :  { %v3045_v45 = vpop.f32.mrf.mxu3 }
 0x2ca   :  { %v3046_v10 = vadd.f32 %v3045_v45, %v3032_v41 }
 0x2cc   :  { %vm3051_vm12 = vcmp.gt.f32.partialorder %v3046_v10, 0.0  ;;  %v3055_v63 = vmul.f32 0.2, %v3046_v10 }
 0x2ce   :  { %v3059_v7 = vsel %vm3051_vm12, %v3046_v10, %v3055_v63 }
 0x2cf   :  { %v3061_v43 = vpack.c.bf16 %v3059_v7, %v3057_v42 }
 0x2d1   :  { %3216 = vmatmul.bf16.vlgmr.msrb.gmra.mxu1 %v3061_v43 }
 0x33e   :  { %v3203_v44 = vpop.f32.mrf.mxu0 }
 0x33f   :  { %v3204_v24 = vadd.f32 %v5157_v3, %v3203_v44 }
 0x346   :  { %v3205_v49 = vpop.f32.mrf.mxu0 }
 0x347   :  { %v3206_v58 = vadd.f32 %v5157_v3, %v3205_v49 }
 0x34e   :  { %v3217_v9 = vpop.f32.mrf.mxu1 }
 0x34f   :  { %v3218_v48 = vadd.f32 %v3217_v9, %v3204_v24 }
 0x351   :  { %v4766_v36 = vmul.f32 -1.442695, %v3218_v48 }
 0x353   :  { %5158 = vpow2.f32 %v4766_v36 }
 0x356   :  { %v3219_v17 = vpop.f32.mrf.mxu1 }
 0x357   :  { %v3220_v0 = vadd.f32 %v3219_v17, %v3206_v58 }
 0x359   :  { %v5159_v19 = vpop.eup %5158  ;;  %v4767_v47 = vmul.f32 -1.442695, %v3220_v0 }
 0x35a   :  { %v3228_v50 = vadd.f32 1.0, %v5159_v19 }
 0x35b   :  { %5160 = vpow2.f32 %v4767_v47 }
 0x35c   :  { %5162 = vrcp.f32 %v3228_v50  ;;  %vm3235_vm14 = vweird.f32 %v3228_v50  ;;  %v3241_v1 = vand.u32 2147483648, %v3228_v50  ;;  %v3239_v4 = vand.u32 2147483647, %v3228_v50 }
 0x35e   :  { %v3242_v30 = vor.u32 1.1754944e-38, %v3241_v1  ;;  %vm3240_vm3 = vcmp.eq.f32.partialorder %v3239_v4, 8.507059e+37 }
 0x361   :  { %v5161_v51 = vpop.eup %5160 }
 0x362   :  { %v5163_v52 = vpop.eup %5162  ;;  %v3229_v53 = vadd.f32 1.0, %v5161_v51 }
 0x363   :  { %v3231_v54 = vmul.f32 %v5163_v52, %v3228_v50  ;;  %vm3236_vm13 = vweird.f32 %v5163_v52 }
 0x364   :  { %5164 = vrcp.f32 %v3229_v53  ;;  %v3256_v2 = vand.u32 2147483648, %v3229_v53  ;;  %v3254_v8 = vand.u32 2147483647, %v3229_v53  ;;  %vm3237_vm0 = vmor %vm3235_vm14, %vm3236_vm13  ;;  %vm3250_vm1 = vweird.f32 %v3229_v53 }
 0x365   :  { %v3232_v55 = vsub.f32 1.0, %v3231_v54 }
 0x366   :  { %v3257_v6 = vor.u32 1.1754944e-38, %v3256_v2  ;;  %vm3255_vm4 = vcmp.eq.f32.partialorder %v3254_v8, 8.507059e+37 }
 0x367   :  { %v3233_v56 = vmul.f32 %v5163_v52, %v3232_v55 }
 0x369   :  { %v3234_v60 = vadd.f32 %v5163_v52, %v3233_v56 }
 0x36a   :  { %v5165_v57 = vpop.eup %5164 }
 0x36b   :  { %v3246_v62 = vmul.f32 %v5165_v57, %v3229_v53  ;;  %vm3251_vm15 = vweird.f32 %v5165_v57  ;;  %v3238_v40 = vsel %vm3237_vm0, %v5163_v52, %v3234_v60 }
 0x36c   :  { %vm3252_vm2 = vmor %vm3250_vm1, %vm3251_vm15  ;;  %v3243_v38 = vsel %vm3240_vm3, %v3242_v30, %v3238_v40 }
 0x36d   :  { %v3247_v59 = vsub.f32 1.0, %v3246_v62 }
 0x36f   :  { %v3248_v25 = vmul.f32 %v5165_v57, %v3247_v59 }
 0x371   :  { %v3249_v11 = vadd.f32 %v5165_v57, %v3248_v25 }
 0x373   :  { %v3253_v12 = vsel %vm3252_vm2, %v5165_v57, %v3249_v11 }
 0x374   :  { %v3258_v16 = vsel %vm3255_vm4, %v3257_v6, %v3253_v12 }
 0x375   :  { %v5139_v20 = vpack.c.bf16 %v3258_v16, %v3243_v38 }
 0x377   :  { %5140 = vst [vmem:[#allocation14] sm:$0xff] %v5139_v20  }
 0x378   :  { %3276 = dma.vmem_to_hbm [thread:$0]  %s3269_s26, 128, %s3271_s28, [#allocation4], %s5381_s23, %s5381_s23, %s5382_s24  }
 0x379   :  { %5366 = dma.done.wait [#allocation4], 128  }
 0x37a   :  { %5367 = vsyncadd [#allocation4], 4294967168 }
 0x37b   :  { %3281 = vsyncpa [#allocation3], 1 }
 0x37c   :  { %3282 = vsyncpa [#allocation6], 1 }
 0x37d   :  { %3283 = vsyncpa [#allocation9], 1 }
 0x37e   :  { %3284 = vsyncpa [#allocation12], 1 }
 0x37f   :  { %3285 = vsyncpa [#allocation4], 1 }

</bundles_post_ra>
